<compile_context>
chip_gen: v7x
topology: tpu7x:2x2x1
jax: 0.10.0
libtpu: 0.0.40
codegen_flags: <defaults>
</compile_context>

<pallas_src>
import numpy as np
import jax
import jax.numpy as jnp
from jax import lax
from jax.experimental import pallas as pl
from jax.experimental.pallas import tpu as pltpu


TB   = 8            # samples per grid step
NROW = TB * 32      # raw image rows per batch tile (sublane axis of the conv1 matmuls)
NV1  = NROW - 4     # conv1 output rows per tile (row b*32+i; only i < 28 is valid/used)
NP1  = TB * 16      # pool1 rows per tile (16-row slab per sample, 14 valid)
NV2  = NP1 - 4      # conv2 output rows per tile (row b*16+i2; only i2 < 10 is valid/used)


# ---------------------------------------------------------------------------
# Fused forward kernel
# ---------------------------------------------------------------------------
def cifarnet_kernel(x_ref, t1_ref, b1c_ref, e0_ref, e1_ref,
                    t2_ref, b2c_ref, f0_ref, f1_ref,
                    w1_ref, b1f_ref, w2_ref, b2f_ref, w3_ref, b3f_ref,
                    o_ref, p1_ref):
    f32 = jnp.float32

    # ---- conv1: 5 row-shifted Toeplitz matmuls over raw image rows ---------------------
    # x_ref[b*32+i, c*32+j] = image[b, c, i, j]
    # t1_ref[di][c*32+jj, (j%2)*128 + (j//2)*6 + co] = w1[co, c, di, jj-j]
    acc1 = jnp.zeros((NV1, 256), f32)
    for di in range(5):
        acc1 = acc1 + jnp.dot(x_ref[di:di + NV1, :], t1_ref[di],
                              preferred_element_type=f32)
    a1 = jnp.maximum(acc1 + b1c_ref[...], 0.0)
    # pool over j: the two 2x2-pool halves are vreg-aligned 128-lane blocks
    pj1 = jnp.maximum(a1[:, :128], a1[:, 128:])
    # pool over i: exact 0/1 row-pair selection matmuls -> 16-row slab per sample
    p1_ref[...] = jnp.maximum(
        jnp.dot(e0_ref[...], pj1, preferred_element_type=f32),
        jnp.dot(e1_ref[...], pj1, preferred_element_type=f32))

    # ---- conv2: same row-Toeplitz trick over the pooled map ----------------------------
    # p1_ref[b*16+pi, pj*6+ci] = pool1[b, ci, pi, pj]
    acc2 = jnp.zeros((NV2, 256), f32)
    for di in range(5):
        acc2 = acc2 + jnp.dot(p1_ref[di:di + NV2, :], t2_ref[di],
                              preferred_element_type=f32)
    a2 = jnp.maximum(acc2 + b2c_ref[...], 0.0)
    pj2 = jnp.maximum(a2[:, :128], a2[:, 128:])     # (NV2, 128): lane = pj2*16 + co2

    # ---- pool2 + flatten + fc1 fused: per pooled row pi2, select the two source rows per
    # sample (0/1 matmuls), max them, accumulate that row's fc1 contribution --------------
    h = jnp.zeros((TB, 128), f32)
    for pi2 in range(5):
        p2 = jnp.maximum(
            jnp.dot(f0_ref[pi2], pj2, preferred_element_type=f32),
            jnp.dot(f1_ref[pi2], pj2, preferred_element_type=f32))
        h = h + jnp.dot(p2, w1_ref[pi2], preferred_element_type=f32)
    h = jnp.maximum(h + b1f_ref[...], 0.0)
    h = jnp.maximum(jnp.dot(h, w2_ref[...], preferred_element_type=f32) + b2f_ref[...], 0.0)
    o_ref[...] = (jnp.dot(h, w3_ref[...], preferred_element_type=f32)
                  + b3f_ref[...]).astype(o_ref.dtype)


# ---------------------------------------------------------------------------
# pallas_call wrapper
# ---------------------------------------------------------------------------
def cifarnet_forward(x, prep):
    """Pallas forward. x: (B, 3, 32, 32) float32 -> logits (B, 10)."""
    B = x.shape[0]
    bp = ((B + TB - 1) // TB) * TB
    if bp != B:
        x = jnp.pad(x, ((0, bp - B), (0, 0), (0, 0), (0, 0)))
    # Layout plumbing only (12 KB/sample): rows = image row i, lanes = c*32 + j.
    xrows = jnp.transpose(x, (0, 2, 1, 3)).reshape(bp * 32, 96)

    rep2 = lambda s: pl.BlockSpec(s, lambda i: (0, 0))
    rep3 = lambda s: pl.BlockSpec(s, lambda i: (0, 0, 0))
    out = pl.pallas_call(
        cifarnet_kernel,
        out_shape=jax.ShapeDtypeStruct((bp, 128), jnp.float32),
        grid=(bp // TB,),
        in_specs=[
            pl.BlockSpec((NROW, 96), lambda i: (i, 0)),   # image rows for this batch tile
            rep3((5, 96, 256)),    # T1: conv1 row-Toeplitz weights
            rep2((1, 256)),        # conv1 bias (pool-half lane layout)
            rep2((NP1, NV1)),      # E0: pool1 even-row selector
            rep2((NP1, NV1)),      # E1: pool1 odd-row selector
            rep3((5, 128, 256)),   # T2: conv2 row-Toeplitz weights
            rep2((1, 256)),        # conv2 bias
            rep3((5, TB, NV2)),    # F0: pool2 even-row selectors (per pooled row)
            rep3((5, TB, NV2)),    # F1: pool2 odd-row selectors
            rep3((5, 128, 128)),   # fc1 weights, split per pooled row (flatten order baked in)
            rep2((1, 128)),        # fc1 bias (padded 120->128)
            rep2((128, 128)),      # fc2 weights (padded)
            rep2((1, 128)),        # fc2 bias
            rep2((128, 128)),      # fc3 weights (lane-dense 128-wide output slab)
            rep2((1, 128)),        # fc3 bias
        ],
        out_specs=pl.BlockSpec((TB, 128), lambda i: (i, 0)),
        scratch_shapes=[pltpu.VMEM((NP1, 128), jnp.float32)],
        # TODO(synk): on v7x, if xprof shows single-TC occupancy, switch this axis to
        #             pltpu.CORE_PARALLEL (or an explicit core_map split of the batch tiles).
        compiler_params=pltpu.CompilerParams(dimension_semantics=("parallel",)),
    )(xrows, *prep)
    return out[:B, :10]


# ---------------------------------------------------------------------------
# Parameters and one-time weight-side preparation
# ---------------------------------------------------------------------------
def init_params(key):
    """Deterministic init with PyTorch nn.Conv2d / nn.Linear parameter shapes."""
    ks = jax.random.split(key, 10)

    def u(k, shape, fan_in):
        b = 1.0 / float(np.sqrt(fan_in))
        return jax.random.uniform(k, shape, jnp.float32, -b, b)

    return (u(ks[0], (6, 3, 5, 5), 75), u(ks[1], (6,), 75),
            u(ks[2], (16, 6, 5, 5), 150), u(ks[3], (16,), 150),
            u(ks[4], (120, 400), 400), u(ks[5], (120,), 400),
            u(ks[6], (84, 120), 120), u(ks[7], (84,), 120),
            u(ks[8], (10, 84), 84), u(ks[9], (10,), 84))


def prepare_params(params):
    """One-time layout prep: Toeplitz conv matrices, pool selectors, padded fc weights."""
    (c1w, c1b, c2w, c2b, f1w, f1b, f2w, f2b, f3w, f3b) = [np.asarray(p) for p in params]

    # conv1 row-Toeplitz: output lane = (j%2)*128 + (j//2)*6 + co  (28 output cols, 6 channels)
    t1 = np.zeros((5, 96, 256), np.float32)
    for di in range(5):
        for c in range(3):
            for dj in range(5):
                for co in range(6):
                    for j in range(28):
                        t1[di, c * 32 + j + dj,
                           (j % 2) * 128 + (j // 2) * 6 + co] = c1w[co, c, di, dj]
    b1c = np.zeros((1, 256), np.float32)
    for co in range(6):
        for j in range(28):
            b1c[0, (j % 2) * 128 + (j // 2) * 6 + co] = c1b[co]

    # pool1 row-pair selectors: P1 row b*16+pi <- max(rows b*32+2pi, b*32+2pi+1)
    e0 = np.zeros((NP1, NV1), np.float32)
    e1 = np.zeros((NP1, NV1), np.float32)
    for b in range(TB):
        for pi in range(14):
            e0[b * 16 + pi, b * 32 + 2 * pi] = 1.0
            e1[b * 16 + pi, b * 32 + 2 * pi + 1] = 1.0

    # conv2 row-Toeplitz: input lane = pj*6 + ci, output lane = (j2%2)*128 + (j2//2)*16 + co2
    t2 = np.zeros((5, 128, 256), np.float32)
    for di in range(5):
        for ci in range(6):
            for dj in range(5):
                for co in range(16):
                    for j2 in range(10):
                        t2[di, (j2 + dj) * 6 + ci,
                           (j2 % 2) * 128 + (j2 // 2) * 16 + co] = c2w[co, ci, di, dj]
    b2c = np.zeros((1, 256), np.float32)
    for co in range(16):
        for j2 in range(10):
            b2c[0, (j2 % 2) * 128 + (j2 // 2) * 16 + co] = c2b[co]

    # pool2 row-pair selectors (samples on rows), one pair per pooled row pi2
    f0 = np.zeros((5, TB, NV2), np.float32)
    f1 = np.zeros((5, TB, NV2), np.float32)
    for pi2 in range(5):
        for b in range(TB):
            f0[pi2, b, b * 16 + 2 * pi2] = 1.0
            f1[pi2, b, b * 16 + 2 * pi2 + 1] = 1.0

    # fc1 weights split per pooled row pi2; rows indexed by pool2 lane pj2*16 + co2.
    # PyTorch flatten order (feature = co2*25 + pi2*5 + pj2) is baked in here.
    w1p = np.zeros((5, 128, 128), np.float32)
    for pi2 in range(5):
        for co in range(16):
            for pj2 in range(5):
                w1p[pi2, pj2 * 16 + co, :120] = f1w[:, co * 25 + pi2 * 5 + pj2]
    b1f = np.zeros((1, 128), np.float32); b1f[0, :120] = f1b

    w2p = np.zeros((128, 128), np.float32); w2p[:120, :84] = f2w.T
    b2f = np.zeros((1, 128), np.float32); b2f[0, :84] = f2b
    w3p = np.zeros((128, 128), np.float32); w3p[:84, :10] = f3w.T
    b3f = np.zeros((1, 128), np.float32); b3f[0, :10] = f3b

    arrays = (t1, b1c, e0, e1, t2, b2c, f0, f1, w1p, b1f, w2p, b2f, w3p, b3f)
    return tuple(jnp.asarray(a) for a in arrays)


# ---------------------------------------------------------------------------
# Plain-JAX reference and self-check
# ---------------------------------------------------------------------------
def cifarnet_reference(x, params):
    """Plain-JAX reference of the PyTorch CifarNet forward."""
    (c1w, c1b, c2w, c2b, f1w, f1b, f2w, f2b, f3w, f3b) = params
    dn = ('NCHW', 'OIHW', 'NCHW')
    hp = lax.Precision.HIGHEST
    y = lax.conv_general_dilated(x, c1w, (1, 1), 'VALID', dimension_numbers=dn, precision=hp)
    y = jnp.maximum(y + c1b[None, :, None, None], 0.0)
    y = lax.reduce_window(y, -jnp.inf, lax.max, (1, 1, 2, 2), (1, 1, 2, 2), 'VALID')
    y = lax.conv_general_dilated(y, c2w, (1, 1), 'VALID', dimension_numbers=dn, precision=hp)
    y = jnp.maximum(y + c2b[None, :, None, None], 0.0)
    y = lax.reduce_window(y, -jnp.inf, lax.max, (1, 1, 2, 2), (1, 1, 2, 2), 'VALID')
    y = y.reshape(x.shape[0], 16 * 5 * 5)
    y = jnp.maximum(jnp.dot(y, f1w.T, precision=hp) + f1b, 0.0)
    y = jnp.maximum(jnp.dot(y, f2w.T, precision=hp) + f2b, 0.0)
    return jnp.dot(y, f3w.T, precision=hp) + f3b


if __name__ == "__main__":
    key = jax.random.PRNGKey(0)
    kx, kp = jax.random.split(key)

    batch = 12   # exercises both the batch-pad path (12 -> 16) and a multi-step grid (2 tiles)
    x = jax.random.normal(kx, (batch, 3, 32, 32), dtype=jnp.float32)
    params = init_params(kp)
    prep = prepare_params(params)

    fwd = jax.jit(cifarnet_forward)
    out = jax.block_until_ready(fwd(x, prep))

    ref = jax.block_until_ready(cifarnet_reference(x, params))
    assert out.shape == (batch, 10), out.shape
    assert jnp.allclose(out, ref, atol=1e-4, rtol=1e-4), float(jnp.max(jnp.abs(out - ref)))
    print("KERNEL_OK")
</pallas_src>

<mosaic_0001>
module attributes {stable_mosaic.version = 11 : i64} {
  func.func @cifarnet_kernel(%arg0: i32, %arg1: memref<256x96xf32, #tpu.memory_space<vmem>>, %arg2: memref<5x96x256xf32, #tpu.memory_space<vmem>>, %arg3: memref<1x256xf32, #tpu.memory_space<vmem>>, %arg4: memref<128x252xf32, #tpu.memory_space<vmem>>, %arg5: memref<128x252xf32, #tpu.memory_space<vmem>>, %arg6: memref<5x128x256xf32, #tpu.memory_space<vmem>>, %arg7: memref<1x256xf32, #tpu.memory_space<vmem>>, %arg8: memref<5x8x124xf32, #tpu.memory_space<vmem>>, %arg9: memref<5x8x124xf32, #tpu.memory_space<vmem>>, %arg10: memref<5x128x128xf32, #tpu.memory_space<vmem>>, %arg11: memref<1x128xf32, #tpu.memory_space<vmem>>, %arg12: memref<128x128xf32, #tpu.memory_space<vmem>>, %arg13: memref<1x128xf32, #tpu.memory_space<vmem>>, %arg14: memref<128x128xf32, #tpu.memory_space<vmem>>, %arg15: memref<1x128xf32, #tpu.memory_space<vmem>>, %arg16: memref<8x128xf32, #tpu.memory_space<vmem>>, %arg17: memref<128x128xf32, #tpu.memory_space<vmem>>) attributes {dimension_semantics = [#tpu.dimension_semantics<parallel>], iteration_bounds = array<i64: 2>, scalar_prefetch = 0 : i64, scratch_operands = 1 : i64, tpu.core_type = #tpu.core_type<tc>, window_params = [{transform_indices = @transform_0, window_bounds = array<i64: 256, 96>}, {pipeline_mode = #tpu.pipeline_mode<synchronous>, transform_indices = @transform_1, window_bounds = array<i64: 5, 96, 256>}, {pipeline_mode = #tpu.pipeline_mode<synchronous>, transform_indices = @transform_2, window_bounds = array<i64: 1, 256>}, {pipeline_mode = #tpu.pipeline_mode<synchronous>, transform_indices = @transform_3, window_bounds = array<i64: 128, 252>}, {pipeline_mode = #tpu.pipeline_mode<synchronous>, transform_indices = @transform_4, window_bounds = array<i64: 128, 252>}, {pipeline_mode = #tpu.pipeline_mode<synchronous>, transform_indices = @transform_5, window_bounds = array<i64: 5, 128, 256>}, {pipeline_mode = #tpu.pipeline_mode<synchronous>, transform_indices = @transform_6, window_bounds = array<i64: 1, 256>}, {pipeline_mode = #tpu.pipeline_mode<synchronous>, transform_indices = @transform_7, window_bounds = array<i64: 5, 8, 124>}, {pipeline_mode = #tpu.pipeline_mode<synchronous>, transform_indices = @transform_8, window_bounds = array<i64: 5, 8, 124>}, {pipeline_mode = #tpu.pipeline_mode<synchronous>, transform_indices = @transform_9, window_bounds = array<i64: 5, 128, 128>}, {pipeline_mode = #tpu.pipeline_mode<synchronous>, transform_indices = @transform_10, window_bounds = array<i64: 1, 128>}, {pipeline_mode = #tpu.pipeline_mode<synchronous>, transform_indices = @transform_11, window_bounds = array<i64: 128, 128>}, {pipeline_mode = #tpu.pipeline_mode<synchronous>, transform_indices = @transform_12, window_bounds = array<i64: 1, 128>}, {pipeline_mode = #tpu.pipeline_mode<synchronous>, transform_indices = @transform_13, window_bounds = array<i64: 128, 128>}, {pipeline_mode = #tpu.pipeline_mode<synchronous>, transform_indices = @transform_14, window_bounds = array<i64: 1, 128>}, {transform_indices = @transform_15, window_bounds = array<i64: 8, 128>}]} {
    %cst = arith.constant 0.000000e+00 : f32
    %0 = vector.broadcast %cst : f32 to vector<252x256xf32>
    %c0 = arith.constant 0 : index
    %c0_0 = arith.constant 0 : index
    %1 = vector.load %arg1[%c0, %c0_0] : memref<256x96xf32, #tpu.memory_space<vmem>>, vector<252x96xf32>
    %c0_1 = arith.constant 0 : index
    %c0_2 = arith.constant 0 : index
    %c0_3 = arith.constant 0 : index
    %2 = vector.load %arg2[%c0_1, %c0_2, %c0_3] : memref<5x96x256xf32, #tpu.memory_space<vmem>>, vector<1x96x256xf32>
    %3 = vector.shape_cast %2 : vector<1x96x256xf32> to vector<96x256xf32>
    %cst_4 = arith.constant dense<0.000000e+00> : vector<252x256xf32>
    %4 = tpu.matmul %1, %3, %cst_4 {dimension_numbers = #tpu.dot_dimension_numbers<[1], [0], [0], [1], [0, 0, 1, 1], [], []>} : vector<252x96xf32>, vector<96x256xf32>, vector<252x256xf32> -> vector<252x256xf32>
    %5 = arith.addf %0, %4 : vector<252x256xf32>
    %c1 = arith.constant 1 : index
    %c0_5 = arith.constant 0 : index
    %6 = vector.load %arg1[%c1, %c0_5] : memref<256x96xf32, #tpu.memory_space<vmem>>, vector<252x96xf32>
    %c1_6 = arith.constant 1 : index
    %c0_7 = arith.constant 0 : index
    %c0_8 = arith.constant 0 : index
    %7 = vector.load %arg2[%c1_6, %c0_7, %c0_8] : memref<5x96x256xf32, #tpu.memory_space<vmem>>, vector<1x96x256xf32>
    %8 = vector.shape_cast %7 : vector<1x96x256xf32> to vector<96x256xf32>
    %cst_9 = arith.constant dense<0.000000e+00> : vector<252x256xf32>
    %9 = tpu.matmul %6, %8, %cst_9 {dimension_numbers = #tpu.dot_dimension_numbers<[1], [0], [0], [1], [0, 0, 1, 1], [], []>} : vector<252x96xf32>, vector<96x256xf32>, vector<252x256xf32> -> vector<252x256xf32>
    %10 = arith.addf %5, %9 : vector<252x256xf32>
    %c2 = arith.constant 2 : index
    %c0_10 = arith.constant 0 : index
    %11 = vector.load %arg1[%c2, %c0_10] : memref<256x96xf32, #tpu.memory_space<vmem>>, vector<252x96xf32>
    %c2_11 = arith.constant 2 : index
    %c0_12 = arith.constant 0 : index
    %c0_13 = arith.constant 0 : index
    %12 = vector.load %arg2[%c2_11, %c0_12, %c0_13] : memref<5x96x256xf32, #tpu.memory_space<vmem>>, vector<1x96x256xf32>
    %13 = vector.shape_cast %12 : vector<1x96x256xf32> to vector<96x256xf32>
    %cst_14 = arith.constant dense<0.000000e+00> : vector<252x256xf32>
    %14 = tpu.matmul %11, %13, %cst_14 {dimension_numbers = #tpu.dot_dimension_numbers<[1], [0], [0], [1], [0, 0, 1, 1], [], []>} : vector<252x96xf32>, vector<96x256xf32>, vector<252x256xf32> -> vector<252x256xf32>
    %15 = arith.addf %10, %14 : vector<252x256xf32>
    %c3 = arith.constant 3 : index
    %c0_15 = arith.constant 0 : index
    %16 = vector.load %arg1[%c3, %c0_15] : memref<256x96xf32, #tpu.memory_space<vmem>>, vector<252x96xf32>
    %c3_16 = arith.constant 3 : index
    %c0_17 = arith.constant 0 : index
    %c0_18 = arith.constant 0 : index
    %17 = vector.load %arg2[%c3_16, %c0_17, %c0_18] : memref<5x96x256xf32, #tpu.memory_space<vmem>>, vector<1x96x256xf32>
    %18 = vector.shape_cast %17 : vector<1x96x256xf32> to vector<96x256xf32>
    %cst_19 = arith.constant dense<0.000000e+00> : vector<252x256xf32>
    %19 = tpu.matmul %16, %18, %cst_19 {dimension_numbers = #tpu.dot_dimension_numbers<[1], [0], [0], [1], [0, 0, 1, 1], [], []>} : vector<252x96xf32>, vector<96x256xf32>, vector<252x256xf32> -> vector<252x256xf32>
    %20 = arith.addf %15, %19 : vector<252x256xf32>
    %c4 = arith.constant 4 : index
    %c0_20 = arith.constant 0 : index
    %21 = vector.load %arg1[%c4, %c0_20] : memref<256x96xf32, #tpu.memory_space<vmem>>, vector<252x96xf32>
    %c4_21 = arith.constant 4 : index
    %c0_22 = arith.constant 0 : index
    %c0_23 = arith.constant 0 : index
    %22 = vector.load %arg2[%c4_21, %c0_22, %c0_23] : memref<5x96x256xf32, #tpu.memory_space<vmem>>, vector<1x96x256xf32>
    %23 = vector.shape_cast %22 : vector<1x96x256xf32> to vector<96x256xf32>
    %cst_24 = arith.constant dense<0.000000e+00> : vector<252x256xf32>
    %24 = tpu.matmul %21, %23, %cst_24 {dimension_numbers = #tpu.dot_dimension_numbers<[1], [0], [0], [1], [0, 0, 1, 1], [], []>} : vector<252x96xf32>, vector<96x256xf32>, vector<252x256xf32> -> vector<252x256xf32>
    %25 = arith.addf %20, %24 : vector<252x256xf32>
    %c0_25 = arith.constant 0 : index
    %c0_26 = arith.constant 0 : index
    %26 = vector.load %arg3[%c0_25, %c0_26] : memref<1x256xf32, #tpu.memory_space<vmem>>, vector<1x256xf32>
    %27 = vector.broadcast %26 : vector<1x256xf32> to vector<252x256xf32>
    %28 = arith.addf %25, %27 : vector<252x256xf32>
    %cst_27 = arith.constant 0.000000e+00 : f32
    %29 = vector.broadcast %cst_27 : f32 to vector<252x256xf32>
    %30 = arith.maximumf %28, %29 : vector<252x256xf32>
    %31 = vector.extract_strided_slice %30 {offsets = [0, 0], sizes = [252, 128], strides = [1, 1]} : vector<252x256xf32> to vector<252x128xf32>
    %32 = vector.extract_strided_slice %30 {offsets = [0, 128], sizes = [252, 128], strides = [1, 1]} : vector<252x256xf32> to vector<252x128xf32>
    %33 = arith.maximumf %31, %32 : vector<252x128xf32>
    %c0_28 = arith.constant 0 : index
    %c0_29 = arith.constant 0 : index
    %34 = vector.load %arg4[%c0_28, %c0_29] : memref<128x252xf32, #tpu.memory_space<vmem>>, vector<128x252xf32>
    %cst_30 = arith.constant dense<0.000000e+00> : vector<128x128xf32>
    %35 = tpu.matmul %34, %33, %cst_30 {dimension_numbers = #tpu.dot_dimension_numbers<[1], [0], [0], [1], [0, 0, 1, 1], [], []>} : vector<128x252xf32>, vector<252x128xf32>, vector<128x128xf32> -> vector<128x128xf32>
    %c0_31 = arith.constant 0 : index
    %c0_32 = arith.constant 0 : index
    %36 = vector.load %arg5[%c0_31, %c0_32] : memref<128x252xf32, #tpu.memory_space<vmem>>, vector<128x252xf32>
    %cst_33 = arith.constant dense<0.000000e+00> : vector<128x128xf32>
    %37 = tpu.matmul %36, %33, %cst_33 {dimension_numbers = #tpu.dot_dimension_numbers<[1], [0], [0], [1], [0, 0, 1, 1], [], []>} : vector<128x252xf32>, vector<252x128xf32>, vector<128x128xf32> -> vector<128x128xf32>
    %38 = arith.maximumf %35, %37 : vector<128x128xf32>
    %c0_34 = arith.constant 0 : index
    %c0_35 = arith.constant 0 : index
    %39 = vector.load %arg17[%c0_34, %c0_35] : memref<128x128xf32, #tpu.memory_space<vmem>>, vector<128x128xf32>
    tpu.vector_store %arg17[%c0_34, %c0_35], %38 {strides = array<i32>} : memref<128x128xf32, #tpu.memory_space<vmem>>, vector<128x128xf32>,
    %cst_36 = arith.constant 0.000000e+00 : f32
    %40 = vector.broadcast %cst_36 : f32 to vector<124x256xf32>
    %c0_37 = arith.constant 0 : index
    %c0_38 = arith.constant 0 : index
    %41 = vector.load %arg17[%c0_37, %c0_38] : memref<128x128xf32, #tpu.memory_space<vmem>>, vector<124x128xf32>
    %c0_39 = arith.constant 0 : index
    %c0_40 = arith.constant 0 : index
    %c0_41 = arith.constant 0 : index
    %42 = vector.load %arg6[%c0_39, %c0_40, %c0_41] : memref<5x128x256xf32, #tpu.memory_space<vmem>>, vector<1x128x256xf32>
    %43 = vector.shape_cast %42 : vector<1x128x256xf32> to vector<128x256xf32>
    %cst_42 = arith.constant dense<0.000000e+00> : vector<124x256xf32>
    %44 = tpu.matmul %41, %43, %cst_42 {dimension_numbers = #tpu.dot_dimension_numbers<[1], [0], [0], [1], [0, 0, 1, 1], [], []>} : vector<124x128xf32>, vector<128x256xf32>, vector<124x256xf32> -> vector<124x256xf32>
    %45 = arith.addf %40, %44 : vector<124x256xf32>
    %c1_43 = arith.constant 1 : index
    %c0_44 = arith.constant 0 : index
    %46 = vector.load %arg17[%c1_43, %c0_44] : memref<128x128xf32, #tpu.memory_space<vmem>>, vector<124x128xf32>
    %c1_45 = arith.constant 1 : index
    %c0_46 = arith.constant 0 : index
    %c0_47 = arith.constant 0 : index
    %47 = vector.load %arg6[%c1_45, %c0_46, %c0_47] : memref<5x128x256xf32, #tpu.memory_space<vmem>>, vector<1x128x256xf32>
    %48 = vector.shape_cast %47 : vector<1x128x256xf32> to vector<128x256xf32>
    %cst_48 = arith.constant dense<0.000000e+00> : vector<124x256xf32>
    %49 = tpu.matmul %46, %48, %cst_48 {dimension_numbers = #tpu.dot_dimension_numbers<[1], [0], [0], [1], [0, 0, 1, 1], [], []>} : vector<124x128xf32>, vector<128x256xf32>, vector<124x256xf32> -> vector<124x256xf32>
    %50 = arith.addf %45, %49 : vector<124x256xf32>
    %c2_49 = arith.constant 2 : index
    %c0_50 = arith.constant 0 : index
    %51 = vector.load %arg17[%c2_49, %c0_50] : memref<128x128xf32, #tpu.memory_space<vmem>>, vector<124x128xf32>
    %c2_51 = arith.constant 2 : index
    %c0_52 = arith.constant 0 : index
    %c0_53 = arith.constant 0 : index
    %52 = vector.load %arg6[%c2_51, %c0_52, %c0_53] : memref<5x128x256xf32, #tpu.memory_space<vmem>>, vector<1x128x256xf32>
    %53 = vector.shape_cast %52 : vector<1x128x256xf32> to vector<128x256xf32>
    %cst_54 = arith.constant dense<0.000000e+00> : vector<124x256xf32>
    %54 = tpu.matmul %51, %53, %cst_54 {dimension_numbers = #tpu.dot_dimension_numbers<[1], [0], [0], [1], [0, 0, 1, 1], [], []>} : vector<124x128xf32>, vector<128x256xf32>, vector<124x256xf32> -> vector<124x256xf32>
    %55 = arith.addf %50, %54 : vector<124x256xf32>
    %c3_55 = arith.constant 3 : index
    %c0_56 = arith.constant 0 : index
    %56 = vector.load %arg17[%c3_55, %c0_56] : memref<128x128xf32, #tpu.memory_space<vmem>>, vector<124x128xf32>
    %c3_57 = arith.constant 3 : index
    %c0_58 = arith.constant 0 : index
    %c0_59 = arith.constant 0 : index
    %57 = vector.load %arg6[%c3_57, %c0_58, %c0_59] : memref<5x128x256xf32, #tpu.memory_space<vmem>>, vector<1x128x256xf32>
    %58 = vector.shape_cast %57 : vector<1x128x256xf32> to vector<128x256xf32>
    %cst_60 = arith.constant dense<0.000000e+00> : vector<124x256xf32>
    %59 = tpu.matmul %56, %58, %cst_60 {dimension_numbers = #tpu.dot_dimension_numbers<[1], [0], [0], [1], [0, 0, 1, 1], [], []>} : vector<124x128xf32>, vector<128x256xf32>, vector<124x256xf32> -> vector<124x256xf32>
    %60 = arith.addf %55, %59 : vector<124x256xf32>
    %c4_61 = arith.constant 4 : index
    %c0_62 = arith.constant 0 : index
    %61 = vector.load %arg17[%c4_61, %c0_62] : memref<128x128xf32, #tpu.memory_space<vmem>>, vector<124x128xf32>
    %c4_63 = arith.constant 4 : index
    %c0_64 = arith.constant 0 : index
    %c0_65 = arith.constant 0 : index
    %62 = vector.load %arg6[%c4_63, %c0_64, %c0_65] : memref<5x128x256xf32, #tpu.memory_space<vmem>>, vector<1x128x256xf32>
    %63 = vector.shape_cast %62 : vector<1x128x256xf32> to vector<128x256xf32>
    %cst_66 = arith.constant dense<0.000000e+00> : vector<124x256xf32>
    %64 = tpu.matmul %61, %63, %cst_66 {dimension_numbers = #tpu.dot_dimension_numbers<[1], [0], [0], [1], [0, 0, 1, 1], [], []>} : vector<124x128xf32>, vector<128x256xf32>, vector<124x256xf32> -> vector<124x256xf32>
    %65 = arith.addf %60, %64 : vector<124x256xf32>
    %c0_67 = arith.constant 0 : index
    %c0_68 = arith.constant 0 : index
    %66 = vector.load %arg7[%c0_67, %c0_68] : memref<1x256xf32, #tpu.memory_space<vmem>>, vector<1x256xf32>
    %67 = vector.broadcast %66 : vector<1x256xf32> to vector<124x256xf32>
    %68 = arith.addf %65, %67 : vector<124x256xf32>
    %cst_69 = arith.constant 0.000000e+00 : f32
    %69 = vector.broadcast %cst_69 : f32 to vector<124x256xf32>
    %70 = arith.maximumf %68, %69 : vector<124x256xf32>
    %71 = vector.extract_strided_slice %70 {offsets = [0, 0], sizes = [124, 128], strides = [1, 1]} : vector<124x256xf32> to vector<124x128xf32>
    %72 = vector.extract_strided_slice %70 {offsets = [0, 128], sizes = [124, 128], strides = [1, 1]} : vector<124x256xf32> to vector<124x128xf32>
    %73 = arith.maximumf %71, %72 : vector<124x128xf32>
    %cst_70 = arith.constant 0.000000e+00 : f32
    %74 = vector.broadcast %cst_70 : f32 to vector<8x128xf32>
    %c0_71 = arith.constant 0 : index
    %c0_72 = arith.constant 0 : index
    %c0_73 = arith.constant 0 : index
    %75 = vector.load %arg8[%c0_71, %c0_72, %c0_73] : memref<5x8x124xf32, #tpu.memory_space<vmem>>, vector<1x8x124xf32>
    %76 = vector.shape_cast %75 : vector<1x8x124xf32> to vector<8x124xf32>
    %cst_74 = arith.constant dense<0.000000e+00> : vector<8x128xf32>
    %77 = tpu.matmul %76, %73, %cst_74 {dimension_numbers = #tpu.dot_dimension_numbers<[1], [0], [0], [1], [0, 0, 1, 1], [], []>} : vector<8x124xf32>, vector<124x128xf32>, vector<8x128xf32> -> vector<8x128xf32>
    %c0_75 = arith.constant 0 : index
    %c0_76 = arith.constant 0 : index
    %c0_77 = arith.constant 0 : index
    %78 = vector.load %arg9[%c0_75, %c0_76, %c0_77] : memref<5x8x124xf32, #tpu.memory_space<vmem>>, vector<1x8x124xf32>
    %79 = vector.shape_cast %78 : vector<1x8x124xf32> to vector<8x124xf32>
    %cst_78 = arith.constant dense<0.000000e+00> : vector<8x128xf32>
    %80 = tpu.matmul %79, %73, %cst_78 {dimension_numbers = #tpu.dot_dimension_numbers<[1], [0], [0], [1], [0, 0, 1, 1], [], []>} : vector<8x124xf32>, vector<124x128xf32>, vector<8x128xf32> -> vector<8x128xf32>
    %81 = arith.maximumf %77, %80 : vector<8x128xf32>
    %c0_79 = arith.constant 0 : index
    %c0_80 = arith.constant 0 : index
    %c0_81 = arith.constant 0 : index
    %82 = vector.load %arg10[%c0_79, %c0_80, %c0_81] : memref<5x128x128xf32, #tpu.memory_space<vmem>>, vector<1x128x128xf32>
    %83 = vector.shape_cast %82 : vector<1x128x128xf32> to vector<128x128xf32>
    %cst_82 = arith.constant dense<0.000000e+00> : vector<8x128xf32>
    %84 = tpu.matmul %81, %83, %cst_82 {dimension_numbers = #tpu.dot_dimension_numbers<[1], [0], [0], [1], [0, 0, 1, 1], [], []>} : vector<8x128xf32>, vector<128x128xf32>, vector<8x128xf32> -> vector<8x128xf32>
    %85 = arith.addf %74, %84 : vector<8x128xf32>
    %c1_83 = arith.constant 1 : index
    %c0_84 = arith.constant 0 : index
    %c0_85 = arith.constant 0 : index
    %86 = vector.load %arg8[%c1_83, %c0_84, %c0_85] : memref<5x8x124xf32, #tpu.memory_space<vmem>>, vector<1x8x124xf32>
    %87 = vector.shape_cast %86 : vector<1x8x124xf32> to vector<8x124xf32>
    %cst_86 = arith.constant dense<0.000000e+00> : vector<8x128xf32>
    %88 = tpu.matmul %87, %73, %cst_86 {dimension_numbers = #tpu.dot_dimension_numbers<[1], [0], [0], [1], [0, 0, 1, 1], [], []>} : vector<8x124xf32>, vector<124x128xf32>, vector<8x128xf32> -> vector<8x128xf32>
    %c1_87 = arith.constant 1 : index
    %c0_88 = arith.constant 0 : index
    %c0_89 = arith.constant 0 : index
    %89 = vector.load %arg9[%c1_87, %c0_88, %c0_89] : memref<5x8x124xf32, #tpu.memory_space<vmem>>, vector<1x8x124xf32>
    %90 = vector.shape_cast %89 : vector<1x8x124xf32> to vector<8x124xf32>
    %cst_90 = arith.constant dense<0.000000e+00> : vector<8x128xf32>
    %91 = tpu.matmul %90, %73, %cst_90 {dimension_numbers = #tpu.dot_dimension_numbers<[1], [0], [0], [1], [0, 0, 1, 1], [], []>} : vector<8x124xf32>, vector<124x128xf32>, vector<8x128xf32> -> vector<8x128xf32>
    %92 = arith.maximumf %88, %91 : vector<8x128xf32>
    %c1_91 = arith.constant 1 : index
    %c0_92 = arith.constant 0 : index
    %c0_93 = arith.constant 0 : index
    %93 = vector.load %arg10[%c1_91, %c0_92, %c0_93] : memref<5x128x128xf32, #tpu.memory_space<vmem>>, vector<1x128x128xf32>
    %94 = vector.shape_cast %93 : vector<1x128x128xf32> to vector<128x128xf32>
    %cst_94 = arith.constant dense<0.000000e+00> : vector<8x128xf32>
    %95 = tpu.matmul %92, %94, %cst_94 {dimension_numbers = #tpu.dot_dimension_numbers<[1], [0], [0], [1], [0, 0, 1, 1], [], []>} : vector<8x128xf32>, vector<128x128xf32>, vector<8x128xf32> -> vector<8x128xf32>
    %96 = arith.addf %85, %95 : vector<8x128xf32>
    %c2_95 = arith.constant 2 : index
    %c0_96 = arith.constant 0 : index
    %c0_97 = arith.constant 0 : index
    %97 = vector.load %arg8[%c2_95, %c0_96, %c0_97] : memref<5x8x124xf32, #tpu.memory_space<vmem>>, vector<1x8x124xf32>
    %98 = vector.shape_cast %97 : vector<1x8x124xf32> to vector<8x124xf32>
    %cst_98 = arith.constant dense<0.000000e+00> : vector<8x128xf32>
    %99 = tpu.matmul %98, %73, %cst_98 {dimension_numbers = #tpu.dot_dimension_numbers<[1], [0], [0], [1], [0, 0, 1, 1], [], []>} : vector<8x124xf32>, vector<124x128xf32>, vector<8x128xf32> -> vector<8x128xf32>
    %c2_99 = arith.constant 2 : index
    %c0_100 = arith.constant 0 : index
    %c0_101 = arith.constant 0 : index
    %100 = vector.load %arg9[%c2_99, %c0_100, %c0_101] : memref<5x8x124xf32, #tpu.memory_space<vmem>>, vector<1x8x124xf32>
    %101 = vector.shape_cast %100 : vector<1x8x124xf32> to vector<8x124xf32>
    %cst_102 = arith.constant dense<0.000000e+00> : vector<8x128xf32>
    %102 = tpu.matmul %101, %73, %cst_102 {dimension_numbers = #tpu.dot_dimension_numbers<[1], [0], [0], [1], [0, 0, 1, 1], [], []>} : vector<8x124xf32>, vector<124x128xf32>, vector<8x128xf32> -> vector<8x128xf32>
    %103 = arith.maximumf %99, %102 : vector<8x128xf32>
    %c2_103 = arith.constant 2 : index
    %c0_104 = arith.constant 0 : index
    %c0_105 = arith.constant 0 : index
    %104 = vector.load %arg10[%c2_103, %c0_104, %c0_105] : memref<5x128x128xf32, #tpu.memory_space<vmem>>, vector<1x128x128xf32>
    %105 = vector.shape_cast %104 : vector<1x128x128xf32> to vector<128x128xf32>
    %cst_106 = arith.constant dense<0.000000e+00> : vector<8x128xf32>
    %106 = tpu.matmul %103, %105, %cst_106 {dimension_numbers = #tpu.dot_dimension_numbers<[1], [0], [0], [1], [0, 0, 1, 1], [], []>} : vector<8x128xf32>, vector<128x128xf32>, vector<8x128xf32> -> vector<8x128xf32>
    %107 = arith.addf %96, %106 : vector<8x128xf32>
    %c3_107 = arith.constant 3 : index
    %c0_108 = arith.constant 0 : index
    %c0_109 = arith.constant 0 : index
    %108 = vector.load %arg8[%c3_107, %c0_108, %c0_109] : memref<5x8x124xf32, #tpu.memory_space<vmem>>, vector<1x8x124xf32>
    %109 = vector.shape_cast %108 : vector<1x8x124xf32> to vector<8x124xf32>
    %cst_110 = arith.constant dense<0.000000e+00> : vector<8x128xf32>
    %110 = tpu.matmul %109, %73, %cst_110 {dimension_numbers = #tpu.dot_dimension_numbers<[1], [0], [0], [1], [0, 0, 1, 1], [], []>} : vector<8x124xf32>, vector<124x128xf32>, vector<8x128xf32> -> vector<8x128xf32>
    %c3_111 = arith.constant 3 : index
    %c0_112 = arith.constant 0 : index
    %c0_113 = arith.constant 0 : index
    %111 = vector.load %arg9[%c3_111, %c0_112, %c0_113] : memref<5x8x124xf32, #tpu.memory_space<vmem>>, vector<1x8x124xf32>
    %112 = vector.shape_cast %111 : vector<1x8x124xf32> to vector<8x124xf32>
    %cst_114 = arith.constant dense<0.000000e+00> : vector<8x128xf32>
    %113 = tpu.matmul %112, %73, %cst_114 {dimension_numbers = #tpu.dot_dimension_numbers<[1], [0], [0], [1], [0, 0, 1, 1], [], []>} : vector<8x124xf32>, vector<124x128xf32>, vector<8x128xf32> -> vector<8x128xf32>
    %114 = arith.maximumf %110, %113 : vector<8x128xf32>
    %c3_115 = arith.constant 3 : index
    %c0_116 = arith.constant 0 : index
    %c0_117 = arith.constant 0 : index
    %115 = vector.load %arg10[%c3_115, %c0_116, %c0_117] : memref<5x128x128xf32, #tpu.memory_space<vmem>>, vector<1x128x128xf32>
    %116 = vector.shape_cast %115 : vector<1x128x128xf32> to vector<128x128xf32>
    %cst_118 = arith.constant dense<0.000000e+00> : vector<8x128xf32>
    %117 = tpu.matmul %114, %116, %cst_118 {dimension_numbers = #tpu.dot_dimension_numbers<[1], [0], [0], [1], [0, 0, 1, 1], [], []>} : vector<8x128xf32>, vector<128x128xf32>, vector<8x128xf32> -> vector<8x128xf32>
    %118 = arith.addf %107, %117 : vector<8x128xf32>
    %c4_119 = arith.constant 4 : index
    %c0_120 = arith.constant 0 : index
    %c0_121 = arith.constant 0 : index
    %119 = vector.load %arg8[%c4_119, %c0_120, %c0_121] : memref<5x8x124xf32, #tpu.memory_space<vmem>>, vector<1x8x124xf32>
    %120 = vector.shape_cast %119 : vector<1x8x124xf32> to vector<8x124xf32>
    %cst_122 = arith.constant dense<0.000000e+00> : vector<8x128xf32>
    %121 = tpu.matmul %120, %73, %cst_122 {dimension_numbers = #tpu.dot_dimension_numbers<[1], [0], [0], [1], [0, 0, 1, 1], [], []>} : vector<8x124xf32>, vector<124x128xf32>, vector<8x128xf32> -> vector<8x128xf32>
    %c4_123 = arith.constant 4 : index
    %c0_124 = arith.constant 0 : index
    %c0_125 = arith.constant 0 : index
    %122 = vector.load %arg9[%c4_123, %c0_124, %c0_125] : memref<5x8x124xf32, #tpu.memory_space<vmem>>, vector<1x8x124xf32>
    %123 = vector.shape_cast %122 : vector<1x8x124xf32> to vector<8x124xf32>
    %cst_126 = arith.constant dense<0.000000e+00> : vector<8x128xf32>
    %124 = tpu.matmul %123, %73, %cst_126 {dimension_numbers = #tpu.dot_dimension_numbers<[1], [0], [0], [1], [0, 0, 1, 1], [], []>} : vector<8x124xf32>, vector<124x128xf32>, vector<8x128xf32> -> vector<8x128xf32>
    %125 = arith.maximumf %121, %124 : vector<8x128xf32>
    %c4_127 = arith.constant 4 : index
    %c0_128 = arith.constant 0 : index
    %c0_129 = arith.constant 0 : index
    %126 = vector.load %arg10[%c4_127, %c0_128, %c0_129] : memref<5x128x128xf32, #tpu.memory_space<vmem>>, vector<1x128x128xf32>
    %127 = vector.shape_cast %126 : vector<1x128x128xf32> to vector<128x128xf32>
    %cst_130 = arith.constant dense<0.000000e+00> : vector<8x128xf32>
    %128 = tpu.matmul %125, %127, %cst_130 {dimension_numbers = #tpu.dot_dimension_numbers<[1], [0], [0], [1], [0, 0, 1, 1], [], []>} : vector<8x128xf32>, vector<128x128xf32>, vector<8x128xf32> -> vector<8x128xf32>
    %129 = arith.addf %118, %128 : vector<8x128xf32>
    %c0_131 = arith.constant 0 : index
    %c0_132 = arith.constant 0 : index
    %130 = vector.load %arg11[%c0_131, %c0_132] : memref<1x128xf32, #tpu.memory_space<vmem>>, vector<1x128xf32>
    %131 = vector.broadcast %130 : vector<1x128xf32> to vector<8x128xf32>
    %132 = arith.addf %129, %131 : vector<8x128xf32>
    %cst_133 = arith.constant 0.000000e+00 : f32
    %133 = vector.broadcast %cst_133 : f32 to vector<8x128xf32>
    %134 = arith.maximumf %132, %133 : vector<8x128xf32>
    %c0_134 = arith.constant 0 : index
    %c0_135 = arith.constant 0 : index
    %135 = vector.load %arg12[%c0_134, %c0_135] : memref<128x128xf32, #tpu.memory_space<vmem>>, vector<128x128xf32>
    %cst_136 = arith.constant dense<0.000000e+00> : vector<8x128xf32>
    %136 = tpu.matmul %134, %135, %cst_136 {dimension_numbers = #tpu.dot_dimension_numbers<[1], [0], [0], [1], [0, 0, 1, 1], [], []>} : vector<8x128xf32>, vector<128x128xf32>, vector<8x128xf32> -> vector<8x128xf32>
    %c0_137 = arith.constant 0 : index
    %c0_138 = arith.constant 0 : index
    %137 = vector.load %arg13[%c0_137, %c0_138] : memref<1x128xf32, #tpu.memory_space<vmem>>, vector<1x128xf32>
    %138 = vector.broadcast %137 : vector<1x128xf32> to vector<8x128xf32>
    %139 = arith.addf %136, %138 : vector<8x128xf32>
    %cst_139 = arith.constant 0.000000e+00 : f32
    %140 = vector.broadcast %cst_139 : f32 to vector<8x128xf32>
    %141 = arith.maximumf %139, %140 : vector<8x128xf32>
    %c0_140 = arith.constant 0 : index
    %c0_141 = arith.constant 0 : index
    %142 = vector.load %arg14[%c0_140, %c0_141] : memref<128x128xf32, #tpu.memory_space<vmem>>, vector<128x128xf32>
    %cst_142 = arith.constant dense<0.000000e+00> : vector<8x128xf32>
    %143 = tpu.matmul %141, %142, %cst_142 {dimension_numbers = #tpu.dot_dimension_numbers<[1], [0], [0], [1], [0, 0, 1, 1], [], []>} : vector<8x128xf32>, vector<128x128xf32>, vector<8x128xf32> -> vector<8x128xf32>
    %c0_143 = arith.constant 0 : index
    %c0_144 = arith.constant 0 : index
    %144 = vector.load %arg15[%c0_143, %c0_144] : memref<1x128xf32, #tpu.memory_space<vmem>>, vector<1x128xf32>
    %145 = vector.broadcast %144 : vector<1x128xf32> to vector<8x128xf32>
    %146 = arith.addf %143, %145 : vector<8x128xf32>
    %c0_145 = arith.constant 0 : index
    %c0_146 = arith.constant 0 : index
    %147 = vector.load %arg16[%c0_145, %c0_146] : memref<8x128xf32, #tpu.memory_space<vmem>>, vector<8x128xf32>
    tpu.vector_store %arg16[%c0_145, %c0_146], %146 {strides = array<i32>} : memref<8x128xf32, #tpu.memory_space<vmem>>, vector<8x128xf32>,
    return
  }
  func.func @transform_0(%arg0: i32) -> (i32, i32) {
    %c0_i32 = arith.constant 0 : i32
    %c0_i32_0 = arith.constant 0 : i32
    return %arg0, %c0_i32 : i32, i32
  }
  func.func @transform_1(%arg0: i32) -> (i32, i32, i32) {
    %c0_i32 = arith.constant 0 : i32
    %c0_i32_0 = arith.constant 0 : i32
    %c0_i32_1 = arith.constant 0 : i32
    %c0_i32_2 = arith.constant 0 : i32
    return %c0_i32, %c0_i32_0, %c0_i32_1 : i32, i32, i32
  }
  func.func @transform_2(%arg0: i32) -> (i32, i32) {
    %c0_i32 = arith.constant 0 : i32
    %c0_i32_0 = arith.constant 0 : i32
    %c0_i32_1 = arith.constant 0 : i32
    return %c0_i32, %c0_i32_0 : i32, i32
  }
  func.func @transform_3(%arg0: i32) -> (i32, i32) {
    %c0_i32 = arith.constant 0 : i32
    %c0_i32_0 = arith.constant 0 : i32
    %c0_i32_1 = arith.constant 0 : i32
    return %c0_i32, %c0_i32_0 : i32, i32
  }
  func.func @transform_4(%arg0: i32) -> (i32, i32) {
    %c0_i32 = arith.constant 0 : i32
    %c0_i32_0 = arith.constant 0 : i32
    %c0_i32_1 = arith.constant 0 : i32
    return %c0_i32, %c0_i32_0 : i32, i32
  }
  func.func @transform_5(%arg0: i32) -> (i32, i32, i32) {
    %c0_i32 = arith.constant 0 : i32
    %c0_i32_0 = arith.constant 0 : i32
    %c0_i32_1 = arith.constant 0 : i32
    %c0_i32_2 = arith.constant 0 : i32
    return %c0_i32, %c0_i32_0, %c0_i32_1 : i32, i32, i32
  }
  func.func @transform_6(%arg0: i32) -> (i32, i32) {
    %c0_i32 = arith.constant 0 : i32
    %c0_i32_0 = arith.constant 0 : i32
    %c0_i32_1 = arith.constant 0 : i32
    return %c0_i32, %c0_i32_0 : i32, i32
  }
  func.func @transform_7(%arg0: i32) -> (i32, i32, i32) {
    %c0_i32 = arith.constant 0 : i32
    %c0_i32_0 = arith.constant 0 : i32
    %c0_i32_1 = arith.constant 0 : i32
    %c0_i32_2 = arith.constant 0 : i32
    return %c0_i32, %c0_i32_0, %c0_i32_1 : i32, i32, i32
  }
  func.func @transform_8(%arg0: i32) -> (i32, i32, i32) {
    %c0_i32 = arith.constant 0 : i32
    %c0_i32_0 = arith.constant 0 : i32
    %c0_i32_1 = arith.constant 0 : i32
    %c0_i32_2 = arith.constant 0 : i32
    return %c0_i32, %c0_i32_0, %c0_i32_1 : i32, i32, i32
  }
  func.func @transform_9(%arg0: i32) -> (i32, i32, i32) {
    %c0_i32 = arith.constant 0 : i32
    %c0_i32_0 = arith.constant 0 : i32
    %c0_i32_1 = arith.constant 0 : i32
    %c0_i32_2 = arith.constant 0 : i32
    return %c0_i32, %c0_i32_0, %c0_i32_1 : i32, i32, i32
  }
  func.func @transform_10(%arg0: i32) -> (i32, i32) {
    %c0_i32 = arith.constant 0 : i32
    %c0_i32_0 = arith.constant 0 : i32
    %c0_i32_1 = arith.constant 0 : i32
    return %c0_i32, %c0_i32_0 : i32, i32
  }
  func.func @transform_11(%arg0: i32) -> (i32, i32) {
    %c0_i32 = arith.constant 0 : i32
    %c0_i32_0 = arith.constant 0 : i32
    %c0_i32_1 = arith.constant 0 : i32
    return %c0_i32, %c0_i32_0 : i32, i32
  }
  func.func @transform_12(%arg0: i32) -> (i32, i32) {
    %c0_i32 = arith.constant 0 : i32
    %c0_i32_0 = arith.constant 0 : i32
    %c0_i32_1 = arith.constant 0 : i32
    return %c0_i32, %c0_i32_0 : i32, i32
  }
  func.func @transform_13(%arg0: i32) -> (i32, i32) {
    %c0_i32 = arith.constant 0 : i32
    %c0_i32_0 = arith.constant 0 : i32
    %c0_i32_1 = arith.constant 0 : i32
    return %c0_i32, %c0_i32_0 : i32, i32
  }
  func.func @transform_14(%arg0: i32) -> (i32, i32) {
    %c0_i32 = arith.constant 0 : i32
    %c0_i32_0 = arith.constant 0 : i32
    %c0_i32_1 = arith.constant 0 : i32
    return %c0_i32, %c0_i32_0 : i32, i32
  }
  func.func @transform_15(%arg0: i32) -> (i32, i32) {
    %c0_i32 = arith.constant 0 : i32
    %c0_i32_0 = arith.constant 0 : i32
    return %arg0, %c0_i32 : i32, i32
  }
}

</mosaic_0001>

<bundles_post_ra>
// kernel: cifarnet_forward.1
= control target key start
LH: loop header
LB: loop body
LE: loop exit
PB: predicated region body
PF: predicated region fallthrough
CT: control target
= control target key end

     0   :  { %20 = vsyncpa [#allocation4], 0  ;;  %s11688_s0 = inlined_call_operand.vmem [shape: f32[512,96], index: 0, kind: input, shape index: {}]   ;;  %s11689_s1 = inlined_call_operand.vmem [shape: f32[5,96,256], index: 1, kind: input, shape index: {}]   ;;  %s11690_s2 = inlined_call_operand.vmem [shape: f32[1,256], index: 2, kind: input, shape index: {}]   ;;  %s11691_s3 = inlined_call_operand.vmem [shape: f32[128,252], index: 3, kind: input, shape index: {}]   ;;  %s11692_s4 = inlined_call_operand.vmem [shape: f32[128,252], index: 4, kind: input, shape index: {}]   ;;  %s11693_s5 = inlined_call_operand.vmem [shape: f32[5,128,256], index: 5, kind: input, shape index: {}]   ;;  %s11694_s6 = inlined_call_operand.vmem [shape: f32[1,256], index: 6, kind: input, shape index: {}]   ;;  %s11695_s7 = inlined_call_operand.vmem [shape: f32[5,8,124], index: 7, kind: input, shape index: {}]   ;;  %s11696_s8 = inlined_call_operand.vmem [shape: f32[5,8,124], index: 8, kind: input, shape index: {}]   ;;  %s11697_s9 = inlined_call_operand.vmem [shape: f32[5,128,128], index: 9, kind: input, shape index: {}]   ;;  %s11698_s10 = inlined_call_operand.vmem [shape: f32[1,128], index: 10, kind: input, shape index: {}]   ;;  %s11699_s11 = inlined_call_operand.vmem [shape: f32[128,128], index: 11, kind: input, shape index: {}]   ;;  %s11700_s12 = inlined_call_operand.vmem [shape: f32[1,128], index: 12, kind: input, shape index: {}]   ;;  %s11701_s13 = inlined_call_operand.vmem [shape: f32[128,128], index: 13, kind: input, shape index: {}]   ;;  %s11702_s14 = inlined_call_operand.vmem [shape: f32[1,128], index: 14, kind: input, shape index: {}]   ;;  %s11703_s15 = inlined_call_operand.hbm [shape: f32[16,128], index: 15, kind: output, shape index: {}]  }
   0x1   :  { %22 = vsyncpa [#allocation4 + $0x1], 0  ;;  %s9004_s18 = smov 0   ;;  %s9006_s19 = smov 0  }
   0x2   :  { %s9008_s20 = smov 0   ;;  %s9010_s21 = smov 0  }
   0x3 LB: > { %11710 = sst [smem:[#allocation6_spill]] %s8905_s18  ;;  %s9025_s22 = sadd.s32 4294967295, %s8917_s21   ;;  %s8917_s21 = sphi %s9010_s21, %s11723_s21   ;;  %s8913_s20 = sphi %s9008_s20, %s11725_s20   ;;  %s8909_s19 = sphi %s9006_s19, %s11727_s19   ;;  %s8905_s18 = sphi %s9004_s18, %s11726_s18  }
   0x4   : > { %11711 = sst [smem:[#allocation7_spill]] %s8913_s20  ;;  %s6096_s23 = sadd.s32 4294967294, %s8917_s21  }
   0x5   : > { %11712 = sst [smem:[#allocation8_spill]] %s8917_s21  ;;  %s9029_s24 = sadd.s32 1, %s8917_s21  }
   0x6   : > { %11713 = sst [smem:[#allocation9_spill]] %s9029_s24  ;;  %s355_s25 = sadd.s32 1, %s8913_s20 }
   0x7   : > { %s352_s26 = ssub.s32 %s8917_s21, %s9029_s24  ;;  %p365_p0 = scmp.ne.s32.totalorder %s8913_s20, %s8909_s19 }
   0x8   : > { %p353_p1 = scmp.eq.s32.totalorder %s352_s26, 0  ;;  %p366_p2 = scmp.eq.s32.totalorder %s9025_s22, 1 }
   0x9   : > { %p371_p3 = scmp.ne.s32.totalorder %s8909_s19, %s8905_s18  ;;  %p372_p4 = scmp.eq.s32.totalorder %s6096_s23, 1 }
   0xa   : > { %s9040_s27 = scalar_select %p353_p1, %s8913_s20, %s355_s25  }
   0xb   : > { %p9042_p5 = por %p366_p2, %p365_p0  ;;  %p9046_p6 = por %p372_p4, %p371_p3 }
   0xc   : > { %11714 = sst [smem:[#allocation10_spill]] %s9040_s27  ;;  %p6099_p7 = scmp.ge.s32.totalorder %s8917_s21, 1 }
   0xd   : > { %s11716_s29 = scalar_select %p9046_p6, 1, 0 }
   0xe   : > { %p441_p8 = scmp.lt.s32.totalorder %s8917_s21, 3 }
   0xf   : > { %11717 = sst [smem:[#allocation11_spill]] %s11716_s29 }
  0x10   : > { %p442_p9 = pnand %p6099_p7, %p441_p8 }
  0x11   : > { %v6104_v0 = vld [vmem:[%s11689_s1 + $0xc8] sm:$0xff] (!%p442_p9)  ;;  %v6106_v1 = vld [vmem:[%s11689_s1 + $0xd8] sm:$0xff] (!%p442_p9)  ;;  %v6103_v2 = vld [vmem:[%s11689_s1 + $0xc0] sm:$0xff] (!%p442_p9)  ;;  %v8919_v7 = vmov (!%p442_p9), 0.0   ;;  %s6101_s29 = sshll.u32 (!%p442_p9), %s9025_s22, 5  ;;  %vm608_vm0 = vcmask (!%p442_p9), 785408  }
  0x12   : > { %445 = sbr.rel (%p442_p9) target bundleno = 3480 (0xd98), region = 80  ;;  %v7664_v3 = vpack.c.bf16 (!%p442_p9), %v6106_v1, %v6104_v0  ;;  %v6105_v4 = vld [vmem:[%s11689_s1 + $0xd0] sm:$0xff] (!%p442_p9)  ;;  %v6108_v5 = vld [vmem:[%s11689_s1 + $0xe8] sm:$0xff] (!%p442_p9)  ;;  %v6110_v6 = vld [vmem:[%s11689_s1 + $0xf8] sm:$0xff] (!%p442_p9)  ;;  %769 = vmatprep.mubr.f32.mxu0 (!%p442_p9), %v8919_v7  ;;  %p490_p10 = scmp.lt.s32.totalorder (!%p442_p9), %s6101_s29, 63  ;;  %vm2941_vm1 = vcmask (!%p442_p9), 1014784  }
  0x13   : > { %v7666_v8 = vpack.c.bf16 (!%p442_p9), %v6105_v4, %v6103_v2  ;;  %v7668_v9 = vpack.c.bf16 (!%p442_p9), %v6110_v6, %v6108_v5  ;;  %v6107_v10 = vld [vmem:[%s11689_s1 + $0xe0] sm:$0xff] (!%p442_p9)  ;;  %v6109_v11 = vld [vmem:[%s11689_s1 + $0xf0] sm:$0xff] (!%p442_p9)  ;;  %v6112_v12 = vld [vmem:[%s11689_s1 + $0x108] sm:$0xff] (!%p442_p9)  ;;  %vm2990_vm2 = vcmask (!%p442_p9), 1043456   ;;  %vm8920_vm3 = vmmov (!%p442_p9), 1   ;;  %s486_s23 = sand.u32 (!%p442_p9), 1, %s8909_s19  }
  0x14   : > { %7665 = vmatprep.subr.bf16.mxu0 (!%p442_p9), %v7664_v3  ;;  %v6114_v13 = vld [vmem:[%s11689_s1 + $0x118] sm:$0xff] (!%p442_p9)  ;;  %v7670_v14 = vpack.c.bf16 (!%p442_p9), %v6109_v11, %v6107_v10  ;;  %v6111_v16 = vld [vmem:[%s11689_s1 + $0x100] sm:$0xff] (!%p442_p9)  ;;  %v6113_v17 = vld [vmem:[%s11689_s1 + $0x110] sm:$0xff] (!%p442_p9)  ;;  %vm8922_vm5 = vmmov (!%p442_p9), 0   ;;  %s6100_s25 = sshll.u32 (!%p442_p9), %s486_s23, 3  ;;  %s6617_s21 = sshll.u32 (!%p442_p9), %s9025_s22, 7 }
  0x15   : > { %7667 = vmatpush1.bf16.msra.mxu0 (!%p442_p9), %v7666_v8  ;;  %v7672_v15 = vpack.c.bf16 (!%p442_p9), %v6114_v13, %v6112_v12  ;;  %v6116_v18 = vld [vmem:[%s11689_s1 + $0x128] sm:$0xff] (!%p442_p9)  ;;  %v6118_v19 = vld [vmem:[%s11689_s1 + $0x138] sm:$0xff] (!%p442_p9)  ;;  %v7674_v20 = vpack.c.bf16 (!%p442_p9), %v6113_v17, %v6111_v16  ;;  %v6115_v22 = vld [vmem:[%s11689_s1 + $0x120] sm:$0xff] (!%p442_p9)  ;;  %s11646_s27 = scalar_lea.hbm (!%p442_p9), %s11703_s15, %s6617_s21  ;;  %s8923_s22 = smov (!%p442_p9), [#allocation3]  }
  0x16   : > { %7669 = vmatprep.subr.bf16.mxu0 (!%p442_p9), %v7668_v9  ;;  %v7676_v21 = vpack.c.bf16 (!%p442_p9), %v6118_v19, %v6116_v18  ;;  %v6117_v23 = vld [vmem:[%s11689_s1 + $0x130] sm:$0xff] (!%p442_p9)  ;;  %v6120_v24 = vld [vmem:[%s11689_s1 + $0x148] sm:$0xff] (!%p442_p9)  ;;  %v6122_v25 = vld [vmem:[%s11689_s1 + $0x158] sm:$0xff] (!%p442_p9) }
  0x17   : > { %v7678_v26 = vpack.c.bf16 (!%p442_p9), %v6117_v23, %v6115_v22  ;;  %v7680_v27 = vpack.c.bf16 (!%p442_p9), %v6122_v25, %v6120_v24  ;;  %v6119_v28 = vld [vmem:[%s11689_s1 + $0x140] sm:$0xff] (!%p442_p9)  ;;  %v6121_v29 = vld [vmem:[%s11689_s1 + $0x150] sm:$0xff] (!%p442_p9)  ;;  %v6124_v30 = vld [vmem:[%s11689_s1 + $0x168] sm:$0xff] (!%p442_p9) }
  0x18   : > { %v6126_v31 = vld [vmem:[%s11689_s1 + $0x178] sm:$0xff] (!%p442_p9)  ;;  %v7682_v32 = vpack.c.bf16 (!%p442_p9), %v6121_v29, %v6119_v28  ;;  %v6123_v34 = vld [vmem:[%s11689_s1 + $0x160] sm:$0xff] (!%p442_p9)  ;;  %v6125_v35 = vld [vmem:[%s11689_s1 + $0x170] sm:$0xff] (!%p442_p9) }
  0x19   : > { %7671 = vmatpush1.bf16.msra.mxu0 %v7670_v14  ;;  %s11729_s29 = smov (!%p490_p10, %s6101_s29), 63  ;;  %v7684_v33 = vpack.c.bf16 %v6126_v31, %v6124_v30  ;;  %v528_v36 = vld [vmem:[%s11689_s1 + $0x8] sm:$0xff]  ;;  %v530_v37 = vld [vmem:[%s11689_s1 + $0x18] sm:$0xff]  ;;  %v7686_v38 = vpack.c.bf16 %v6125_v35, %v6123_v34  ;;  %v527_v40 = vld [vmem:[%s11689_s1] sm:$0xff] }
  0x1a   : > { %7673 = vmatprep.subr.bf16.mxu0 %v7672_v15  ;;  %s6102_s18 = sshll.u32 %s11729_s29, 3  ;;  %v7688_v39 = vpack.c.bf16 %v530_v37, %v528_v36  ;;  %v529_v41 = vld [vmem:[%s11689_s1 + $0x10] sm:$0xff]  ;;  %v532_v42 = vld [vmem:[%s11689_s1 + $0x28] sm:$0xff]  ;;  %v534_v43 = vld [vmem:[%s11689_s1 + $0x38] sm:$0xff] }
  0x1b   : > { %s9135_s17 = scalar_lea.vmem %s11688_s0, %s6102_s18  ;;  %v7690_v45 = vpack.c.bf16 %v529_v41, %v527_v40  ;;  %v7692_v46 = vpack.c.bf16 %v534_v43, %v532_v42  ;;  %v531_v47 = vld [vmem:[%s11689_s1 + $0x20] sm:$0xff]  ;;  %v533_v48 = vld [vmem:[%s11689_s1 + $0x30] sm:$0xff]  ;;  %v536_v49 = vld [vmem:[%s11689_s1 + $0x48] sm:$0xff]  ;;  %s488_s18 = scalar_lea.vmem [#allocation3], %s6100_s25 }
  0x1c   : > { %v551_v44 = vld [vmem:[%s9135_s17 + $0x1] sm:$0xff]  ;;  %v538_v50 = vld [vmem:[%s11689_s1 + $0x58] sm:$0xff]  ;;  %v552_v51 = vld [vmem:[%s9135_s17 + $0x9] sm:$0xff]  ;;  %v7694_v52 = vpack.c.bf16 %v533_v48, %v531_v47  ;;  %s6037_s16 = sshll.u32 %s488_s18, 4  ;;  %s8859_s25 = sshll.u32 %s8923_s22, 4  ;;  %s11648_s16 = int_to_ptr.vmem [resolvable:$true] %s6037_s16  ;;  %s8860_s25 = int_to_ptr.vmem [resolvable:$false] %s8859_s25 }
  0x1d   : > { %7675 = vmatpush1.bf16.msra.mxu0 %v7674_v20  ;;  %v7696_v53 = vpack.c.bf16 %v538_v50, %v536_v49  ;;  %v535_v54 = vld [vmem:[%s11689_s1 + $0x40] sm:$0xff]  ;;  %v537_v55 = vld [vmem:[%s11689_s1 + $0x50] sm:$0xff]  ;;  %v540_v56 = vld [vmem:[%s11689_s1 + $0x68] sm:$0xff]  ;;  %s8855_s24 = scalar_lea.vmem %s11648_s16, 128  ;;  %s8861_s26 = scalar_lea.vmem %s8860_s25, 256 }
  0x1e   : > { %7677 = vmatprep.subr.bf16.mxu0 %v7676_v21  ;;  %v542_v57 = vld [vmem:[%s11689_s1 + $0x78] sm:$0xff]  ;;  %v7698_v59 = vpack.c.bf16 %v537_v55, %v535_v54  ;;  %v539_v61 = vld [vmem:[%s11689_s1 + $0x60] sm:$0xff]  ;;  %v541_v62 = vld [vmem:[%s11689_s1 + $0x70] sm:$0xff]  ;;  %p8856_p11 = scmp.ne.s32.totalorder %s11648_s16, %s8855_s24  ;;  %p8862_p0 = scmp.lt.s32.totalorder %s11648_s16, %s8860_s25 }
  0x1f   : > { %v553_v58 = vld [vmem:[%s9135_s17 + $0x11] sm:$0xff]  ;;  %v7700_v60 = vpack.c.bf16 %v542_v57, %v540_v56  ;;  %v544_v63 = vld [vmem:[%s11689_s1 + $0x88] sm:$0xff]  ;;  %v554_v1 = vld [vmem:[%s9135_s17 + $0x19] sm:$0xff]  ;;  %v7702_v2 = vpack.c.bf16 %v541_v62, %v539_v61  ;;  %p8863_p1 = scmp.lt.s32.totalorder %s8861_s26, %s8855_s24 }
  0x20   : > { %v546_v0 = vld [vmem:[%s11689_s1 + $0x98] sm:$0xff]  ;;  %v543_v4 = vld [vmem:[%s11689_s1 + $0x80] sm:$0xff]  ;;  %v545_v5 = vld [vmem:[%s11689_s1 + $0x90] sm:$0xff]  ;;  %p8857_p12 = pnand %p8856_p11, %p9042_p5 }
  0x21   : > { %7679 = vmatpush1.bf16.msra.mxu0 %v7678_v26  ;;  %v7704_v3 = vpack.c.bf16 %v546_v0, %v544_v63  ;;  %v548_v6 = vld [vmem:[%s11689_s1 + $0xa8] sm:$0xff]  ;;  %v550_v8 = vld [vmem:[%s11689_s1 + $0xb8] sm:$0xff]  ;;  %v7706_v10 = vpack.c.bf16 %v545_v5, %v543_v4  ;;  %v547_v12 = vld [vmem:[%s11689_s1 + $0xa0] sm:$0xff]  ;;  %p8864_p2 = por %p8863_p1, %p8862_p0 }
  0x22   : > { %7681 = vmatprep.subr.bf16.mxu0 %v7680_v27  ;;  %v555_v9 = vld [vmem:[%s9135_s17 + $0x21] sm:$0xff]  ;;  %v7708_v11 = vpack.c.bf16 %v550_v8, %v548_v6  ;;  %v549_v13 = vld [vmem:[%s11689_s1 + $0xb0] sm:$0xff]  ;;  %v6194_v15 = vld [vmem:[%s11689_s1 + $0x198] sm:$0xff]  ;;  %p8858_p13 = pneg %p8857_p12 }
  0x23   : > { %v6192_v14 = vld [vmem:[%s11689_s1 + $0x188] sm:$0xff]  ;;  %v7710_v17 = vpack.c.bf16 %v549_v13, %v547_v12  ;;  %v557_v19 = vld [vmem:[%s9135_s17 + $0x31] sm:$0xff]  ;;  %v558_v20 = vld [vmem:[%s9135_s17 + $0x39] sm:$0xff] }
  0x24   : > { %v556_v16 = vld [vmem:[%s9135_s17 + $0x29] sm:$0xff]  ;;  %v7712_v18 = vpack.c.bf16 %v6194_v15, %v6192_v14  ;;  %v559_v21 = vld [vmem:[%s9135_s17 + $0x41] sm:$0xff]  ;;  %v561_v23 = vld [vmem:[%s9135_s17 + $0x51] sm:$0xff]  ;;  %p8865_p3 = pnand %p8864_p2, %p8858_p13 }
  0x25   : > { %7683 = vmatpush1.bf16.msra.mxu0 %v7682_v32  ;;  %v560_v22 = vld [vmem:[%s9135_s17 + $0x49] sm:$0xff]  ;;  %v562_v24 = vld [vmem:[%s9135_s17 + $0x59] sm:$0xff]  ;;  %v563_v25 = vld [vmem:[%s9135_s17 + $0x61] sm:$0xff] }
  0x26   : > { %7685 = vmatprep.subr.bf16.mxu0 %v7684_v33  ;;  %v564_v26 = vld [vmem:[%s9135_s17 + $0x69] sm:$0xff]  ;;  %v565_v27 = vld [vmem:[%s9135_s17 + $0x71] sm:$0xff]  ;;  %v566_v28 = vld [vmem:[%s9135_s17 + $0x79] sm:$0xff] }
  0x27   : > { %v567_v29 = vld [vmem:[%s9135_s17 + $0x81] sm:$0xff]  ;;  %v568_v30 = vld [vmem:[%s9135_s17 + $0x89] sm:$0xff]  ;;  %v569_v31 = vld [vmem:[%s9135_s17 + $0x91] sm:$0xff] }
  0x28   : > { %v570_v32 = vld [vmem:[%s9135_s17 + $0x99] sm:$0xff]  ;;  %v571_v33 = vld [vmem:[%s9135_s17 + $0xa1] sm:$0xff]  ;;  %v572_v34 = vld [vmem:[%s9135_s17 + $0xa9] sm:$0xff] }
  0x29   : > { %7687 = vmatpush1.bf16.msra.mxu0 %v7686_v38  ;;  %v573_v35 = vld [vmem:[%s9135_s17 + $0xb1] sm:$0xff]  ;;  %v574_v36 = vld [vmem:[%s9135_s17 + $0xb9] sm:$0xff]  ;;  %v575_v37 = vld [vmem:[%s9135_s17 + $0xc1] sm:$0xff] }
  0x2a   : > { %7689 = vmatprep.subr.bf16.mxu0 %v7688_v39  ;;  %v576_v38 = vld [vmem:[%s9135_s17 + $0xc9] sm:$0xff]  ;;  %v577_v39 = vld [vmem:[%s9135_s17 + $0xd1] sm:$0xff]  ;;  %v578_v40 = vld [vmem:[%s9135_s17 + $0xd9] sm:$0xff] }
  0x2b   : > { %v579_v41 = vld [vmem:[%s9135_s17 + $0xe1] sm:$0xff]  ;;  %v580_v42 = vld [vmem:[%s9135_s17 + $0xe9] sm:$0xff]  ;;  %v581_v43 = vld [vmem:[%s9135_s17 + $0xf1] sm:$0xff] }
  0x2c   : > { %6127 = vmatmul.mubr.msk.f32.vlgmr.msra.gmra.mrb[0].mxu0 %vm608_vm0, %v551_v44  ;;  %v582_v44 = vld [vmem:[%s9135_s17 + $0xf9] sm:$0xf]  ;;  %v6196_v47 = vld [vmem:[%s11689_s1 + $0x1a8] sm:$0xff]  ;;  %v495_v49 = vld [vmem:[%s9135_s17] sm:$0xff] }
  0x2d   : > { %775 = vmatprep.mubr.f32.mxu0 %v8919_v7  ;;  %7691 = vmatpush1.bf16.msra.mxu0 %v7690_v45  ;;  %v6191_v45 = vld [vmem:[%s11689_s1 + $0x180] sm:$0xff]  ;;  %v6198_v48 = vld [vmem:[%s11689_s1 + $0x1b8] sm:$0xff]  ;;  %v6200_v54 = vld [vmem:[%s11689_s1 + $0x1c8] sm:$0xff] }
  0x2e   : > { %7693 = vmatprep.subr.bf16.mxu0 %v7692_v46  ;;  %v6193_v46 = vld [vmem:[%s11689_s1 + $0x190] sm:$0xff]  ;;  %v6202_v55 = vld [vmem:[%s11689_s1 + $0x1d8] sm:$0xff]  ;;  %v496_v56 = vld [vmem:[%s9135_s17 + $0x8] sm:$0xff] }
  0x2f   : > { %v7714_v50 = vpack.c.bf16 %v6193_v46, %v6191_v45  ;;  %v6204_v61 = vld [vmem:[%s11689_s1 + $0x1e8] sm:$0xff]  ;;  %v6206_v62 = vld [vmem:[%s11689_s1 + $0x1f8] sm:$0xff]  ;;  %v497_v63 = vld [vmem:[%s9135_s17 + $0x10] sm:$0xff] }
  0x30   : > { %6128 = vmatmul.mubr.msk.f32.gmra.mrb[2].mxu0 %vm608_vm0, %v552_v51  ;;  %v7716_v51 = vpack.c.bf16 %v6198_v48, %v6196_v47  ;;  %v6208_v4 = vld [vmem:[%s11689_s1 + $0x208] sm:$0xff]  ;;  %v6210_v5 = vld [vmem:[%s11689_s1 + $0x218] sm:$0xff]  ;;  %v499_v14 = vld [vmem:[%s9135_s17 + $0x20] sm:$0xff] }
  0x31   : > { %781 = vmatprep.mubr.f32.mxu0 %v8919_v7  ;;  %7695 = vmatpush1.bf16.msra.mxu0 %v7694_v52  ;;  %v6195_v52 = vld [vmem:[%s11689_s1 + $0x1a0] sm:$0xff]  ;;  %v498_v6 = vld [vmem:[%s9135_s17 + $0x18] sm:$0xff]  ;;  %v6212_v12 = vld [vmem:[%s11689_s1 + $0x228] sm:$0xff] }
  0x32   : > { %7697 = vmatprep.subr.bf16.mxu0 %v7696_v53  ;;  %v6197_v53 = vld [vmem:[%s11689_s1 + $0x1b0] sm:$0xff]  ;;  %v6214_v13 = vld [vmem:[%s11689_s1 + $0x238] sm:$0xff]  ;;  %v523_v46 = vld [vmem:[%s9135_s17 + $0xe0] sm:$0xff] }
  0x33   : > { %v7718_v57 = vpack.c.bf16 %v6197_v53, %v6195_v52  ;;  %v522_v45 = vld [vmem:[%s9135_s17 + $0xd8] sm:$0xff]  ;;  %v524_v47 = vld [vmem:[%s9135_s17 + $0xe8] sm:$0xff]  ;;  %v525_v48 = vld [vmem:[%s9135_s17 + $0xf0] sm:$0xff] }
  0x34   : > { %6129 = vmatmul.mubr.msk.f32.gmra.mrb[4].mxu0 %vm608_vm0, %v553_v58  ;;  %v7720_v58 = vpack.c.bf16 %v6202_v55, %v6200_v54  ;;  %v6252_v52 = vld [vmem:[%s11689_s1 + $0x268] sm:$0xff]  ;;  %v6254_v53 = vld [vmem:[%s11689_s1 + $0x278] sm:$0xff]  ;;  %vm10022_vm4 = vmpackc.low %vm2990_vm2, %vm8920_vm3 }
  0x35   : > { %787 = vmatprep.mubr.f32.mxu0 %v8919_v7  ;;  %7699 = vmatpush1.bf16.msra.mxu0 %v7698_v59  ;;  %v6199_v59 = vld [vmem:[%s11689_s1 + $0x1c0] sm:$0xff] }
  0x36   : > { %7701 = vmatprep.subr.bf16.mxu0 %v7700_v60  ;;  %v6201_v60 = vld [vmem:[%s11689_s1 + $0x1d0] sm:$0xff]  ;;  %v1315_v54 = vld [vmem:[%s9135_s17 + $0x2] sm:$0xff] }
  0x37   : > { %v7722_v0 = vpack.c.bf16 %v6201_v60, %v6199_v59  ;;  %v6256_v59 = vld [vmem:[%s11689_s1 + $0x288] sm:$0xff]  ;;  %v6258_v60 = vld [vmem:[%s11689_s1 + $0x298] sm:$0xff] }
  0x38   : > { %6130 = vmatmul.mubr.msk.f32.gmra.mrb[6].mxu0 %vm608_vm0, %v554_v1  ;;  %v7724_v1 = vpack.c.bf16 %v6206_v62, %v6204_v61  ;;  %v1316_v61 = vld [vmem:[%s9135_s17 + $0xa] sm:$0xff] }
  0x39   : > { %793 = vmatprep.mubr.f32.mxu0 %v8919_v7  ;;  %7703 = vmatpush1.bf16.msra.mxu0 %v7702_v2  ;;  %v6203_v2 = vld [vmem:[%s11689_s1 + $0x1e0] sm:$0xff] }
  0x3a   : > { %7705 = vmatprep.subr.bf16.mxu0 %v7704_v3  ;;  %v6205_v3 = vld [vmem:[%s11689_s1 + $0x1f0] sm:$0xff] }
  0x3b   : > { %v7726_v8 = vpack.c.bf16 %v6205_v3, %v6203_v2  ;;  %v6260_v2 = vld [vmem:[%s11689_s1 + $0x2a8] sm:$0xff]  ;;  %v6262_v3 = vld [vmem:[%s11689_s1 + $0x2b8] sm:$0xff] }
  0x3c   : > { %6131 = vmatmul.mubr.msk.f32.gmra.mrb[8].mxu0 %vm608_vm0, %v555_v9  ;;  %v7728_v9 = vpack.c.bf16 %v6210_v5, %v6208_v4  ;;  %v1317_v4 = vld [vmem:[%s9135_s17 + $0x12] sm:$0xff] }
  0x3d   : > { %799 = vmatprep.mubr.f32.mxu0 %v8919_v7  ;;  %7707 = vmatpush1.bf16.msra.mxu0 %v7706_v10  ;;  %v6207_v10 = vld [vmem:[%s11689_s1 + $0x200] sm:$0xff] }
  0x3e   : > { %7709 = vmatprep.subr.bf16.mxu0 %v7708_v11  ;;  %v6209_v11 = vld [vmem:[%s11689_s1 + $0x210] sm:$0xff] }
  0x3f   : > { %v7730_v15 = vpack.c.bf16 %v6209_v11, %v6207_v10  ;;  %v6264_v10 = vld [vmem:[%s11689_s1 + $0x2c8] sm:$0xff]  ;;  %v6266_v11 = vld [vmem:[%s11689_s1 + $0x2d8] sm:$0xff] }
  0x40   : > { %6132 = vmatmul.mubr.msk.f32.gmra.mrb[10].mxu0 %vm608_vm0, %v556_v16  ;;  %v7732_v16 = vpack.c.bf16 %v6214_v13, %v6212_v12  ;;  %v1318_v12 = vld [vmem:[%s9135_s17 + $0x1a] sm:$0xff] }
  0x41   : > { %805 = vmatprep.mubr.f32.mxu0 %v8919_v7  ;;  %7711 = vmatpush1.bf16.msra.mxu0 %v7710_v17  ;;  %v6211_v17 = vld [vmem:[%s11689_s1 + $0x220] sm:$0xff] }
  0x42   : > { %7713 = vmatprep.subr.bf16.mxu0 %v7712_v18  ;;  %v6213_v18 = vld [vmem:[%s11689_s1 + $0x230] sm:$0xff] }
  0x44   : > { %6133 = vmatmul.mubr.msk.f32.gmra.mrb[12].mxu0 %vm608_vm0, %v557_v19  ;;  %v6248_v19 = vld [vmem:[%s11689_s1 + $0x248] sm:$0xff] }
  0x45   : > { %811 = vmatprep.mubr.f32.mxu0 %v8919_v7 }
  0x48   : > { %6134 = vmatmul.mubr.msk.f32.gmra.mrb[14].mxu0 %vm608_vm0, %v558_v20  ;;  %v6250_v20 = vld [vmem:[%s11689_s1 + $0x258] sm:$0xff] }
  0x49   : > { %817 = vmatprep.mubr.f32.mxu0 %v8919_v7 }
  0x4c   : > { %6135 = vmatmul.mubr.msk.f32.gmra.mrb[16].mxu0 %vm608_vm0, %v559_v21  ;;  %v500_v21 = vld [vmem:[%s9135_s17 + $0x28] sm:$0xff] }
  0x4d   : > { %823 = vmatprep.mubr.f32.mxu0 %v8919_v7 }
  0x50   : > { %6136 = vmatmul.mubr.msk.f32.gmra.mrb[18].mxu0 %vm608_vm0, %v560_v22  ;;  %v7734_v22 = vpack.c.bf16 %v6213_v18, %v6211_v17  ;;  %v6268_v17 = vld [vmem:[%s11689_s1 + $0x2e8] sm:$0xff]  ;;  %v6270_v18 = vld [vmem:[%s11689_s1 + $0x2f8] sm:$0xff] }
  0x51   : > { %829 = vmatprep.mubr.f32.mxu0 %v8919_v7 }
  0x54   : > { %6137 = vmatmul.mubr.msk.f32.gmra.mrb[20].mxu0 %vm608_vm0, %v561_v23  ;;  %v7736_v23 = vpack.c.bf16 %v6250_v20, %v6248_v19  ;;  %v1319_v19 = vld [vmem:[%s9135_s17 + $0x22] sm:$0xff] }
  0x55   : > { %835 = vmatprep.mubr.f32.mxu0 %v8919_v7 }
  0x58   : > { %6138 = vmatmul.mubr.msk.f32.gmra.mrb[22].mxu0 %vm608_vm0, %v562_v24  ;;  %v501_v24 = vld [vmem:[%s9135_s17 + $0x30] sm:$0xff] }
  0x59   : > { %841 = vmatprep.mubr.f32.mxu0 %v8919_v7 }
  0x5c   : > { %6139 = vmatmul.mubr.msk.f32.gmra.mrb[24].mxu0 %vm608_vm0, %v563_v25  ;;  %v502_v25 = vld [vmem:[%s9135_s17 + $0x38] sm:$0xff] }
  0x5d   : > { %847 = vmatprep.mubr.f32.mxu0 %v8919_v7 }
  0x60   : > { %6140 = vmatmul.mubr.msk.f32.gmra.mrb[26].mxu0 %vm608_vm0, %v564_v26  ;;  %v503_v26 = vld [vmem:[%s9135_s17 + $0x40] sm:$0xff] }
  0x61   : > { %853 = vmatprep.mubr.f32.mxu0 %v8919_v7 }
  0x64   : > { %6141 = vmatmul.mubr.msk.f32.gmra.mrb[28].mxu0 %vm608_vm0, %v565_v27  ;;  %v504_v27 = vld [vmem:[%s9135_s17 + $0x48] sm:$0xff] }
  0x65   : > { %859 = vmatprep.mubr.f32.mxu0 %v8919_v7 }
  0x68   : > { %6142 = vmatmul.mubr.msk.f32.gmra.mrb[30].mxu0 %vm608_vm0, %v566_v28  ;;  %v505_v28 = vld [vmem:[%s9135_s17 + $0x50] sm:$0xff] }
  0x69   : > { %865 = vmatprep.mubr.f32.mxu0 %v8919_v7 }
  0x6c   : > { %6143 = vmatmul.mubr.msk.f32.gmra.mrb[32].mxu0 %vm608_vm0, %v567_v29  ;;  %v506_v29 = vld [vmem:[%s9135_s17 + $0x58] sm:$0xff] }
  0x6d   : > { %871 = vmatprep.mubr.f32.mxu0 %v8919_v7 }
  0x70   : > { %6144 = vmatmul.mubr.msk.f32.gmra.mrb[34].mxu0 %vm608_vm0, %v568_v30  ;;  %v507_v30 = vld [vmem:[%s9135_s17 + $0x60] sm:$0xff] }
  0x71   : > { %877 = vmatprep.mubr.f32.mxu0 %v8919_v7 }
  0x74   : > { %6145 = vmatmul.mubr.msk.f32.gmra.mrb[36].mxu0 %vm608_vm0, %v569_v31  ;;  %v508_v31 = vld [vmem:[%s9135_s17 + $0x68] sm:$0xff] }
  0x75   : > { %883 = vmatprep.mubr.f32.mxu0 %v8919_v7 }
  0x78   : > { %6146 = vmatmul.mubr.msk.f32.gmra.mrb[38].mxu0 %vm608_vm0, %v570_v32  ;;  %v509_v32 = vld [vmem:[%s9135_s17 + $0x70] sm:$0xff] }
  0x79   : > { %889 = vmatprep.mubr.f32.mxu0 %v8919_v7 }
  0x7c   : > { %6147 = vmatmul.mubr.msk.f32.gmra.mrb[40].mxu0 %vm608_vm0, %v571_v33  ;;  %v510_v33 = vld [vmem:[%s9135_s17 + $0x78] sm:$0xff] }
  0x7d   : > { %895 = vmatprep.mubr.f32.mxu0 %v8919_v7 }
  0x80   : > { %6148 = vmatmul.mubr.msk.f32.gmra.mrb[42].mxu0 %vm608_vm0, %v572_v34  ;;  %v511_v34 = vld [vmem:[%s9135_s17 + $0x80] sm:$0xff] }
  0x81   : > { %901 = vmatprep.mubr.f32.mxu0 %v8919_v7 }
  0x84   : > { %6149 = vmatmul.mubr.msk.f32.gmra.mrb[44].mxu0 %vm608_vm0, %v573_v35  ;;  %v512_v35 = vld [vmem:[%s9135_s17 + $0x88] sm:$0xff] }
  0x85   : > { %907 = vmatprep.mubr.f32.mxu0 %v8919_v7 }
  0x88   : > { %6150 = vmatmul.mubr.msk.f32.gmra.mrb[46].mxu0 %vm608_vm0, %v574_v36  ;;  %v513_v36 = vld [vmem:[%s9135_s17 + $0x90] sm:$0xff] }
  0x89   : > { %913 = vmatprep.mubr.f32.mxu0 %v8919_v7 }
  0x8c   : > { %6151 = vmatmul.mubr.msk.f32.gmra.mrb[48].mxu0 %vm608_vm0, %v575_v37  ;;  %v514_v37 = vld [vmem:[%s9135_s17 + $0x98] sm:$0xff] }
  0x8d   : > { %919 = vmatprep.mubr.f32.mxu0 %v8919_v7 }
  0x90   : > { %6152 = vmatmul.mubr.msk.f32.gmra.mrb[50].mxu0 %vm608_vm0, %v576_v38  ;;  %v515_v38 = vld [vmem:[%s9135_s17 + $0xa0] sm:$0xff] }
  0x91   : > { %925 = vmatprep.mubr.f32.mxu0 %v8919_v7 }
  0x94   : > { %6153 = vmatmul.mubr.msk.f32.gmra.mrb[52].mxu0 %vm608_vm0, %v577_v39  ;;  %v516_v39 = vld [vmem:[%s9135_s17 + $0xa8] sm:$0xff] }
  0x95   : > { %931 = vmatprep.mubr.f32.mxu0 %v8919_v7 }
  0x98   : > { %6154 = vmatmul.mubr.msk.f32.gmra.mrb[54].mxu0 %vm608_vm0, %v578_v40  ;;  %v517_v40 = vld [vmem:[%s9135_s17 + $0xb0] sm:$0xff] }
  0x99   : > { %937 = vmatprep.mubr.f32.mxu0 %v8919_v7 }
  0x9c   : > { %6155 = vmatmul.mubr.msk.f32.gmra.mrb[56].mxu0 %vm608_vm0, %v579_v41  ;;  %v518_v41 = vld [vmem:[%s9135_s17 + $0xb8] sm:$0xff] }
  0x9d   : > { %943 = vmatprep.mubr.f32.mxu0 %v8919_v7 }
  0xa0   : > { %6156 = vmatmul.mubr.msk.f32.gmra.mrb[58].mxu0 %vm608_vm0, %v580_v42  ;;  %v519_v42 = vld [vmem:[%s9135_s17 + $0xc0] sm:$0xff] }
  0xa1   : > { %949 = vmatprep.mubr.f32.mxu0 %v8919_v7 }
  0xa4   : > { %6157 = vmatmul.mubr.msk.f32.gmra.mrb[60].mxu0 %vm608_vm0, %v581_v43  ;;  %v520_v43 = vld [vmem:[%s9135_s17 + $0xc8] sm:$0xff] }
  0xa5   : > { %955 = vmatprep.mubr.f32.mxu0 %v8919_v7 }
  0xa8   : > { %6158 = vmatmul.mubr.msk.f32.gmra.mrb[62].mxu0 %vm608_vm0, %v582_v44  ;;  %v521_v44 = vld [vmem:[%s9135_s17 + $0xd0] sm:$0xff] }
  0xa9   : > { %1122 = vmatprep.mubr.f32.mxu0 %v8919_v7 }
  0xac   : > { %6159 = vmatmul.mubr.msk.f32.vlgmr.msra.gmra.mrb[0].mxu0 %vm608_vm0, %v495_v49  ;;  %v526_v49 = vld [vmem:[%s9135_s17 + $0xf8] sm:$0xf] }
  0xad   : > { %1128 = vmatprep.mubr.f32.mxu0 %v8919_v7  ;;  %7715 = vmatpush1.bf16.msra.mxu0 %v7714_v50  ;;  %v6247_v50 = vld [vmem:[%s11689_s1 + $0x240] sm:$0xff] }
  0xae   : > { %7717 = vmatprep.subr.bf16.mxu0 %v7716_v51  ;;  %v6249_v51 = vld [vmem:[%s11689_s1 + $0x250] sm:$0xff] }
  0xaf   : > { %v7738_v55 = vpack.c.bf16 %v6249_v51, %v6247_v50  ;;  %v1342_v50 = vld [vmem:[%s9135_s17 + $0xda] sm:$0xff]  ;;  %v1343_v51 = vld [vmem:[%s9135_s17 + $0xe2] sm:$0xff] }
  0xb0   : > { %6160 = vmatmul.mubr.msk.f32.gmra.mrb[2].mxu0 %vm608_vm0, %v496_v56  ;;  %v7740_v56 = vpack.c.bf16 %v6254_v53, %v6252_v52  ;;  %v1344_v52 = vld [vmem:[%s9135_s17 + $0xea] sm:$0xff]  ;;  %v1345_v53 = vld [vmem:[%s9135_s17 + $0xf2] sm:$0xff] }
  0xb1   : > { %1134 = vmatprep.mubr.f32.mxu0 %v8919_v7  ;;  %7719 = vmatpush1.bf16.msra.mxu0 %v7718_v57  ;;  %v6251_v57 = vld [vmem:[%s11689_s1 + $0x260] sm:$0xff] }
  0xb2   : > { %7721 = vmatprep.subr.bf16.mxu0 %v7720_v58  ;;  %v6253_v58 = vld [vmem:[%s11689_s1 + $0x270] sm:$0xff] }
  0xb3   : > { %v7742_v62 = vpack.c.bf16 %v6253_v58, %v6251_v57  ;;  %v6308_v57 = vld [vmem:[%s11689_s1 + $0x328] sm:$0xff]  ;;  %v6310_v58 = vld [vmem:[%s11689_s1 + $0x338] sm:$0xff] }
  0xb4   : > { %6161 = vmatmul.mubr.msk.f32.gmra.mrb[4].mxu0 %vm608_vm0, %v497_v63  ;;  %v7744_v63 = vpack.c.bf16 %v6258_v60, %v6256_v59  ;;  %v1789_v59 = vld [vmem:[%s9135_s17 + $0x3] sm:$0xff] }
  0xb5   : > { %1140 = vmatprep.mubr.f32.mxu0 %v8919_v7  ;;  %7723 = vmatpush1.bf16.msra.mxu0 %v7722_v0  ;;  %v6255_v0 = vld [vmem:[%s11689_s1 + $0x280] sm:$0xff] }
  0xb6   : > { %7725 = vmatprep.subr.bf16.mxu0 %v7724_v1  ;;  %v6257_v1 = vld [vmem:[%s11689_s1 + $0x290] sm:$0xff] }
  0xb7   : > { %v7746_v5 = vpack.c.bf16 %v6257_v1, %v6255_v0  ;;  %v6312_v0 = vld [vmem:[%s11689_s1 + $0x348] sm:$0xff]  ;;  %v6314_v1 = vld [vmem:[%s11689_s1 + $0x358] sm:$0xff] }
  0xb8   : > { %6162 = vmatmul.mubr.msk.f32.gmra.mrb[6].mxu0 %vm608_vm0, %v498_v6  ;;  %v7748_v6 = vpack.c.bf16 %v6262_v3, %v6260_v2  ;;  %v1790_v2 = vld [vmem:[%s9135_s17 + $0xb] sm:$0xff] }
  0xb9   : > { %1146 = vmatprep.mubr.f32.mxu0 %v8919_v7  ;;  %7727 = vmatpush1.bf16.msra.mxu0 %v7726_v8  ;;  %v6259_v8 = vld [vmem:[%s11689_s1 + $0x2a0] sm:$0xff] }
  0xba   : > { %7729 = vmatprep.subr.bf16.mxu0 %v7728_v9  ;;  %v6261_v9 = vld [vmem:[%s11689_s1 + $0x2b0] sm:$0xff] }
  0xbb   : > { %v7750_v13 = vpack.c.bf16 %v6261_v9, %v6259_v8  ;;  %v6316_v8 = vld [vmem:[%s11689_s1 + $0x368] sm:$0xff]  ;;  %v6318_v9 = vld [vmem:[%s11689_s1 + $0x378] sm:$0xff] }
  0xbc   : > { %6163 = vmatmul.mubr.msk.f32.gmra.mrb[8].mxu0 %vm608_vm0, %v499_v14  ;;  %v7752_v14 = vpack.c.bf16 %v6266_v11, %v6264_v10  ;;  %v1791_v10 = vld [vmem:[%s9135_s17 + $0x13] sm:$0xff] }
  0xbd   : > { %1152 = vmatprep.mubr.f32.mxu0 %v8919_v7  ;;  %7731 = vmatpush1.bf16.msra.mxu0 %v7730_v15  ;;  %v6263_v15 = vld [vmem:[%s11689_s1 + $0x2c0] sm:$0xff] }
  0xbe   : > { %7733 = vmatprep.subr.bf16.mxu0 %v7732_v16  ;;  %v6265_v16 = vld [vmem:[%s11689_s1 + $0x2d0] sm:$0xff] }
  0xbf   : > { %v7754_v20 = vpack.c.bf16 %v6265_v16, %v6263_v15  ;;  %v6320_v15 = vld [vmem:[%s11689_s1 + $0x388] sm:$0xff]  ;;  %v6322_v16 = vld [vmem:[%s11689_s1 + $0x398] sm:$0xff] }
  0xc0   : > { %6164 = vmatmul.mubr.msk.f32.gmra.mrb[10].mxu0 %vm608_vm0, %v500_v21  ;;  %v7756_v21 = vpack.c.bf16 %v6270_v18, %v6268_v17  ;;  %v1792_v17 = vld [vmem:[%s9135_s17 + $0x1b] sm:$0xff] }
  0xc1   : > { %1158 = vmatprep.mubr.f32.mxu0 %v8919_v7  ;;  %7735 = vmatpush1.bf16.msra.mxu0 %v7734_v22  ;;  %v6267_v22 = vld [vmem:[%s11689_s1 + $0x2e0] sm:$0xff] }
  0xc2   : > { %7737 = vmatprep.subr.bf16.mxu0 %v7736_v23  ;;  %v6269_v23 = vld [vmem:[%s11689_s1 + $0x2f0] sm:$0xff] }
  0xc4   : > { %6165 = vmatmul.mubr.msk.f32.gmra.mrb[12].mxu0 %vm608_vm0, %v501_v24  ;;  %v6304_v24 = vld [vmem:[%s11689_s1 + $0x308] sm:$0xff] }
  0xc5   : > { %1164 = vmatprep.mubr.f32.mxu0 %v8919_v7 }
  0xc8   : > { %6166 = vmatmul.mubr.msk.f32.gmra.mrb[14].mxu0 %vm608_vm0, %v502_v25  ;;  %v6306_v25 = vld [vmem:[%s11689_s1 + $0x318] sm:$0xff] }
  0xc9   : > { %1170 = vmatprep.mubr.f32.mxu0 %v8919_v7 }
  0xcc   : > { %6167 = vmatmul.mubr.msk.f32.gmra.mrb[16].mxu0 %vm608_vm0, %v503_v26  ;;  %v1320_v26 = vld [vmem:[%s9135_s17 + $0x2a] sm:$0xff] }
  0xcd   : > { %1176 = vmatprep.mubr.f32.mxu0 %v8919_v7 }
  0xd0   : > { %6168 = vmatmul.mubr.msk.f32.gmra.mrb[18].mxu0 %vm608_vm0, %v504_v27  ;;  %v7758_v27 = vpack.c.bf16 %v6269_v23, %v6267_v22  ;;  %v6324_v22 = vld [vmem:[%s11689_s1 + $0x3a8] sm:$0xff]  ;;  %v6326_v23 = vld [vmem:[%s11689_s1 + $0x3b8] sm:$0xff] }
  0xd1   : > { %1182 = vmatprep.mubr.f32.mxu0 %v8919_v7 }
  0xd4   : > { %6169 = vmatmul.mubr.msk.f32.gmra.mrb[20].mxu0 %vm608_vm0, %v505_v28  ;;  %v7760_v28 = vpack.c.bf16 %v6306_v25, %v6304_v24  ;;  %v1793_v24 = vld [vmem:[%s9135_s17 + $0x23] sm:$0xff] }
  0xd5   : > { %1188 = vmatprep.mubr.f32.mxu0 %v8919_v7 }
  0xd8   : > { %6170 = vmatmul.mubr.msk.f32.gmra.mrb[22].mxu0 %vm608_vm0, %v506_v29  ;;  %v1321_v29 = vld [vmem:[%s9135_s17 + $0x32] sm:$0xff] }
  0xd9   : > { %1194 = vmatprep.mubr.f32.mxu0 %v8919_v7 }
  0xdc   : > { %6171 = vmatmul.mubr.msk.f32.gmra.mrb[24].mxu0 %vm608_vm0, %v507_v30  ;;  %v1322_v30 = vld [vmem:[%s9135_s17 + $0x3a] sm:$0xff] }
  0xdd   : > { %1200 = vmatprep.mubr.f32.mxu0 %v8919_v7 }
  0xe0   : > { %6172 = vmatmul.mubr.msk.f32.gmra.mrb[26].mxu0 %vm608_vm0, %v508_v31  ;;  %v1323_v31 = vld [vmem:[%s9135_s17 + $0x42] sm:$0xff] }
  0xe1   : > { %1206 = vmatprep.mubr.f32.mxu0 %v8919_v7 }
  0xe4   : > { %6173 = vmatmul.mubr.msk.f32.gmra.mrb[28].mxu0 %vm608_vm0, %v509_v32  ;;  %v1324_v32 = vld [vmem:[%s9135_s17 + $0x4a] sm:$0xff] }
  0xe5   : > { %1212 = vmatprep.mubr.f32.mxu0 %v8919_v7 }
  0xe8   : > { %6174 = vmatmul.mubr.msk.f32.gmra.mrb[30].mxu0 %vm608_vm0, %v510_v33  ;;  %v1325_v33 = vld [vmem:[%s9135_s17 + $0x52] sm:$0xff] }
  0xe9   : > { %1218 = vmatprep.mubr.f32.mxu0 %v8919_v7 }
  0xec   : > { %6175 = vmatmul.mubr.msk.f32.gmra.mrb[32].mxu0 %vm608_vm0, %v511_v34  ;;  %v1326_v34 = vld [vmem:[%s9135_s17 + $0x5a] sm:$0xff] }
  0xed   : > { %1224 = vmatprep.mubr.f32.mxu0 %v8919_v7 }
  0xf0   : > { %6176 = vmatmul.mubr.msk.f32.gmra.mrb[34].mxu0 %vm608_vm0, %v512_v35  ;;  %v1327_v35 = vld [vmem:[%s9135_s17 + $0x62] sm:$0xff] }
  0xf1   : > { %1230 = vmatprep.mubr.f32.mxu0 %v8919_v7 }
  0xf4   : > { %6177 = vmatmul.mubr.msk.f32.gmra.mrb[36].mxu0 %vm608_vm0, %v513_v36  ;;  %v1328_v36 = vld [vmem:[%s9135_s17 + $0x6a] sm:$0xff] }
  0xf5   : > { %1236 = vmatprep.mubr.f32.mxu0 %v8919_v7 }
  0xf8   : > { %6178 = vmatmul.mubr.msk.f32.gmra.mrb[38].mxu0 %vm608_vm0, %v514_v37  ;;  %v1329_v37 = vld [vmem:[%s9135_s17 + $0x72] sm:$0xff] }
  0xf9   : > { %1242 = vmatprep.mubr.f32.mxu0 %v8919_v7 }
  0xfc   : > { %6179 = vmatmul.mubr.msk.f32.gmra.mrb[40].mxu0 %vm608_vm0, %v515_v38  ;;  %v1330_v38 = vld [vmem:[%s9135_s17 + $0x7a] sm:$0xff] }
  0xfd   : > { %1248 = vmatprep.mubr.f32.mxu0 %v8919_v7 }
 0x100   : > { %6180 = vmatmul.mubr.msk.f32.gmra.mrb[42].mxu0 %vm608_vm0, %v516_v39  ;;  %v1331_v39 = vld [vmem:[%s9135_s17 + $0x82] sm:$0xff] }
 0x101   : > { %1254 = vmatprep.mubr.f32.mxu0 %v8919_v7 }
 0x104   : > { %6181 = vmatmul.mubr.msk.f32.gmra.mrb[44].mxu0 %vm608_vm0, %v517_v40  ;;  %v1332_v40 = vld [vmem:[%s9135_s17 + $0x8a] sm:$0xff] }
 0x105   : > { %1260 = vmatprep.mubr.f32.mxu0 %v8919_v7 }
 0x108   : > { %6182 = vmatmul.mubr.msk.f32.gmra.mrb[46].mxu0 %vm608_vm0, %v518_v41  ;;  %v1333_v41 = vld [vmem:[%s9135_s17 + $0x92] sm:$0xff] }
 0x109   : > { %1266 = vmatprep.mubr.f32.mxu0 %v8919_v7 }
 0x10c   : > { %6183 = vmatmul.mubr.msk.f32.gmra.mrb[48].mxu0 %vm608_vm0, %v519_v42  ;;  %v1334_v42 = vld [vmem:[%s9135_s17 + $0x9a] sm:$0xff] }
 0x10d   : > { %1272 = vmatprep.mubr.f32.mxu0 %v8919_v7 }
 0x110   : > { %6184 = vmatmul.mubr.msk.f32.gmra.mrb[50].mxu0 %vm608_vm0, %v520_v43  ;;  %v1335_v43 = vld [vmem:[%s9135_s17 + $0xa2] sm:$0xff] }
 0x111   : > { %1278 = vmatprep.mubr.f32.mxu0 %v8919_v7 }
 0x114   : > { %6185 = vmatmul.mubr.msk.f32.gmra.mrb[52].mxu0 %vm608_vm0, %v521_v44  ;;  %v1336_v44 = vld [vmem:[%s9135_s17 + $0xaa] sm:$0xff] }
 0x115   : > { %1284 = vmatprep.mubr.f32.mxu0 %v8919_v7 }
 0x118   : > { %6186 = vmatmul.mubr.msk.f32.gmra.mrb[54].mxu0 %vm608_vm0, %v522_v45  ;;  %v1337_v45 = vld [vmem:[%s9135_s17 + $0xb2] sm:$0xff] }
 0x119   : > { %1290 = vmatprep.mubr.f32.mxu0 %v8919_v7 }
 0x11c   : > { %6187 = vmatmul.mubr.msk.f32.gmra.mrb[56].mxu0 %vm608_vm0, %v523_v46  ;;  %v1338_v46 = vld [vmem:[%s9135_s17 + $0xba] sm:$0xff] }
 0x11d   : > { %1296 = vmatprep.mubr.f32.mxu0 %v8919_v7 }
 0x120   : > { %6188 = vmatmul.mubr.msk.f32.gmra.mrb[58].mxu0 %vm608_vm0, %v524_v47  ;;  %v1339_v47 = vld [vmem:[%s9135_s17 + $0xc2] sm:$0xff] }
 0x121   : > { %1302 = vmatprep.mubr.f32.mxu0 %v8919_v7 }
 0x124   : > { %6189 = vmatmul.mubr.msk.f32.gmra.mrb[60].mxu0 %vm608_vm0, %v525_v48  ;;  %v1340_v48 = vld [vmem:[%s9135_s17 + $0xca] sm:$0xff] }
 0x125   : > { %1308 = vmatprep.mubr.f32.mxu0 %v8919_v7 }
 0x128   : > { %6190 = vmatmul.mubr.msk.f32.gmra.mrb[62].mxu0 %vm608_vm0, %v526_v49  ;;  %v1341_v49 = vld [vmem:[%s9135_s17 + $0xd2] sm:$0xff] }
 0x129   : > { %1532 = vmatprep.mubr.f32.mxu0 %v8919_v7 }
 0x12c   : > { %6215 = vmatmul.mubr.msk.f32.vlgmr.msra.gmra.mrb[0].mxu0 %vm608_vm0, %v1315_v54  ;;  %v1346_v54 = vld [vmem:[%s9135_s17 + $0xfa] sm:$0xf] }
 0x12d   : > { %1538 = vmatprep.mubr.f32.mxu0 %v8919_v7  ;;  %7739 = vmatpush1.bf16.msra.mxu0 %v7738_v55  ;;  %v6303_v55 = vld [vmem:[%s11689_s1 + $0x300] sm:$0xff] }
 0x12e   : > { %7741 = vmatprep.subr.bf16.mxu0 %v7740_v56  ;;  %v6305_v56 = vld [vmem:[%s11689_s1 + $0x310] sm:$0xff] }
 0x12f   : > { %v7762_v60 = vpack.c.bf16 %v6305_v56, %v6303_v55  ;;  %v1819_v55 = vld [vmem:[%s9135_s17 + $0xf3] sm:$0xff]  ;;  %v1820_v56 = vld [vmem:[%s9135_s17 + $0xfb] sm:$0xf] }
 0x130   : > { %6216 = vmatmul.mubr.msk.f32.gmra.mrb[2].mxu0 %vm608_vm0, %v1316_v61  ;;  %v7764_v61 = vpack.c.bf16 %v6310_v58, %v6308_v57  ;;  %v2263_v57 = vld [vmem:[%s9135_s17 + $0x4] sm:$0xff]  ;;  %v2264_v58 = vld [vmem:[%s9135_s17 + $0xc] sm:$0xff] }
 0x131   : > { %1544 = vmatprep.mubr.f32.mxu0 %v8919_v7  ;;  %7743 = vmatpush1.bf16.msra.mxu0 %v7742_v62  ;;  %v6307_v62 = vld [vmem:[%s11689_s1 + $0x320] sm:$0xff] }
 0x132   : > { %7745 = vmatprep.subr.bf16.mxu0 %v7744_v63  ;;  %v6309_v63 = vld [vmem:[%s11689_s1 + $0x330] sm:$0xff] }
 0x133   : > { %v7766_v3 = vpack.c.bf16 %v6309_v63, %v6307_v62  ;;  %v2268_v62 = vld [vmem:[%s9135_s17 + $0x2c] sm:$0xff]  ;;  %v2269_v63 = vld [vmem:[%s9135_s17 + $0x34] sm:$0xff] }
 0x134   : > { %6217 = vmatmul.mubr.msk.f32.gmra.mrb[4].mxu0 %vm608_vm0, %v1317_v4  ;;  %v7768_v4 = vpack.c.bf16 %v6314_v1, %v6312_v0  ;;  %v2270_v0 = vld [vmem:[%s9135_s17 + $0x3c] sm:$0xff]  ;;  %v2271_v1 = vld [vmem:[%s9135_s17 + $0x44] sm:$0xff] }
 0x135   : > { %1550 = vmatprep.mubr.f32.mxu0 %v8919_v7  ;;  %7747 = vmatpush1.bf16.msra.mxu0 %v7746_v5  ;;  %v6311_v5 = vld [vmem:[%s11689_s1 + $0x340] sm:$0xff] }
 0x136   : > { %7749 = vmatprep.subr.bf16.mxu0 %v7748_v6  ;;  %v6313_v6 = vld [vmem:[%s11689_s1 + $0x350] sm:$0xff] }
 0x137   : > { %v7770_v11 = vpack.c.bf16 %v6313_v6, %v6311_v5  ;;  %v2275_v5 = vld [vmem:[%s9135_s17 + $0x64] sm:$0xff]  ;;  %v2276_v6 = vld [vmem:[%s9135_s17 + $0x6c] sm:$0xff] }
 0x138   : > { %6218 = vmatmul.mubr.msk.f32.gmra.mrb[6].mxu0 %vm608_vm0, %v1318_v12  ;;  %v7772_v12 = vpack.c.bf16 %v6318_v9, %v6316_v8  ;;  %v2277_v8 = vld [vmem:[%s9135_s17 + $0x74] sm:$0xff]  ;;  %v2278_v9 = vld [vmem:[%s9135_s17 + $0x7c] sm:$0xff] }
 0x139   : > { %1556 = vmatprep.mubr.f32.mxu0 %v8919_v7  ;;  %7751 = vmatpush1.bf16.msra.mxu0 %v7750_v13  ;;  %v6315_v13 = vld [vmem:[%s11689_s1 + $0x360] sm:$0xff] }
 0x13a   : > { %7753 = vmatprep.subr.bf16.mxu0 %v7752_v14  ;;  %v6317_v14 = vld [vmem:[%s11689_s1 + $0x370] sm:$0xff] }
 0x13b   : > { %v7774_v18 = vpack.c.bf16 %v6317_v14, %v6315_v13  ;;  %v2282_v13 = vld [vmem:[%s9135_s17 + $0x9c] sm:$0xff]  ;;  %v2283_v14 = vld [vmem:[%s9135_s17 + $0xa4] sm:$0xff] }
 0x13c   : > { %6219 = vmatmul.mubr.msk.f32.gmra.mrb[8].mxu0 %vm608_vm0, %v1319_v19  ;;  %v7776_v19 = vpack.c.bf16 %v6322_v16, %v6320_v15  ;;  %v2284_v15 = vld [vmem:[%s9135_s17 + $0xac] sm:$0xff]  ;;  %v2285_v16 = vld [vmem:[%s9135_s17 + $0xb4] sm:$0xff] }
 0x13d   : > { %1562 = vmatprep.mubr.f32.mxu0 %v8919_v7  ;;  %7755 = vmatpush1.bf16.msra.mxu0 %v7754_v20  ;;  %v6319_v20 = vld [vmem:[%s11689_s1 + $0x380] sm:$0xff] }
 0x13e   : > { %7757 = vmatprep.subr.bf16.mxu0 %v7756_v21  ;;  %v6321_v21 = vld [vmem:[%s11689_s1 + $0x390] sm:$0xff] }
 0x13f   : > { %v7778_v25 = vpack.c.bf16 %v6321_v21, %v6319_v20  ;;  %v2289_v20 = vld [vmem:[%s9135_s17 + $0xd4] sm:$0xff]  ;;  %v2290_v21 = vld [vmem:[%s9135_s17 + $0xdc] sm:$0xff] }
 0x140   : > { %6220 = vmatmul.mubr.msk.f32.gmra.mrb[10].mxu0 %vm608_vm0, %v1320_v26  ;;  %v7780_v26 = vpack.c.bf16 %v6326_v23, %v6324_v22  ;;  %v2291_v22 = vld [vmem:[%s9135_s17 + $0xe4] sm:$0xff]  ;;  %v2292_v23 = vld [vmem:[%s9135_s17 + $0xec] sm:$0xff] }
 0x141   : > { %1568 = vmatprep.mubr.f32.mxu0 %v8919_v7  ;;  %7759 = vmatpush1.bf16.msra.mxu0 %v7758_v27  ;;  %v6323_v27 = vld [vmem:[%s11689_s1 + $0x3a0] sm:$0xff] }
 0x142   : > { %7761 = vmatprep.subr.bf16.mxu0 %v7760_v28  ;;  %v6325_v28 = vld [vmem:[%s11689_s1 + $0x3b0] sm:$0xff] }
 0x144   : > { %6221 = vmatmul.mubr.msk.f32.gmra.mrb[12].mxu0 %vm608_vm0, %v1321_v29  ;;  %v1794_v29 = vld [vmem:[%s9135_s17 + $0x2b] sm:$0xff] }
 0x145   : > { %1574 = vmatprep.mubr.f32.mxu0 %v8919_v7 }
 0x148   : > { %6222 = vmatmul.mubr.msk.f32.gmra.mrb[14].mxu0 %vm608_vm0, %v1322_v30  ;;  %v7782_v30 = vpack.c.bf16 %v6325_v28, %v6323_v27 }
 0x149   : > { %1580 = vmatprep.mubr.f32.mxu0 %v8919_v7 }
 0x14c   : > { %6223 = vmatmul.mubr.msk.f32.gmra.mrb[16].mxu0 %vm608_vm0, %v1323_v31  ;;  %v1795_v31 = vld [vmem:[%s9135_s17 + $0x33] sm:$0xff] }
 0x14d   : > { %1586 = vmatprep.mubr.f32.mxu0 %v8919_v7 }
 0x150   : > { %6224 = vmatmul.mubr.msk.f32.gmra.mrb[18].mxu0 %vm608_vm0, %v1324_v32  ;;  %v1796_v32 = vld [vmem:[%s9135_s17 + $0x3b] sm:$0xff] }
 0x151   : > { %1592 = vmatprep.mubr.f32.mxu0 %v8919_v7 }
 0x154   : > { %6225 = vmatmul.mubr.msk.f32.gmra.mrb[20].mxu0 %vm608_vm0, %v1325_v33  ;;  %v1797_v33 = vld [vmem:[%s9135_s17 + $0x43] sm:$0xff] }
 0x155   : > { %1598 = vmatprep.mubr.f32.mxu0 %v8919_v7 }
 0x158   : > { %6226 = vmatmul.mubr.msk.f32.gmra.mrb[22].mxu0 %vm608_vm0, %v1326_v34  ;;  %v1798_v34 = vld [vmem:[%s9135_s17 + $0x4b] sm:$0xff] }
 0x159   : > { %1604 = vmatprep.mubr.f32.mxu0 %v8919_v7 }
 0x15c   : > { %6227 = vmatmul.mubr.msk.f32.gmra.mrb[24].mxu0 %vm608_vm0, %v1327_v35  ;;  %v1799_v35 = vld [vmem:[%s9135_s17 + $0x53] sm:$0xff] }
 0x15d   : > { %1610 = vmatprep.mubr.f32.mxu0 %v8919_v7 }
 0x160   : > { %6228 = vmatmul.mubr.msk.f32.gmra.mrb[26].mxu0 %vm608_vm0, %v1328_v36  ;;  %v1800_v36 = vld [vmem:[%s9135_s17 + $0x5b] sm:$0xff] }
 0x161   : > { %1616 = vmatprep.mubr.f32.mxu0 %v8919_v7 }
 0x164   : > { %6229 = vmatmul.mubr.msk.f32.gmra.mrb[28].mxu0 %vm608_vm0, %v1329_v37  ;;  %v1801_v37 = vld [vmem:[%s9135_s17 + $0x63] sm:$0xff] }
 0x165   : > { %1622 = vmatprep.mubr.f32.mxu0 %v8919_v7 }
 0x168   : > { %6230 = vmatmul.mubr.msk.f32.gmra.mrb[30].mxu0 %vm608_vm0, %v1330_v38  ;;  %v1802_v38 = vld [vmem:[%s9135_s17 + $0x6b] sm:$0xff] }
 0x169   : > { %1628 = vmatprep.mubr.f32.mxu0 %v8919_v7 }
 0x16c   : > { %6231 = vmatmul.mubr.msk.f32.gmra.mrb[32].mxu0 %vm608_vm0, %v1331_v39  ;;  %v1803_v39 = vld [vmem:[%s9135_s17 + $0x73] sm:$0xff] }
 0x16d   : > { %1634 = vmatprep.mubr.f32.mxu0 %v8919_v7 }
 0x170   : > { %6232 = vmatmul.mubr.msk.f32.gmra.mrb[34].mxu0 %vm608_vm0, %v1332_v40  ;;  %v1804_v40 = vld [vmem:[%s9135_s17 + $0x7b] sm:$0xff] }
 0x171   : > { %1640 = vmatprep.mubr.f32.mxu0 %v8919_v7 }
 0x174   : > { %6233 = vmatmul.mubr.msk.f32.gmra.mrb[36].mxu0 %vm608_vm0, %v1333_v41  ;;  %v1805_v41 = vld [vmem:[%s9135_s17 + $0x83] sm:$0xff] }
 0x175   : > { %1646 = vmatprep.mubr.f32.mxu0 %v8919_v7 }
 0x178   : > { %6234 = vmatmul.mubr.msk.f32.gmra.mrb[38].mxu0 %vm608_vm0, %v1334_v42  ;;  %v1806_v42 = vld [vmem:[%s9135_s17 + $0x8b] sm:$0xff] }
 0x179   : > { %1652 = vmatprep.mubr.f32.mxu0 %v8919_v7 }
 0x17c   : > { %6235 = vmatmul.mubr.msk.f32.gmra.mrb[40].mxu0 %vm608_vm0, %v1335_v43  ;;  %v1807_v43 = vld [vmem:[%s9135_s17 + $0x93] sm:$0xff] }
 0x17d   : > { %1658 = vmatprep.mubr.f32.mxu0 %v8919_v7 }
 0x180   : > { %6236 = vmatmul.mubr.msk.f32.gmra.mrb[42].mxu0 %vm608_vm0, %v1336_v44  ;;  %v1808_v44 = vld [vmem:[%s9135_s17 + $0x9b] sm:$0xff] }
 0x181   : > { %1664 = vmatprep.mubr.f32.mxu0 %v8919_v7 }
 0x184   : > { %6237 = vmatmul.mubr.msk.f32.gmra.mrb[44].mxu0 %vm608_vm0, %v1337_v45  ;;  %v1809_v45 = vld [vmem:[%s9135_s17 + $0xa3] sm:$0xff] }
 0x185   : > { %1670 = vmatprep.mubr.f32.mxu0 %v8919_v7 }
 0x188   : > { %6238 = vmatmul.mubr.msk.f32.gmra.mrb[46].mxu0 %vm608_vm0, %v1338_v46  ;;  %v1810_v46 = vld [vmem:[%s9135_s17 + $0xab] sm:$0xff] }
 0x189   : > { %1676 = vmatprep.mubr.f32.mxu0 %v8919_v7 }
 0x18c   : > { %6239 = vmatmul.mubr.msk.f32.gmra.mrb[48].mxu0 %vm608_vm0, %v1339_v47  ;;  %v1811_v47 = vld [vmem:[%s9135_s17 + $0xb3] sm:$0xff] }
 0x18d   : > { %1682 = vmatprep.mubr.f32.mxu0 %v8919_v7 }
 0x190   : > { %6240 = vmatmul.mubr.msk.f32.gmra.mrb[50].mxu0 %vm608_vm0, %v1340_v48  ;;  %v1812_v48 = vld [vmem:[%s9135_s17 + $0xbb] sm:$0xff] }
 0x191   : > { %1688 = vmatprep.mubr.f32.mxu0 %v8919_v7 }
 0x194   : > { %6241 = vmatmul.mubr.msk.f32.gmra.mrb[52].mxu0 %vm608_vm0, %v1341_v49  ;;  %v1813_v49 = vld [vmem:[%s9135_s17 + $0xc3] sm:$0xff] }
 0x195   : > { %1694 = vmatprep.mubr.f32.mxu0 %v8919_v7 }
 0x198   : > { %6242 = vmatmul.mubr.msk.f32.gmra.mrb[54].mxu0 %vm608_vm0, %v1342_v50  ;;  %v1814_v50 = vld [vmem:[%s9135_s17 + $0xcb] sm:$0xff] }
 0x199   : > { %1700 = vmatprep.mubr.f32.mxu0 %v8919_v7 }
 0x19c   : > { %6243 = vmatmul.mubr.msk.f32.gmra.mrb[56].mxu0 %vm608_vm0, %v1343_v51  ;;  %v1815_v51 = vld [vmem:[%s9135_s17 + $0xd3] sm:$0xff] }
 0x19d   : > { %1706 = vmatprep.mubr.f32.mxu0 %v8919_v7 }
 0x1a0   : > { %6244 = vmatmul.mubr.msk.f32.gmra.mrb[58].mxu0 %vm608_vm0, %v1344_v52  ;;  %v1816_v52 = vld [vmem:[%s9135_s17 + $0xdb] sm:$0xff] }
 0x1a1   : > { %1712 = vmatprep.mubr.f32.mxu0 %v8919_v7 }
 0x1a4   : > { %6245 = vmatmul.mubr.msk.f32.gmra.mrb[60].mxu0 %vm608_vm0, %v1345_v53  ;;  %v1817_v53 = vld [vmem:[%s9135_s17 + $0xe3] sm:$0xff] }
 0x1a5   : > { %1718 = vmatprep.mubr.f32.mxu0 %v8919_v7 }
 0x1a8   : > { %6246 = vmatmul.mubr.msk.f32.gmra.mrb[62].mxu0 %vm608_vm0, %v1346_v54  ;;  %v1818_v54 = vld [vmem:[%s9135_s17 + $0xeb] sm:$0xff] }
 0x1a9   : > { %2006 = vmatprep.mubr.f32.mxu0 %v8919_v7 }
 0x1ac   : > { %6271 = vmatmul.mubr.msk.f32.vlgmr.msra.gmra.mrb[0].mxu0 %vm608_vm0, %v1789_v59  ;;  %v2265_v59 = vld [vmem:[%s9135_s17 + $0x14] sm:$0xff] }
 0x1ad   : > { %2012 = vmatprep.mubr.f32.mxu0 %v8919_v7  ;;  %7763 = vmatpush1.bf16.msra.mxu0 %v7762_v60  ;;  %v2266_v60 = vld [vmem:[%s9135_s17 + $0x1c] sm:$0xff] }
 0x1ae   : > { %7765 = vmatprep.subr.bf16.mxu0 %v7764_v61  ;;  %v2267_v61 = vld [vmem:[%s9135_s17 + $0x24] sm:$0xff] }
 0x1b0   : > { %6272 = vmatmul.mubr.msk.f32.gmra.mrb[2].mxu0 %vm608_vm0, %v1790_v2  ;;  %v2272_v2 = vld [vmem:[%s9135_s17 + $0x4c] sm:$0xff] }
 0x1b1   : > { %2018 = vmatprep.mubr.f32.mxu0 %v8919_v7  ;;  %7767 = vmatpush1.bf16.msra.mxu0 %v7766_v3  ;;  %v2273_v3 = vld [vmem:[%s9135_s17 + $0x54] sm:$0xff] }
 0x1b2   : > { %7769 = vmatprep.subr.bf16.mxu0 %v7768_v4  ;;  %v2274_v4 = vld [vmem:[%s9135_s17 + $0x5c] sm:$0xff] }
 0x1b4   : > { %6273 = vmatmul.mubr.msk.f32.gmra.mrb[4].mxu0 %vm608_vm0, %v1791_v10  ;;  %v2279_v10 = vld [vmem:[%s9135_s17 + $0x84] sm:$0xff] }
 0x1b5   : > { %2024 = vmatprep.mubr.f32.mxu0 %v8919_v7  ;;  %7771 = vmatpush1.bf16.msra.mxu0 %v7770_v11  ;;  %v2280_v11 = vld [vmem:[%s9135_s17 + $0x8c] sm:$0xff] }
 0x1b6   : > { %7773 = vmatprep.subr.bf16.mxu0 %v7772_v12  ;;  %v2281_v12 = vld [vmem:[%s9135_s17 + $0x94] sm:$0xff] }
 0x1b8   : > { %6274 = vmatmul.mubr.msk.f32.gmra.mrb[6].mxu0 %vm608_vm0, %v1792_v17  ;;  %v2286_v17 = vld [vmem:[%s9135_s17 + $0xbc] sm:$0xff] }
 0x1b9   : > { %2030 = vmatprep.mubr.f32.mxu0 %v8919_v7  ;;  %7775 = vmatpush1.bf16.msra.mxu0 %v7774_v18  ;;  %v2287_v18 = vld [vmem:[%s9135_s17 + $0xc4] sm:$0xff] }
 0x1ba   : > { %7777 = vmatprep.subr.bf16.mxu0 %v7776_v19  ;;  %v2288_v19 = vld [vmem:[%s9135_s17 + $0xcc] sm:$0xff] }
 0x1bc   : > { %6275 = vmatmul.mubr.msk.f32.gmra.mrb[8].mxu0 %vm608_vm0, %v1793_v24  ;;  %v2293_v24 = vld [vmem:[%s9135_s17 + $0xf4] sm:$0xff] }
 0x1bd   : > { %2036 = vmatprep.mubr.f32.mxu0 %v8919_v7  ;;  %7779 = vmatpush1.bf16.msra.mxu0 %v7778_v25  ;;  %v2294_v25 = vld [vmem:[%s9135_s17 + $0xfc] sm:$0xf]  ;;  %s6024_s17 = scalar_lea.sflag [#allocation4], %s486_s23 }
 0x1be   : > { %7781 = vmatprep.subr.bf16.mxu0 %v7780_v26  ;;  %v2739_v26 = vlaneseq }
 0x1c0   : > { %6276 = vmatmul.mubr.msk.f32.gmra.mrb[10].mxu0 %vm608_vm0, %v1794_v29  ;;  %v9898_v27 = vshrl.u32 %v2739_v26, 7  ;;  %v2737_v29 = vld [vmem:[%s11690_s2] sm:$0x3] }
 0x1c1   : > { %2042 = vmatprep.mubr.f32.mxu0 %v8919_v7  ;;  %7783 = vmatpush1.bf16.msra.mxu0 %v7782_v30 }
 0x1c2   : > { %v2741_v28 = vsub.s32 0, %v9898_v27  ;;  %v2745_v30 = vsub.s32 1, %v9898_v27 }
 0x1c4   : > { %6277 = vmatmul.mubr.msk.f32.gmra.mrb[12].mxu0 %vm608_vm0, %v1795_v31  ;;  %v9907_v31 = vrot.slane %v2737_v29, %v2741_v28 }
 0x1c5   : > { %2048 = vmatprep.mubr.f32.mxu0 %v8919_v7 }
 0x1c8   : > { %6278 = vmatmul.mubr.msk.f32.gmra.mrb[14].mxu0 %vm608_vm0, %v1796_v32  ;;  %v9911_v32 = vrot.slane %v2737_v29, %v2745_v30 }
 0x1c9   : > { %2054 = vmatprep.mubr.f32.mxu0 %v8919_v7 }
 0x1cc   : > { %6279 = vmatmul.mubr.msk.f32.gmra.mrb[16].mxu0 %vm608_vm0, %v1797_v33 }
 0x1cd   : > { %2060 = vmatprep.mubr.f32.mxu0 %v8919_v7 }
 0x1d0   : > { %6280 = vmatmul.mubr.msk.f32.gmra.mrb[18].mxu0 %vm608_vm0, %v1798_v34 }
 0x1d1   : > { %2066 = vmatprep.mubr.f32.mxu0 %v8919_v7 }
 0x1d4   : > { %6281 = vmatmul.mubr.msk.f32.gmra.mrb[20].mxu0 %vm608_vm0, %v1799_v35 }
 0x1d5   : > { %2072 = vmatprep.mubr.f32.mxu0 %v8919_v7 }
 0x1d8   : > { %6282 = vmatmul.mubr.msk.f32.gmra.mrb[22].mxu0 %vm608_vm0, %v1800_v36 }
 0x1d9   : > { %2078 = vmatprep.mubr.f32.mxu0 %v8919_v7 }
 0x1dc   : > { %6283 = vmatmul.mubr.msk.f32.gmra.mrb[24].mxu0 %vm608_vm0, %v1801_v37 }
 0x1dd   : > { %2084 = vmatprep.mubr.f32.mxu0 %v8919_v7 }
 0x1e0   : > { %6284 = vmatmul.mubr.msk.f32.gmra.mrb[26].mxu0 %vm608_vm0, %v1802_v38 }
 0x1e1   : > { %2090 = vmatprep.mubr.f32.mxu0 %v8919_v7 }
 0x1e4   : > { %6285 = vmatmul.mubr.msk.f32.gmra.mrb[28].mxu0 %vm608_vm0, %v1803_v39 }
 0x1e5   : > { %2096 = vmatprep.mubr.f32.mxu0 %v8919_v7 }
 0x1e8   : > { %6286 = vmatmul.mubr.msk.f32.gmra.mrb[30].mxu0 %vm608_vm0, %v1804_v40 }
 0x1e9   : > { %2102 = vmatprep.mubr.f32.mxu0 %v8919_v7 }
 0x1ec   : > { %6287 = vmatmul.mubr.msk.f32.gmra.mrb[32].mxu0 %vm608_vm0, %v1805_v41 }
 0x1ed   : > { %2108 = vmatprep.mubr.f32.mxu0 %v8919_v7 }
 0x1f0   : > { %6288 = vmatmul.mubr.msk.f32.gmra.mrb[34].mxu0 %vm608_vm0, %v1806_v42 }
 0x1f1   : > { %2114 = vmatprep.mubr.f32.mxu0 %v8919_v7 }
 0x1f4   : > { %6289 = vmatmul.mubr.msk.f32.gmra.mrb[36].mxu0 %vm608_vm0, %v1807_v43 }
 0x1f5   : > { %2120 = vmatprep.mubr.f32.mxu0 %v8919_v7 }
 0x1f8   : > { %6290 = vmatmul.mubr.msk.f32.gmra.mrb[38].mxu0 %vm608_vm0, %v1808_v44 }
 0x1f9   : > { %2126 = vmatprep.mubr.f32.mxu0 %v8919_v7 }
 0x1fc   : > { %6291 = vmatmul.mubr.msk.f32.gmra.mrb[40].mxu0 %vm608_vm0, %v1809_v45 }
 0x1fd   : > { %2132 = vmatprep.mubr.f32.mxu0 %v8919_v7 }
 0x200   : > { %6292 = vmatmul.mubr.msk.f32.gmra.mrb[42].mxu0 %vm608_vm0, %v1810_v46 }
 0x201   : > { %2138 = vmatprep.mubr.f32.mxu0 %v8919_v7 }
 0x204   : > { %6293 = vmatmul.mubr.msk.f32.gmra.mrb[44].mxu0 %vm608_vm0, %v1811_v47  ;;  %v2910_v47 = vld [vmem:[%s11691_s3 + $0x8] sm:$0xff] }
 0x205   : > { %2144 = vmatprep.mubr.f32.mxu0 %v8919_v7  ;;  %6360 = vmatprep.mubr.msk.f32.mxu1 %vm2941_vm1, %v2910_v47 }
 0x208   : > { %6294 = vmatmul.mubr.msk.f32.gmra.mrb[46].mxu0 %vm608_vm0, %v1812_v48 }
 0x209   : > { %2150 = vmatprep.mubr.f32.mxu0 %v8919_v7 }
 0x20c   : > { %6295 = vmatmul.mubr.msk.f32.gmra.mrb[48].mxu0 %vm608_vm0, %v1813_v49 }
 0x20d   : > { %2156 = vmatprep.mubr.f32.mxu0 %v8919_v7 }
 0x210   : > { %6296 = vmatmul.mubr.msk.f32.gmra.mrb[50].mxu0 %vm608_vm0, %v1814_v50 }
 0x211   : > { %2162 = vmatprep.mubr.f32.mxu0 %v8919_v7 }
 0x214   : > { %6297 = vmatmul.mubr.msk.f32.gmra.mrb[52].mxu0 %vm608_vm0, %v1815_v51 }
 0x215   : > { %2168 = vmatprep.mubr.f32.mxu0 %v8919_v7 }
 0x218   : > { %6298 = vmatmul.mubr.msk.f32.gmra.mrb[54].mxu0 %vm608_vm0, %v1816_v52 }
 0x219   : > { %2174 = vmatprep.mubr.f32.mxu0 %v8919_v7 }
 0x21c   : > { %6299 = vmatmul.mubr.msk.f32.gmra.mrb[56].mxu0 %vm608_vm0, %v1817_v53 }
 0x21d   : > { %2180 = vmatprep.mubr.f32.mxu0 %v8919_v7 }
 0x220   : > { %6300 = vmatmul.mubr.msk.f32.gmra.mrb[58].mxu0 %vm608_vm0, %v1818_v54 }
 0x221   : > { %2186 = vmatprep.mubr.f32.mxu0 %v8919_v7 }
 0x224   : > { %6301 = vmatmul.mubr.msk.f32.gmra.mrb[60].mxu0 %vm608_vm0, %v1819_v55 }
 0x225   : > { %2192 = vmatprep.mubr.f32.mxu0 %v8919_v7 }
 0x228   : > { %6302 = vmatmul.mubr.msk.f32.gmra.mrb[62].mxu0 %vm608_vm0, %v1820_v56 }
 0x229   : > { %2480 = vmatprep.mubr.f32.mxu0 %v8919_v7 }
 0x22c   : > { %6327 = vmatmul.mubr.msk.f32.vlgmr.msra.gmra.mrb[0].mxu0 %vm608_vm0, %v2263_v57 }
 0x22d   : > { %2486 = vmatprep.mubr.f32.mxu0 %v8919_v7 }
 0x230   : > { %6328 = vmatmul.mubr.msk.f32.gmra.mrb[2].mxu0 %vm608_vm0, %v2264_v58 }
 0x231   : > { %2492 = vmatprep.mubr.f32.mxu0 %v8919_v7 }
 0x234   : > { %6329 = vmatmul.mubr.msk.f32.gmra.mrb[4].mxu0 %vm608_vm0, %v2265_v59 }
 0x235   : > { %2498 = vmatprep.mubr.f32.mxu0 %v8919_v7 }
 0x238   : > { %6330 = vmatmul.mubr.msk.f32.gmra.mrb[6].mxu0 %vm608_vm0, %v2266_v60 }
 0x239   : > { %2504 = vmatprep.mubr.f32.mxu0 %v8919_v7 }
 0x23c   : > { %6331 = vmatmul.mubr.msk.f32.gmra.mrb[8].mxu0 %vm608_vm0, %v2267_v61 }
 0x23d   : > { %2510 = vmatprep.mubr.f32.mxu0 %v8919_v7 }
 0x240   : > { %6332 = vmatmul.mubr.msk.f32.gmra.mrb[10].mxu0 %vm608_vm0, %v2268_v62 }
 0x241   : > { %2516 = vmatprep.mubr.f32.mxu0 %v8919_v7 }
 0x244   : > { %6333 = vmatmul.mubr.msk.f32.gmra.mrb[12].mxu0 %vm608_vm0, %v2269_v63 }
 0x245   : > { %2522 = vmatprep.mubr.f32.mxu0 %v8919_v7 }
 0x248   : > { %6334 = vmatmul.mubr.msk.f32.gmra.mrb[14].mxu0 %vm608_vm0, %v2270_v0 }
 0x249   : > { %2528 = vmatprep.mubr.f32.mxu0 %v8919_v7 }
 0x24c   : > { %6335 = vmatmul.mubr.msk.f32.gmra.mrb[16].mxu0 %vm608_vm0, %v2271_v1 }
 0x24d   : > { %2534 = vmatprep.mubr.f32.mxu0 %v8919_v7 }
 0x250   : > { %6336 = vmatmul.mubr.msk.f32.gmra.mrb[18].mxu0 %vm608_vm0, %v2272_v2 }
 0x251   : > { %2540 = vmatprep.mubr.f32.mxu0 %v8919_v7 }
 0x254   : > { %6337 = vmatmul.mubr.msk.f32.gmra.mrb[20].mxu0 %vm608_vm0, %v2273_v3 }
 0x255   : > { %2546 = vmatprep.mubr.f32.mxu0 %v8919_v7 }
 0x258   : > { %6338 = vmatmul.mubr.msk.f32.gmra.mrb[22].mxu0 %vm608_vm0, %v2274_v4 }
 0x259   : > { %2552 = vmatprep.mubr.f32.mxu0 %v8919_v7 }
 0x25c   : > { %6339 = vmatmul.mubr.msk.f32.gmra.mrb[24].mxu0 %vm608_vm0, %v2275_v5 }
 0x25d   : > { %2558 = vmatprep.mubr.f32.mxu0 %v8919_v7 }
 0x260   : > { %6340 = vmatmul.mubr.msk.f32.gmra.mrb[26].mxu0 %vm608_vm0, %v2276_v6 }
 0x261   : > { %2564 = vmatprep.mubr.f32.mxu0 %v8919_v7 }
 0x264   : > { %6341 = vmatmul.mubr.msk.f32.gmra.mrb[28].mxu0 %vm608_vm0, %v2277_v8 }
 0x265   : > { %2570 = vmatprep.mubr.f32.mxu0 %v8919_v7 }
 0x268   : > { %6342 = vmatmul.mubr.msk.f32.gmra.mrb[30].mxu0 %vm608_vm0, %v2278_v9 }
 0x269   : > { %2576 = vmatprep.mubr.f32.mxu0 %v8919_v7 }
 0x26c   : > { %6343 = vmatmul.mubr.msk.f32.gmra.mrb[32].mxu0 %vm608_vm0, %v2279_v10 }
 0x26d   : > { %2582 = vmatprep.mubr.f32.mxu0 %v8919_v7 }
 0x270   : > { %6344 = vmatmul.mubr.msk.f32.gmra.mrb[34].mxu0 %vm608_vm0, %v2280_v11 }
 0x271   : > { %2588 = vmatprep.mubr.f32.mxu0 %v8919_v7 }
 0x274   : > { %6345 = vmatmul.mubr.msk.f32.gmra.mrb[36].mxu0 %vm608_vm0, %v2281_v12 }
 0x275   : > { %2594 = vmatprep.mubr.f32.mxu0 %v8919_v7 }
 0x278   : > { %6346 = vmatmul.mubr.msk.f32.gmra.mrb[38].mxu0 %vm608_vm0, %v2282_v13 }
 0x279   : > { %2600 = vmatprep.mubr.f32.mxu0 %v8919_v7 }
 0x27c   : > { %6347 = vmatmul.mubr.msk.f32.gmra.mrb[40].mxu0 %vm608_vm0, %v2283_v14 }
 0x27d   : > { %2606 = vmatprep.mubr.f32.mxu0 %v8919_v7 }
 0x280   : > { %6348 = vmatmul.mubr.msk.f32.gmra.mrb[42].mxu0 %vm608_vm0, %v2284_v15 }
 0x281   : > { %2612 = vmatprep.mubr.f32.mxu0 %v8919_v7 }
 0x284   : > { %6349 = vmatmul.mubr.msk.f32.gmra.mrb[44].mxu0 %vm608_vm0, %v2285_v16 }
 0x285   : > { %2618 = vmatprep.mubr.f32.mxu0 %v8919_v7 }
 0x288   : > { %6350 = vmatmul.mubr.msk.f32.gmra.mrb[46].mxu0 %vm608_vm0, %v2286_v17 }
 0x289   : > { %2624 = vmatprep.mubr.f32.mxu0 %v8919_v7 }
 0x28c   : > { %6351 = vmatmul.mubr.msk.f32.gmra.mrb[48].mxu0 %vm608_vm0, %v2287_v18 }
 0x28d   : > { %2630 = vmatprep.mubr.f32.mxu0 %v8919_v7 }
 0x290   : > { %6352 = vmatmul.mubr.msk.f32.gmra.mrb[50].mxu0 %vm608_vm0, %v2288_v19 }
 0x291   : > { %2636 = vmatprep.mubr.f32.mxu0 %v8919_v7 }
 0x294   : > { %6353 = vmatmul.mubr.msk.f32.gmra.mrb[52].mxu0 %vm608_vm0, %v2289_v20 }
 0x295   : > { %2642 = vmatprep.mubr.f32.mxu0 %v8919_v7 }
 0x298   : > { %6354 = vmatmul.mubr.msk.f32.gmra.mrb[54].mxu0 %vm608_vm0, %v2290_v21 }
 0x299   : > { %2648 = vmatprep.mubr.f32.mxu0 %v8919_v7 }
 0x29c   : > { %6355 = vmatmul.mubr.msk.f32.gmra.mrb[56].mxu0 %vm608_vm0, %v2291_v22 }
 0x29d   : > { %2654 = vmatprep.mubr.f32.mxu0 %v8919_v7 }
 0x2a0   : > { %6356 = vmatmul.mubr.msk.f32.gmra.mrb[58].mxu0 %vm608_vm0, %v2292_v23 }
 0x2a1   : > { %2660 = vmatprep.mubr.f32.mxu0 %v8919_v7 }
 0x2a4   : > { %6357 = vmatmul.mubr.msk.f32.gmra.mrb[60].mxu0 %vm608_vm0, %v2293_v24 }
 0x2a5   : > { %2666 = vmatprep.mubr.f32.mxu0 %v8919_v7 }
 0x2a8   : > { %6358 = vmatmul.mubr.msk.f32.gmra.mrb[62].mxu0 %vm608_vm0, %v2294_v25 }
 0x2a9   : > { %7311 = vmatprep.mubr.msk.f32.mxu0 %vm8922_vm5, %v8919_v7 }
 0x2ff   : > { %v2482_v33 = vpop.f32.mrb[0].mxu0 }
 0x300   : > { %v2749_v34 = vadd.f32 %v9907_v31, %v2482_v33  ;;  %v2484_v35 = vpop.f32.mrb[1].mxu0 }
 0x301   : > { %v2750_v36 = vadd.f32 %v9911_v32, %v2484_v35 }
 0x302   : > { %v2813_v37 = vmax.f32 %v2749_v34, 0.0 }
 0x303   : > { %v2814_v38 = vmax.f32 %v2750_v36, 0.0  ;;  %v2488_v39 = vpop.f32.mrb[2].mxu0 }
 0x304   : > { %v2751_v40 = vadd.f32 %v9907_v31, %v2488_v39  ;;  %v2490_v41 = vpop.f32.mrb[3].mxu0 }
 0x305   : > { %v2877_v42 = vmax.f32 %v2813_v37, %v2814_v38  ;;  %v2752_v43 = vadd.f32 %v9911_v32, %v2490_v41 }
 0x306   : > { %v2815_v44 = vmax.f32 %v2751_v40, 0.0 }
 0x307   : > { %v2816_v45 = vmax.f32 %v2752_v43, 0.0  ;;  %v2494_v46 = vpop.f32.mrb[4].mxu0 }
 0x308   : > { %v2753_v48 = vadd.f32 %v9907_v31, %v2494_v46  ;;  %v2496_v49 = vpop.f32.mrb[5].mxu0 }
 0x309   : > { %v2878_v50 = vmax.f32 %v2815_v44, %v2816_v45  ;;  %v2754_v51 = vadd.f32 %v9911_v32, %v2496_v49 }
 0x30a   : > { %v2817_v52 = vmax.f32 %v2753_v48, 0.0 }
 0x30b   : > { %v2818_v53 = vmax.f32 %v2754_v51, 0.0  ;;  %v2500_v54 = vpop.f32.mrb[6].mxu0  ;;  %v9923_v55 = vpack.c.bf16 %v2878_v50, %v2877_v42 }
 0x30c   : > { %v2755_v56 = vadd.f32 %v9907_v31, %v2500_v54  ;;  %v2502_v57 = vpop.f32.mrb[7].mxu0 }
 0x30d   : > { %v2879_v58 = vmax.f32 %v2817_v52, %v2818_v53  ;;  %v2756_v59 = vadd.f32 %v9911_v32, %v2502_v57 }
 0x30e   : > { %v2819_v60 = vmax.f32 %v2755_v56, 0.0 }
 0x30f   : > { %v2820_v61 = vmax.f32 %v2756_v59, 0.0  ;;  %v2506_v62 = vpop.f32.mrb[8].mxu0 }
 0x310   : > { %v2757_v63 = vadd.f32 %v9907_v31, %v2506_v62  ;;  %v2508_v0 = vpop.f32.mrb[9].mxu0 }
 0x311   : > { %v2880_v1 = vmax.f32 %v2819_v60, %v2820_v61  ;;  %v2758_v2 = vadd.f32 %v9911_v32, %v2508_v0 }
 0x312   : > { %v2821_v3 = vmax.f32 %v2757_v63, 0.0 }
 0x313   : > { %v2822_v4 = vmax.f32 %v2758_v2, 0.0  ;;  %v2512_v5 = vpop.f32.mrb[10].mxu0  ;;  %v9929_v6 = vpack.c.bf16 %v2880_v1, %v2879_v58 }
 0x314   : > { %v2759_v8 = vadd.f32 %v9907_v31, %v2512_v5  ;;  %v2514_v9 = vpop.f32.mrb[11].mxu0 }
 0x315   : > { %v2881_v10 = vmax.f32 %v2821_v3, %v2822_v4  ;;  %v2760_v11 = vadd.f32 %v9911_v32, %v2514_v9 }
 0x316   : > { %v2823_v12 = vmax.f32 %v2759_v8, 0.0 }
 0x317   : > { %v2824_v13 = vmax.f32 %v2760_v11, 0.0  ;;  %v2518_v14 = vpop.f32.mrb[12].mxu0 }
 0x318   : > { %v2761_v15 = vadd.f32 %v9907_v31, %v2518_v14  ;;  %v2520_v16 = vpop.f32.mrb[13].mxu0 }
 0x319   : > { %v2882_v17 = vmax.f32 %v2823_v12, %v2824_v13  ;;  %v2762_v18 = vadd.f32 %v9911_v32, %v2520_v16 }
 0x31a   : > { %v2825_v19 = vmax.f32 %v2761_v15, 0.0 }
 0x31b   : > { %v2826_v20 = vmax.f32 %v2762_v18, 0.0  ;;  %v2524_v21 = vpop.f32.mrb[14].mxu0  ;;  %v9935_v22 = vpack.c.bf16 %v2882_v17, %v2881_v10 }
 0x31c   : > { %v2763_v23 = vadd.f32 %v9907_v31, %v2524_v21  ;;  %v2526_v24 = vpop.f32.mrb[15].mxu0 }
 0x31d   : > { %v2883_v25 = vmax.f32 %v2825_v19, %v2826_v20  ;;  %v2764_v26 = vadd.f32 %v9911_v32, %v2526_v24 }
 0x31e   : > { %v2827_v29 = vmax.f32 %v2763_v23, 0.0 }
 0x31f   : > { %v2828_v33 = vmax.f32 %v2764_v26, 0.0  ;;  %v2530_v34 = vpop.f32.mrb[16].mxu0 }
 0x320   : > { %v2765_v35 = vadd.f32 %v9907_v31, %v2530_v34  ;;  %v2532_v36 = vpop.f32.mrb[17].mxu0 }
 0x321   : > { %v2884_v37 = vmax.f32 %v2827_v29, %v2828_v33  ;;  %v2766_v38 = vadd.f32 %v9911_v32, %v2532_v36 }
 0x322   : > { %v2829_v39 = vmax.f32 %v2765_v35, 0.0 }
 0x323   : > { %v2830_v40 = vmax.f32 %v2766_v38, 0.0  ;;  %v2536_v41 = vpop.f32.mrb[18].mxu0  ;;  %v9941_v42 = vpack.c.bf16 %v2884_v37, %v2883_v25 }
 0x324   : > { %v2767_v43 = vadd.f32 %v9907_v31, %v2536_v41  ;;  %v2538_v44 = vpop.f32.mrb[19].mxu0 }
 0x325   : > { %v2885_v45 = vmax.f32 %v2829_v39, %v2830_v40  ;;  %v2768_v46 = vadd.f32 %v9911_v32, %v2538_v44 }
 0x326   : > { %v2831_v47 = vmax.f32 %v2767_v43, 0.0 }
 0x327   : > { %v2832_v48 = vmax.f32 %v2768_v46, 0.0  ;;  %v2542_v49 = vpop.f32.mrb[20].mxu0 }
 0x328   : > { %v2769_v50 = vadd.f32 %v9907_v31, %v2542_v49  ;;  %v2544_v51 = vpop.f32.mrb[21].mxu0 }
 0x329   : > { %v2886_v52 = vmax.f32 %v2831_v47, %v2832_v48  ;;  %v2770_v53 = vadd.f32 %v9911_v32, %v2544_v51 }
 0x32a   : > { %v2833_v54 = vmax.f32 %v2769_v50, 0.0 }
 0x32b   : > { %v2834_v56 = vmax.f32 %v2770_v53, 0.0  ;;  %v2548_v57 = vpop.f32.mrb[22].mxu0  ;;  %v9947_v58 = vpack.c.bf16 %v2886_v52, %v2885_v45 }
 0x32c   : > { %v2771_v59 = vadd.f32 %v9907_v31, %v2548_v57  ;;  %v2550_v60 = vpop.f32.mrb[23].mxu0 }
 0x32d   : > { %v2887_v61 = vmax.f32 %v2833_v54, %v2834_v56  ;;  %v2772_v62 = vadd.f32 %v9911_v32, %v2550_v60 }
 0x32e   : > { %v2835_v63 = vmax.f32 %v2771_v59, 0.0 }
 0x32f   : > { %v2836_v0 = vmax.f32 %v2772_v62, 0.0  ;;  %v2554_v1 = vpop.f32.mrb[24].mxu0 }
 0x330   : > { %v2773_v2 = vadd.f32 %v9907_v31, %v2554_v1  ;;  %v2556_v3 = vpop.f32.mrb[25].mxu0 }
 0x331   : > { %v2888_v4 = vmax.f32 %v2835_v63, %v2836_v0  ;;  %v2774_v5 = vadd.f32 %v9911_v32, %v2556_v3 }
 0x332   : > { %v2837_v8 = vmax.f32 %v2773_v2, 0.0 }
 0x333   : > { %v2838_v9 = vmax.f32 %v2774_v5, 0.0  ;;  %v2560_v10 = vpop.f32.mrb[26].mxu0  ;;  %v9953_v11 = vpack.c.bf16 %v2888_v4, %v2887_v61 }
 0x334   : > { %v2775_v12 = vadd.f32 %v9907_v31, %v2560_v10  ;;  %v2562_v13 = vpop.f32.mrb[27].mxu0 }
 0x335   : > { %v2889_v14 = vmax.f32 %v2837_v8, %v2838_v9  ;;  %v2776_v15 = vadd.f32 %v9911_v32, %v2562_v13 }
 0x336   : > { %v2839_v16 = vmax.f32 %v2775_v12, 0.0 }
 0x337   : > { %v2840_v17 = vmax.f32 %v2776_v15, 0.0  ;;  %v2566_v18 = vpop.f32.mrb[28].mxu0 }
 0x338   : > { %v2777_v19 = vadd.f32 %v9907_v31, %v2566_v18  ;;  %v2568_v20 = vpop.f32.mrb[29].mxu0 }
 0x339   : > { %v2890_v21 = vmax.f32 %v2839_v16, %v2840_v17  ;;  %v2778_v23 = vadd.f32 %v9911_v32, %v2568_v20 }
 0x33a   : > { %v2841_v24 = vmax.f32 %v2777_v19, 0.0 }
 0x33b   : > { %v2842_v25 = vmax.f32 %v2778_v23, 0.0  ;;  %v2572_v26 = vpop.f32.mrb[30].mxu0  ;;  %v9959_v29 = vpack.c.bf16 %v2890_v21, %v2889_v14 }
 0x33c   : > { %v2779_v33 = vadd.f32 %v9907_v31, %v2572_v26  ;;  %v2574_v34 = vpop.f32.mrb[31].mxu0 }
 0x33d   : > { %v2891_v35 = vmax.f32 %v2841_v24, %v2842_v25  ;;  %v2780_v36 = vadd.f32 %v9911_v32, %v2574_v34 }
 0x33e   : > { %v2843_v37 = vmax.f32 %v2779_v33, 0.0 }
 0x33f   : > { %v2844_v38 = vmax.f32 %v2780_v36, 0.0  ;;  %v2578_v39 = vpop.f32.mrb[32].mxu0 }
 0x340   : > { %v2781_v40 = vadd.f32 %v9907_v31, %v2578_v39  ;;  %v2580_v41 = vpop.f32.mrb[33].mxu0 }
 0x341   : > { %v2892_v43 = vmax.f32 %v2843_v37, %v2844_v38  ;;  %v2782_v44 = vadd.f32 %v9911_v32, %v2580_v41 }
 0x342   : > { %v2845_v45 = vmax.f32 %v2781_v40, 0.0 }
 0x343   : > { %v2846_v46 = vmax.f32 %v2782_v44, 0.0  ;;  %v2584_v47 = vpop.f32.mrb[34].mxu0  ;;  %v9965_v48 = vpack.c.bf16 %v2892_v43, %v2891_v35 }
 0x344   : > { %v2783_v49 = vadd.f32 %v9907_v31, %v2584_v47  ;;  %v2586_v50 = vpop.f32.mrb[35].mxu0 }
 0x345   : > { %v2893_v51 = vmax.f32 %v2845_v45, %v2846_v46  ;;  %v2784_v52 = vadd.f32 %v9911_v32, %v2586_v50 }
 0x346   : > { %v2847_v53 = vmax.f32 %v2783_v49, 0.0 }
 0x347   : > { %v2848_v54 = vmax.f32 %v2784_v52, 0.0  ;;  %v2590_v56 = vpop.f32.mrb[36].mxu0 }
 0x348   : > { %v2785_v57 = vadd.f32 %v9907_v31, %v2590_v56  ;;  %v2592_v59 = vpop.f32.mrb[37].mxu0 }
 0x349   : > { %v2894_v60 = vmax.f32 %v2847_v53, %v2848_v54  ;;  %v2786_v61 = vadd.f32 %v9911_v32, %v2592_v59 }
 0x34a   : > { %v2849_v62 = vmax.f32 %v2785_v57, 0.0 }
 0x34b   : > { %v2850_v63 = vmax.f32 %v2786_v61, 0.0  ;;  %v2596_v0 = vpop.f32.mrb[38].mxu0  ;;  %v9971_v1 = vpack.c.bf16 %v2894_v60, %v2893_v51 }
 0x34c   : > { %v2787_v2 = vadd.f32 %v9907_v31, %v2596_v0  ;;  %v2598_v3 = vpop.f32.mrb[39].mxu0 }
 0x34d   : > { %v2895_v4 = vmax.f32 %v2849_v62, %v2850_v63  ;;  %v2788_v5 = vadd.f32 %v9911_v32, %v2598_v3  ;;  %7785 = vmatprep.subr.bf16.mxu1 %v9971_v1 }
 0x34e   : > { %v2851_v8 = vmax.f32 %v2787_v2, 0.0  ;;  %7787 = vmatpush3.bf16.msra.mxu1 %v9923_v55 }
 0x34f   : > { %v2852_v9 = vmax.f32 %v2788_v5, 0.0  ;;  %v2602_v10 = vpop.f32.mrb[40].mxu0 }
 0x350   : > { %v2789_v12 = vadd.f32 %v9907_v31, %v2602_v10  ;;  %v2604_v13 = vpop.f32.mrb[41].mxu0 }
 0x351   : > { %v2896_v14 = vmax.f32 %v2851_v8, %v2852_v9  ;;  %v2790_v15 = vadd.f32 %v9911_v32, %v2604_v13 }
 0x352   : > { %v2853_v16 = vmax.f32 %v2789_v12, 0.0 }
 0x353   : > { %v2854_v17 = vmax.f32 %v2790_v15, 0.0  ;;  %v2608_v18 = vpop.f32.mrb[42].mxu0  ;;  %v9979_v19 = vpack.c.bf16 %v2896_v14, %v2895_v4 }
 0x354   : > { %v2791_v20 = vadd.f32 %v9907_v31, %v2608_v18  ;;  %v2610_v21 = vpop.f32.mrb[43].mxu0 }
 0x355   : > { %v2897_v23 = vmax.f32 %v2853_v16, %v2854_v17  ;;  %v2792_v24 = vadd.f32 %v9911_v32, %v2610_v21  ;;  %7789 = vmatprep.subr.bf16.mxu1 %v9979_v19 }
 0x356   : > { %v2855_v25 = vmax.f32 %v2791_v20, 0.0  ;;  %7791 = vmatpush3.bf16.msra.mxu1 %v9929_v6 }
 0x357   : > { %v2856_v26 = vmax.f32 %v2792_v24, 0.0  ;;  %v2614_v33 = vpop.f32.mrb[44].mxu0 }
 0x358   : > { %v2793_v34 = vadd.f32 %v9907_v31, %v2614_v33  ;;  %v2616_v35 = vpop.f32.mrb[45].mxu0 }
 0x359   : > { %v2898_v36 = vmax.f32 %v2855_v25, %v2856_v26  ;;  %v2794_v37 = vadd.f32 %v9911_v32, %v2616_v35 }
 0x35a   : > { %v2857_v38 = vmax.f32 %v2793_v34, 0.0 }
 0x35b   : > { %v2858_v39 = vmax.f32 %v2794_v37, 0.0  ;;  %v2620_v40 = vpop.f32.mrb[46].mxu0  ;;  %v9987_v41 = vpack.c.bf16 %v2898_v36, %v2897_v23 }
 0x35c   : > { %v2795_v43 = vadd.f32 %v9907_v31, %v2620_v40  ;;  %v2622_v44 = vpop.f32.mrb[47].mxu0 }
 0x35d   : > { %v2899_v45 = vmax.f32 %v2857_v38, %v2858_v39  ;;  %v2796_v46 = vadd.f32 %v9911_v32, %v2622_v44  ;;  %7793 = vmatprep.subr.bf16.mxu1 %v9987_v41 }
 0x35e   : > { %v2859_v47 = vmax.f32 %v2795_v43, 0.0  ;;  %7795 = vmatpush3.bf16.msra.mxu1 %v9935_v22 }
 0x35f   : > { %v2860_v49 = vmax.f32 %v2796_v46, 0.0  ;;  %v2626_v50 = vpop.f32.mrb[48].mxu0 }
 0x360   : > { %v2797_v51 = vadd.f32 %v9907_v31, %v2626_v50  ;;  %v2628_v52 = vpop.f32.mrb[49].mxu0 }
 0x361   : > { %v2900_v53 = vmax.f32 %v2859_v47, %v2860_v49  ;;  %v2798_v54 = vadd.f32 %v9911_v32, %v2628_v52 }
 0x362   : > { %v2861_v56 = vmax.f32 %v2797_v51, 0.0 }
 0x363   : > { %v2862_v57 = vmax.f32 %v2798_v54, 0.0  ;;  %v2632_v59 = vpop.f32.mrb[50].mxu0  ;;  %v9995_v60 = vpack.c.bf16 %v2900_v53, %v2899_v45 }
 0x364   : > { %v2799_v61 = vadd.f32 %v9907_v31, %v2632_v59  ;;  %v2634_v62 = vpop.f32.mrb[51].mxu0 }
 0x365   : > { %v2901_v63 = vmax.f32 %v2861_v56, %v2862_v57  ;;  %v2800_v0 = vadd.f32 %v9911_v32, %v2634_v62  ;;  %7797 = vmatprep.subr.bf16.mxu1 %v9995_v60 }
 0x366   : > { %v2863_v2 = vmax.f32 %v2799_v61, 0.0  ;;  %7799 = vmatpush3.bf16.msra.mxu1 %v9941_v42 }
 0x367   : > { %v2864_v3 = vmax.f32 %v2800_v0, 0.0  ;;  %v2638_v4 = vpop.f32.mrb[52].mxu0 }
 0x368   : > { %v2801_v5 = vadd.f32 %v9907_v31, %v2638_v4  ;;  %v2640_v8 = vpop.f32.mrb[53].mxu0  ;;  %v6598_v4 = vld [vmem:[%s11697_s9 + $0x208] sm:$0xff] }
 0x369   : > { %v2902_v9 = vmax.f32 %v2863_v2, %v2864_v3  ;;  %v2802_v10 = vadd.f32 %v9911_v32, %v2640_v8  ;;  %v2911_v8 = vld [vmem:[%s11691_s3 + $0x10] sm:$0xff] }
 0x36a   : > { %v2865_v12 = vmax.f32 %v2801_v5, 0.0 }
 0x36b   : > { %v2866_v13 = vmax.f32 %v2802_v10, 0.0  ;;  %v2644_v14 = vpop.f32.mrb[54].mxu0  ;;  %v10003_v15 = vpack.c.bf16 %v2902_v9, %v2901_v63  ;;  %v2914_v9 = vld [vmem:[%s11691_s3 + $0x28] sm:$0xff]  ;;  %v2924_v10 = vld [vmem:[%s11691_s3 + $0x78] sm:$0xff] }
 0x36c   : > { %v2803_v16 = vadd.f32 %v9907_v31, %v2644_v14  ;;  %v2646_v17 = vpop.f32.mrb[55].mxu0  ;;  %v2927_v14 = vld [vmem:[%s11691_s3 + $0x90] sm:$0xff] }
 0x36d   : > { %v2903_v18 = vmax.f32 %v2865_v12, %v2866_v13  ;;  %v2804_v20 = vadd.f32 %v9911_v32, %v2646_v17  ;;  %7801 = vmatprep.subr.bf16.mxu1 %v10003_v15  ;;  %v2926_v12 = vld [vmem:[%s11691_s3 + $0x88] sm:$0xff]  ;;  %v2928_v13 = vld [vmem:[%s11691_s3 + $0x98] sm:$0xff]  ;;  %v2931_v17 = vld [vmem:[%s11691_s3 + $0xb0] sm:$0xff] }
 0x36e   : > { %v2867_v21 = vmax.f32 %v2803_v16, 0.0  ;;  %7803 = vmatpush3.bf16.msra.mxu1 %v9947_v58  ;;  %v2932_v16 = vld [vmem:[%s11691_s3 + $0xb8] sm:$0xff] }
 0x36f   : > { %v2868_v23 = vmax.f32 %v2804_v20, 0.0  ;;  %v2650_v24 = vpop.f32.mrb[56].mxu0  ;;  %v2933_v20 = vld [vmem:[%s11691_s3 + $0xc0] sm:$0xff] }
 0x370   : > { %v2805_v25 = vadd.f32 %v9907_v31, %v2650_v24  ;;  %v2652_v26 = vpop.f32.mrb[57].mxu0  ;;  %v2938_v24 = vld [vmem:[%s11691_s3 + $0xe8] sm:$0xff] }
 0x371   : > { %v2904_v33 = vmax.f32 %v2867_v21, %v2868_v23  ;;  %v2806_v34 = vadd.f32 %v9911_v32, %v2652_v26  ;;  %v2936_v21 = vld [vmem:[%s11691_s3 + $0xd8] sm:$0xff]  ;;  %v2935_v23 = vld [vmem:[%s11691_s3 + $0xd0] sm:$0xff] }
 0x372   : > { %v2869_v35 = vmax.f32 %v2805_v25, 0.0  ;;  %v2937_v25 = vld [vmem:[%s11691_s3 + $0xe0] sm:$0xff]  ;;  %v2940_v26 = vld [vmem:[%s11691_s3 + $0xf8] sm:$0xff] }
 0x373   : > { %v2870_v36 = vmax.f32 %v2806_v34, 0.0  ;;  %v2656_v37 = vpop.f32.mrb[58].mxu0  ;;  %v10011_v38 = vpack.c.bf16 %v2904_v33, %v2903_v18  ;;  %v2934_v18 = vld [vmem:[%s11691_s3 + $0xc8] sm:$0xff]  ;;  %v2939_v33 = vld [vmem:[%s11691_s3 + $0xf0] sm:$0xff] }
 0x374   : > { %v2807_v39 = vadd.f32 %v9907_v31, %v2656_v37  ;;  %v2658_v40 = vpop.f32.mrb[59].mxu0  ;;  %v3140_v34 = vld [vmem:[%s11692_s4 + $0x8] sm:$0xff]  ;;  %v3141_v37 = vld [vmem:[%s11692_s4 + $0x10] sm:$0xff] }
 0x375   : > { %v2905_v43 = vmax.f32 %v2869_v35, %v2870_v36  ;;  %v2808_v44 = vadd.f32 %v9911_v32, %v2658_v40  ;;  %7805 = vmatprep.subr.bf16.mxu1 %v10011_v38  ;;  %v3139_v35 = vld [vmem:[%s11692_s4] sm:$0xff]  ;;  %v3142_v36 = vld [vmem:[%s11692_s4 + $0x18] sm:$0xff] }
 0x376   : > { %v2871_v45 = vmax.f32 %v2807_v39, 0.0  ;;  %7807 = vmatpush3.bf16.msra.mxu1 %v9953_v11  ;;  %v3143_v39 = vld [vmem:[%s11692_s4 + $0x20] sm:$0xff]  ;;  %v3146_v40 = vld [vmem:[%s11692_s4 + $0x38] sm:$0xff] }
 0x377   : > { %v2872_v46 = vmax.f32 %v2808_v44, 0.0  ;;  %v2662_v47 = vpop.f32.mrb[60].mxu0  ;;  %v3148_v44 = vld [vmem:[%s11692_s4 + $0x48] sm:$0xff] }
 0x378   : > { %v2809_v49 = vadd.f32 %v9907_v31, %v2662_v47  ;;  %v2664_v50 = vpop.f32.mrb[61].mxu0  ;;  %v3149_v47 = vld [vmem:[%s11692_s4 + $0x50] sm:$0xff] }
 0x379   : > { %v2906_v51 = vmax.f32 %v2871_v45, %v2872_v46  ;;  %v2810_v52 = vadd.f32 %v9911_v32, %v2664_v50  ;;  %v3147_v45 = vld [vmem:[%s11692_s4 + $0x40] sm:$0xff]  ;;  %v3150_v46 = vld [vmem:[%s11692_s4 + $0x58] sm:$0xff] }
 0x37a   : > { %v2873_v53 = vmax.f32 %v2809_v49, 0.0  ;;  %v3152_v49 = vld [vmem:[%s11692_s4 + $0x68] sm:$0xff]  ;;  %v3151_v50 = vld [vmem:[%s11692_s4 + $0x60] sm:$0xff] }
 0x37b   : > { %v2874_v54 = vmax.f32 %v2810_v52, 0.0  ;;  %v2668_v56 = vpop.f32.mrb[62].mxu0  ;;  %v7808_v57 = vpack.c.bf16 %v2906_v51, %v2905_v43  ;;  %v3145_v43 = vld [vmem:[%s11692_s4 + $0x30] sm:$0xff]  ;;  %v3154_v51 = vld [vmem:[%s11692_s4 + $0x78] sm:$0xff] }
 0x37c   : > { %v2811_v59 = vadd.f32 %v9907_v31, %v2668_v56  ;;  %v2670_v61 = vpop.f32.mrb[63].mxu0  ;;  %v2909_v31 = vld [vmem:[%s11691_s3] sm:$0xff]  ;;  %v3153_v52 = vld [vmem:[%s11692_s4 + $0x70] sm:$0xff]  ;;  %v3158_v56 = vld [vmem:[%s11692_s4 + $0x98] sm:$0xff] }
 0x37d   : > { %v2907_v62 = vmax.f32 %v2873_v53, %v2874_v54  ;;  %v2812_v63 = vadd.f32 %v9911_v32, %v2670_v61  ;;  %7809 = vmatprep.subr.bf16.mxu1 %v7808_v57  ;;  %v2912_v32 = vld [vmem:[%s11691_s3 + $0x18] sm:$0xff]  ;;  %v3156_v53 = vld [vmem:[%s11692_s4 + $0x88] sm:$0xff]  ;;  %v3155_v54 = vld [vmem:[%s11692_s4 + $0x80] sm:$0xff] }
 0x37e   : > { %v2875_v0 = vmax.f32 %v2811_v59, 0.0  ;;  %7811 = vmatpush3.bf16.msra.mxu1 %v9959_v29  ;;  %v3160_v59 = vld [vmem:[%s11692_s4 + $0xa8] sm:$0xff]  ;;  %v3159_v61 = vld [vmem:[%s11692_s4 + $0xa0] sm:$0xff] }
 0x37f   : > { %v2876_v2 = vmax.f32 %v2812_v63, 0.0  ;;  %v3161_v63 = vld [vmem:[%s11692_s4 + $0xb0] sm:$0xff] }
 0x381   : > { %v2908_v3 = vmax.f32 %v2875_v0, %v2876_v2  ;;  %v6394_v0 = vld [vmem:[%s11693_s5 + $0x108] sm:$0xff]  ;;  %v6396_v2 = vld [vmem:[%s11693_s5 + $0x118] sm:$0xff] }
 0x383   : > { %v7812_v5 = vpack.c.bf16 %v2908_v3, %v2907_v62  ;;  %v3162_v62 = vld [vmem:[%s11692_s4 + $0xb8] sm:$0xff]  ;;  %v6393_v3 = vld [vmem:[%s11693_s5 + $0x100] sm:$0xff] }
 0x385   : > { %7814 = vmatprep.subr.msk.bf16.mxu1 %vm10022_vm4, %v7812_v5 }
 0x386   : > { %7816 = vmatpush3.bf16.msra.mxu1 %v9965_v48 }
 0x387   : > { %7818 = vmatprep.subr.bf16.mxu1 %v9971_v1  ;;  %v2916_v1 = vld [vmem:[%s11691_s3 + $0x38] sm:$0xff] }
 0x389   : > { %3059 = vmatmul.mubr.f32.vlgmr.msra.gmra.mrb[0].mxu1 %v2909_v31  ;;  %v7850_v31 = vpack.c.bf16 %v6396_v2, %v6394_v0 }
 0x38a   : > { %7820 = vmatpush3.bf16.msra.mxu1 %v9923_v55  ;;  %6361 = vmatprep.mubr.msk.f32.mxu1 %vm2941_vm1, %v2912_v32  ;;  %v2913_v55 = vld [vmem:[%s11691_s3 + $0x20] sm:$0xff]  ;;  %v6395_v32 = vld [vmem:[%s11693_s5 + $0x110] sm:$0xff] }
 0x38b   : > { %7822 = vmatprep.subr.bf16.mxu1 %v9979_v19  ;;  %v2918_v19 = vld [vmem:[%s11691_s3 + $0x48] sm:$0xff] }
 0x38d   : > { %3064 = vmatmul.mubr.f32.gmra.mrb[2].mxu1 %v2911_v8  ;;  %v7852_v8 = vpack.c.bf16 %v6395_v32, %v6393_v3 }
 0x38e   : > { %7824 = vmatpush3.bf16.msra.mxu1 %v9929_v6  ;;  %6362 = vmatprep.mubr.msk.f32.mxu1 %vm2941_vm1, %v2914_v9  ;;  %v2915_v6 = vld [vmem:[%s11691_s3 + $0x30] sm:$0xff]  ;;  %v3163_v9 = vld [vmem:[%s11692_s4 + $0xc0] sm:$0xff] }
 0x38f   : > { %7826 = vmatprep.subr.bf16.mxu1 %v9987_v41  ;;  %v2920_v41 = vld [vmem:[%s11691_s3 + $0x58] sm:$0xff] }
 0x391   : > { %3069 = vmatmul.mubr.f32.gmra.mrb[4].mxu1 %v2913_v55  ;;  %v3166_v55 = vld [vmem:[%s11692_s4 + $0xd8] sm:$0xff] }
 0x392   : > { %7828 = vmatpush3.bf16.msra.mxu1 %v9935_v22  ;;  %6363 = vmatprep.mubr.msk.f32.mxu1 %vm2941_vm1, %v2916_v1  ;;  %v2917_v22 = vld [vmem:[%s11691_s3 + $0x40] sm:$0xff]  ;;  %v3165_v1 = vld [vmem:[%s11692_s4 + $0xd0] sm:$0xff] }
 0x393   : > { %7830 = vmatprep.subr.bf16.mxu1 %v9995_v60  ;;  %v2922_v60 = vld [vmem:[%s11691_s3 + $0x68] sm:$0xff] }
 0x395   : > { %3074 = vmatmul.mubr.f32.gmra.mrb[6].mxu1 %v2915_v6  ;;  %v6398_v6 = vld [vmem:[%s11693_s5 + $0x128] sm:$0xff] }
 0x396   : > { %7832 = vmatpush3.bf16.msra.mxu1 %v9941_v42  ;;  %6364 = vmatprep.mubr.msk.f32.mxu1 %vm2941_vm1, %v2918_v19  ;;  %v2919_v42 = vld [vmem:[%s11691_s3 + $0x50] sm:$0xff]  ;;  %v6400_v19 = vld [vmem:[%s11693_s5 + $0x138] sm:$0xff] }
 0x397   : > { %7834 = vmatprep.subr.bf16.mxu1 %v10003_v15  ;;  %v2929_v15 = vld [vmem:[%s11691_s3 + $0xa0] sm:$0xff] }
 0x399   : > { %3079 = vmatmul.mubr.f32.gmra.mrb[8].mxu1 %v2917_v22  ;;  %v6397_v22 = vld [vmem:[%s11693_s5 + $0x120] sm:$0xff] }
 0x39a   : > { %7836 = vmatpush3.bf16.msra.mxu1 %v9947_v58  ;;  %6365 = vmatprep.mubr.msk.f32.mxu1 %vm2941_vm1, %v2920_v41  ;;  %v2921_v58 = vld [vmem:[%s11691_s3 + $0x60] sm:$0xff]  ;;  %v3168_v41 = vld [vmem:[%s11692_s4 + $0xe8] sm:$0xff] }
 0x39b   : > { %7838 = vmatprep.subr.bf16.mxu1 %v10011_v38  ;;  %v3144_v38 = vld [vmem:[%s11692_s4 + $0x28] sm:$0xff] }
 0x39d   : > { %3084 = vmatmul.mubr.f32.gmra.mrb[10].mxu1 %v2919_v42  ;;  %v7854_v42 = vpack.c.bf16 %v6400_v19, %v6398_v6 }
 0x39e   : > { %7840 = vmatpush3.bf16.msra.mxu1 %v9953_v11  ;;  %6366 = vmatprep.mubr.msk.f32.mxu1 %vm2941_vm1, %v2922_v60  ;;  %v2923_v11 = vld [vmem:[%s11691_s3 + $0x70] sm:$0xff] }
 0x39f   : > { %7842 = vmatprep.subr.bf16.mxu1 %v7808_v57  ;;  %v3157_v57 = vld [vmem:[%s11692_s4 + $0x90] sm:$0xff] }
 0x3a0   : > { %v6399_v60 = vld [vmem:[%s11693_s5 + $0x130] sm:$0xff] }
 0x3a1   : > { %3089 = vmatmul.mubr.f32.gmra.mrb[12].mxu1 %v2921_v58  ;;  %v7856_v58 = vpack.c.bf16 %v6399_v60, %v6397_v22 }
 0x3a2   : > { %7844 = vmatpush3.bf16.msra.mxu1 %v9959_v29  ;;  %6367 = vmatprep.mubr.msk.f32.mxu1 %vm2941_vm1, %v2924_v10  ;;  %v2925_v29 = vld [vmem:[%s11691_s3 + $0x80] sm:$0xff] }
 0x3a3   : > { %7847 = vmatprep.subr.msk.bf16.mxu1 %vm10022_vm4, %v7812_v5  ;;  %v3164_v5 = vld [vmem:[%s11692_s4 + $0xc8] sm:$0xff]  ;;  %v3167_v10 = vld [vmem:[%s11692_s4 + $0xe0] sm:$0xff] }
 0x3a5   : > { %3094 = vmatmul.mubr.f32.gmra.mrb[14].mxu1 %v2923_v11  ;;  %v3170_v11 = vld [vmem:[%s11692_s4 + $0xf8] sm:$0xff] }
 0x3a6   : > { %7849 = vmatpush3.bf16.msra.mxu1 %v9965_v48  ;;  %6368 = vmatprep.mubr.msk.f32.mxu1 %vm2941_vm1, %v2926_v12  ;;  %v2930_v48 = vld [vmem:[%s11691_s3 + $0xa8] sm:$0xff]  ;;  %v3169_v12 = vld [vmem:[%s11692_s4 + $0xf0] sm:$0xff] }
 0x3a7   : > { %7851 = vmatprep.subr.bf16.mxu1 %v7850_v31 }
 0x3a9   : > { %3099 = vmatmul.mubr.f32.gmra.mrb[16].mxu1 %v2925_v29  ;;  %v6402_v29 = vld [vmem:[%s11693_s5 + $0x148] sm:$0xff] }
 0x3aa   : > { %6369 = vmatprep.mubr.msk.f32.mxu1 %vm2941_vm1, %v2928_v13  ;;  %v6404_v13 = vld [vmem:[%s11693_s5 + $0x158] sm:$0xff] }
 0x3ad   : > { %3104 = vmatmul.mubr.f32.gmra.mrb[18].mxu1 %v2927_v14  ;;  %v6401_v14 = vld [vmem:[%s11693_s5 + $0x140] sm:$0xff] }
 0x3ae   : > { %6370 = vmatprep.mubr.msk.f32.mxu1 %vm2941_vm1, %v2930_v48  ;;  %v7858_v48 = vpack.c.bf16 %v6404_v13, %v6402_v29 }
 0x3b1   : > { %3109 = vmatmul.mubr.f32.gmra.mrb[20].mxu1 %v2929_v15  ;;  %v6403_v15 = vld [vmem:[%s11693_s5 + $0x150] sm:$0xff] }
 0x3b2   : > { %6371 = vmatprep.mubr.msk.f32.mxu1 %vm2941_vm1, %v2932_v16  ;;  %v7860_v16 = vpack.c.bf16 %v6403_v15, %v6401_v14 }
 0x3b5   : > { %3114 = vmatmul.mubr.f32.gmra.mrb[22].mxu1 %v2931_v17  ;;  %v6406_v17 = vld [vmem:[%s11693_s5 + $0x168] sm:$0xff] }
 0x3b6   : > { %6372 = vmatprep.mubr.msk.f32.mxu1 %vm2941_vm1, %v2934_v18  ;;  %v6408_v18 = vld [vmem:[%s11693_s5 + $0x178] sm:$0xff] }
 0x3b9   : > { %3119 = vmatmul.mubr.f32.gmra.mrb[24].mxu1 %v2933_v20  ;;  %v6405_v20 = vld [vmem:[%s11693_s5 + $0x160] sm:$0xff] }
 0x3ba   : > { %6373 = vmatprep.mubr.msk.f32.mxu1 %vm2941_vm1, %v2936_v21  ;;  %v7862_v21 = vpack.c.bf16 %v6408_v18, %v6406_v17 }
 0x3bd   : > { %3124 = vmatmul.mubr.f32.gmra.mrb[26].mxu1 %v2935_v23  ;;  %v6407_v23 = vld [vmem:[%s11693_s5 + $0x170] sm:$0xff] }
 0x3be   : > { %6374 = vmatprep.mubr.msk.f32.mxu1 %vm2941_vm1, %v2938_v24  ;;  %v7864_v24 = vpack.c.bf16 %v6407_v23, %v6405_v20 }
 0x3c1   : > { %3129 = vmatmul.mubr.f32.gmra.mrb[28].mxu1 %v2937_v25  ;;  %v6410_v25 = vld [vmem:[%s11693_s5 + $0x188] sm:$0xff] }
 0x3c2   : > { %6375 = vmatprep.mubr.msk.f32.mxu1 %vm2941_vm1, %v2940_v26  ;;  %v6412_v26 = vld [vmem:[%s11693_s5 + $0x198] sm:$0xff] }
 0x3c5   : > { %3134 = vmatmul.mubr.f32.gmra.mrb[30].mxu1 %v2939_v33  ;;  %v6409_v33 = vld [vmem:[%s11693_s5 + $0x180] sm:$0xff] }
 0x3c6   : > { %6377 = vmatprep.mubr.msk.f32.mxu1 %vm2941_vm1, %v3140_v34  ;;  %v7866_v34 = vpack.c.bf16 %v6412_v26, %v6410_v25 }
 0x3c9   : > { %3284 = vmatmul.mubr.f32.vlgmr.msra.gmra.mrb[32].mxu1 %v3139_v35  ;;  %v6411_v35 = vld [vmem:[%s11693_s5 + $0x190] sm:$0xff] }
 0x3ca   : > { %6378 = vmatprep.mubr.msk.f32.mxu1 %vm2941_vm1, %v3142_v36  ;;  %7853 = vmatpush1.bf16.msra.mxu1 %v7852_v8  ;;  %v7868_v36 = vpack.c.bf16 %v6411_v35, %v6409_v33 }
 0x3cb   : > { %7855 = vmatprep.subr.bf16.mxu1 %v7854_v42 }
 0x3cd   : > { %3289 = vmatmul.mubr.f32.gmra.mrb[34].mxu1 %v3141_v37  ;;  %v6414_v37 = vld [vmem:[%s11693_s5 + $0x1a8] sm:$0xff] }
 0x3ce   : > { %6379 = vmatprep.mubr.msk.f32.mxu1 %vm2941_vm1, %v3144_v38  ;;  %7857 = vmatpush1.bf16.msra.mxu1 %v7856_v58  ;;  %v6416_v38 = vld [vmem:[%s11693_s5 + $0x1b8] sm:$0xff] }
 0x3cf   : > { %7859 = vmatprep.subr.bf16.mxu1 %v7858_v48 }
 0x3d1   : > { %3294 = vmatmul.mubr.f32.gmra.mrb[36].mxu1 %v3143_v39  ;;  %v6413_v39 = vld [vmem:[%s11693_s5 + $0x1a0] sm:$0xff] }
 0x3d2   : > { %6380 = vmatprep.mubr.msk.f32.mxu1 %vm2941_vm1, %v3146_v40  ;;  %7861 = vmatpush1.bf16.msra.mxu1 %v7860_v16  ;;  %v7870_v40 = vpack.c.bf16 %v6416_v38, %v6414_v37 }
 0x3d3   : > { %7863 = vmatprep.subr.bf16.mxu1 %v7862_v21 }
 0x3d5   : > { %3299 = vmatmul.mubr.f32.gmra.mrb[38].mxu1 %v3145_v43  ;;  %v6415_v43 = vld [vmem:[%s11693_s5 + $0x1b0] sm:$0xff] }
 0x3d6   : > { %6381 = vmatprep.mubr.msk.f32.mxu1 %vm2941_vm1, %v3148_v44  ;;  %7865 = vmatpush1.bf16.msra.mxu1 %v7864_v24  ;;  %v7872_v44 = vpack.c.bf16 %v6415_v43, %v6413_v39 }
 0x3d7   : > { %7867 = vmatprep.subr.bf16.mxu1 %v7866_v34 }
 0x3d9   : > { %3304 = vmatmul.mubr.f32.gmra.mrb[40].mxu1 %v3147_v45  ;;  %v6418_v45 = vld [vmem:[%s11693_s5 + $0x1c8] sm:$0xff] }
 0x3da   : > { %6382 = vmatprep.mubr.msk.f32.mxu1 %vm2941_vm1, %v3150_v46  ;;  %7869 = vmatpush1.bf16.msra.mxu1 %v7868_v36  ;;  %v6420_v46 = vld [vmem:[%s11693_s5 + $0x1d8] sm:$0xff] }
 0x3db   : > { %7871 = vmatprep.subr.bf16.mxu1 %v7870_v40 }
 0x3dd   : > { %3309 = vmatmul.mubr.f32.gmra.mrb[42].mxu1 %v3149_v47  ;;  %v7874_v47 = vpack.c.bf16 %v6420_v46, %v6418_v45 }
 0x3de   : > { %6383 = vmatprep.mubr.msk.f32.mxu1 %vm2941_vm1, %v3152_v49  ;;  %7873 = vmatpush1.bf16.msra.mxu1 %v7872_v44  ;;  %v6417_v49 = vld [vmem:[%s11693_s5 + $0x1c0] sm:$0xff] }
 0x3df   : > { %7875 = vmatprep.subr.bf16.mxu1 %v7874_v47 }
 0x3e1   : > { %3314 = vmatmul.mubr.f32.gmra.mrb[44].mxu1 %v3151_v50  ;;  %v6419_v50 = vld [vmem:[%s11693_s5 + $0x1d0] sm:$0xff] }
 0x3e2   : > { %6384 = vmatprep.mubr.msk.f32.mxu1 %vm2941_vm1, %v3154_v51  ;;  %v7876_v51 = vpack.c.bf16 %v6419_v50, %v6417_v49 }
 0x3e4   : > { %7877 = vmatpush1.bf16.msra.mxu1 %v7876_v51 }
 0x3e5   : > { %3319 = vmatmul.mubr.f32.gmra.mrb[46].mxu1 %v3153_v52  ;;  %v6422_v52 = vld [vmem:[%s11693_s5 + $0x1e8] sm:$0xff] }
 0x3e6   : > { %6385 = vmatprep.mubr.msk.f32.mxu1 %vm2941_vm1, %v3156_v53  ;;  %v6424_v53 = vld [vmem:[%s11693_s5 + $0x1f8] sm:$0xff] }
 0x3e9   : > { %3324 = vmatmul.mubr.f32.gmra.mrb[48].mxu1 %v3155_v54  ;;  %v7878_v54 = vpack.c.bf16 %v6424_v53, %v6422_v52 }
 0x3ea   : > { %6386 = vmatprep.mubr.msk.f32.mxu1 %vm2941_vm1, %v3158_v56  ;;  %v6421_v56 = vld [vmem:[%s11693_s5 + $0x1e0] sm:$0xff] }
 0x3eb   : > { %7879 = vmatprep.subr.bf16.mxu1 %v7878_v54 }
 0x3ed   : > { %3329 = vmatmul.mubr.f32.gmra.mrb[50].mxu1 %v3157_v57  ;;  %v6423_v57 = vld [vmem:[%s11693_s5 + $0x1f0] sm:$0xff] }
 0x3ee   : > { %6387 = vmatprep.mubr.msk.f32.mxu1 %vm2941_vm1, %v3160_v59  ;;  %v7880_v59 = vpack.c.bf16 %v6423_v57, %v6421_v56 }
 0x3f0   : > { %7881 = vmatpush1.bf16.msra.mxu1 %v7880_v59 }
 0x3f1   : > { %3334 = vmatmul.mubr.f32.gmra.mrb[52].mxu1 %v3159_v61  ;;  %v3413_v61 = vld [vmem:[%s11693_s5 + $0x8] sm:$0xff] }
 0x3f2   : > { %6388 = vmatprep.mubr.msk.f32.mxu1 %vm2941_vm1, %v3162_v62  ;;  %v3415_v62 = vld [vmem:[%s11693_s5 + $0x18] sm:$0xff] }
 0x3f5   : > { %3339 = vmatmul.mubr.f32.gmra.mrb[54].mxu1 %v3161_v63  ;;  %v7882_v63 = vpack.c.bf16 %v3415_v62, %v3413_v61 }
 0x3f6   : > { %6389 = vmatprep.mubr.msk.f32.mxu1 %vm2941_vm1, %v3164_v5 }
 0x3f7   : > { %7883 = vmatprep.subr.bf16.mxu1 %v7882_v63 }
 0x3f9   : > { %3344 = vmatmul.mubr.f32.gmra.mrb[56].mxu1 %v3163_v9 }
 0x3fa   : > { %6390 = vmatprep.mubr.msk.f32.mxu1 %vm2941_vm1, %v3166_v55 }
 0x3fd   : > { %3349 = vmatmul.mubr.f32.gmra.mrb[58].mxu1 %v3165_v1 }
 0x3fe   : > { %6391 = vmatprep.mubr.msk.f32.mxu1 %vm2941_vm1, %v3168_v41 }
 0x401   : > { %3354 = vmatmul.mubr.f32.gmra.mrb[60].mxu1 %v3167_v10 }
 0x402   : > { %6392 = vmatprep.mubr.msk.f32.mxu1 %vm2941_vm1, %v3170_v11 }
 0x405   : > { %3359 = vmatmul.mubr.f32.gmra.mrb[62].mxu1 %v3169_v12 }
 0x406   : > { %3557 = vmatprep.mubr.f32.mxu1 %v8919_v7 }
 0x45c   : > { %v6652_v0 = vpop.f32.mrb[0].mxu1 }
 0x45d   : > { %v6653_v2 = vpop.f32.mrb[1].mxu1 }
 0x45e   : > { %v6654_v3 = vadd.f32 %v6653_v2, %v6652_v0 }
 0x460   : > { %v6655_v5 = vpop.f32.mrb[2].mxu1 }
 0x461   : > { %v6656_v31 = vpop.f32.mrb[3].mxu1 }
 0x462   : > { %v6657_v32 = vadd.f32 %v6656_v31, %v6655_v5  ;;  %v3414_v5 = vld [vmem:[%s11693_s5 + $0x10] sm:$0xff] }
 0x464   : > { %v6658_v8 = vpop.f32.mrb[4].mxu1 }
 0x465   : > { %v6659_v9 = vpop.f32.mrb[5].mxu1 }
 0x466   : > { %v6660_v55 = vadd.f32 %v6659_v9, %v6658_v8  ;;  %v3419_v8 = vld [vmem:[%s11693_s5 + $0x38] sm:$0xff] }
 0x468   : > { %v6661_v1 = vpop.f32.mrb[6].mxu1 }
 0x469   : > { %v6662_v6 = vpop.f32.mrb[7].mxu1 }
 0x46a   : > { %v6663_v19 = vadd.f32 %v6662_v6, %v6661_v1 }
 0x46c   : > { %v6664_v22 = vpop.f32.mrb[8].mxu1 }
 0x46d   : > { %v6665_v41 = vpop.f32.mrb[9].mxu1 }
 0x46e   : > { %v10368_v42 = vadd.f32 %v6665_v41, %v6664_v22  ;;  %v3416_v41 = vld [vmem:[%s11693_s5 + $0x20] sm:$0xff] }
 0x470   : > { %v6667_v60 = vpop.f32.mrb[10].mxu1 }
 0x471   : > { %v6668_v58 = vpop.f32.mrb[11].mxu1 }
 0x472   : > { %v10370_v10 = vadd.f32 %v6668_v58, %v6667_v60  ;;  %v3418_v60 = vld [vmem:[%s11693_s5 + $0x30] sm:$0xff] }
 0x474   : > { %v6670_v11 = vpop.f32.mrb[12].mxu1 }
 0x475   : > { %v6671_v12 = vpop.f32.mrb[13].mxu1 }
 0x476   : > { %v10372_v29 = vadd.f32 %v6671_v12, %v6670_v11  ;;  %v3421_v12 = vld [vmem:[%s11693_s5 + $0x48] sm:$0xff] }
 0x478   : > { %v6673_v13 = vpop.f32.mrb[14].mxu1 }
 0x479   : > { %v6674_v14 = vpop.f32.mrb[15].mxu1 }
 0x47a   : > { %v10374_v48 = vadd.f32 %v6674_v14, %v6673_v13  ;;  %v7888_v14 = vpack.c.bf16 %v3418_v60, %v3416_v41 }
 0x47c   : > { %v6676_v15 = vpop.f32.mrb[16].mxu1 }
 0x47d   : > { %v6677_v16 = vpop.f32.mrb[17].mxu1 }
 0x47e   : > { %v10376_v17 = vadd.f32 %v6677_v16, %v6676_v15 }
 0x480   : > { %v6679_v18 = vpop.f32.mrb[18].mxu1 }
 0x481   : > { %v6680_v20 = vpop.f32.mrb[19].mxu1 }
 0x482   : > { %v10378_v21 = vadd.f32 %v6680_v20, %v6679_v18  ;;  %v3420_v20 = vld [vmem:[%s11693_s5 + $0x40] sm:$0xff] }
 0x484   : > { %v6682_v23 = vpop.f32.mrb[20].mxu1 }
 0x485   : > { %v6683_v24 = vpop.f32.mrb[21].mxu1 }
 0x486   : > { %v10380_v25 = vadd.f32 %v6683_v24, %v6682_v23  ;;  %v3422_v23 = vld [vmem:[%s11693_s5 + $0x50] sm:$0xff] }
 0x488   : > { %v6685_v26 = vpop.f32.mrb[22].mxu1 }
 0x489   : > { %v6686_v33 = vpop.f32.mrb[23].mxu1 }
 0x48a   : > { %v10382_v34 = vadd.f32 %v6686_v33, %v6685_v26  ;;  %v3425_v33 = vld [vmem:[%s11693_s5 + $0x68] sm:$0xff] }
 0x48c   : > { %v6688_v35 = vpop.f32.mrb[24].mxu1 }
 0x48d   : > { %v6689_v36 = vpop.f32.mrb[25].mxu1 }
 0x48e   : > { %v10384_v37 = vadd.f32 %v6689_v36, %v6688_v35  ;;  %v7892_v36 = vpack.c.bf16 %v3422_v23, %v3420_v20 }
 0x490   : > { %v6691_v38 = vpop.f32.mrb[26].mxu1 }
 0x491   : > { %v6692_v39 = vpop.f32.mrb[27].mxu1 }
 0x492   : > { %v10386_v40 = vadd.f32 %v6692_v39, %v6691_v38 }
 0x494   : > { %v6694_v43 = vpop.f32.mrb[28].mxu1 }
 0x495   : > { %v6695_v44 = vpop.f32.mrb[29].mxu1 }
 0x496   : > { %v10388_v45 = vadd.f32 %v6695_v44, %v6694_v43  ;;  %v3424_v44 = vld [vmem:[%s11693_s5 + $0x60] sm:$0xff] }
 0x498   : > { %v6697_v46 = vpop.f32.mrb[30].mxu1 }
 0x499   : > { %v6698_v47 = vpop.f32.mrb[31].mxu1 }
 0x49a   : > { %v10390_v49 = vadd.f32 %v6698_v47, %v6697_v46  ;;  %v3426_v46 = vld [vmem:[%s11693_s5 + $0x70] sm:$0xff] }
 0x49c   : > { %v6732_v50 = vpop.f32.mrb[32].mxu1 }
 0x49d   : > { %v6733_v51 = vpop.f32.mrb[33].mxu1 }
 0x49e   : > { %v6734_v52 = vadd.f32 %v6733_v51, %v6732_v50  ;;  %v3429_v51 = vld [vmem:[%s11693_s5 + $0x88] sm:$0xff] }
 0x4a0   : > { %v10392_v53 = vmax.f32 %v6654_v3, %v6734_v52  ;;  %v6735_v54 = vpop.f32.mrb[34].mxu1  ;;  %v3412_v3 = vld [vmem:[%s11693_s5] sm:$0xff] }
 0x4a1   : > { %v6736_v56 = vpop.f32.mrb[35].mxu1 }
 0x4a2   : > { %3380 = vst [vmem:[#allocation2] sm:$0xff] %v10392_v53  ;;  %v6737_v57 = vadd.f32 %v6736_v56, %v6735_v54  ;;  %v7896_v54 = vpack.c.bf16 %v3426_v46, %v3424_v44 }
 0x4a4   : > { %v10395_v59 = vmax.f32 %v6657_v32, %v6737_v57  ;;  %v6738_v61 = vpop.f32.mrb[36].mxu1  ;;  %v3417_v32 = vld [vmem:[%s11693_s5 + $0x28] sm:$0xff] }
 0x4a5   : > { %v6739_v62 = vpop.f32.mrb[37].mxu1  ;;  %v7886_v22 = vpack.c.bf16 %v3419_v8, %v3417_v32 }
 0x4a6   : > { %3381 = vst [vmem:[#allocation2 + $0x8] sm:$0xff] %v10395_v59  ;;  %v6740_v63 = vadd.f32 %v6739_v62, %v6738_v61  ;;  %v3428_v62 = vld [vmem:[%s11693_s5 + $0x80] sm:$0xff] }
 0x4a8   : > { %v10398_v0 = vmax.f32 %v6660_v55, %v6740_v63  ;;  %v6741_v2 = vpop.f32.mrb[38].mxu1  ;;  %v7884_v55 = vpack.c.bf16 %v3414_v5, %v3412_v3  ;;  %v3430_v63 = vld [vmem:[%s11693_s5 + $0x90] sm:$0xff]  ;;  %v3433_v5 = vld [vmem:[%s11693_s5 + $0xa8] sm:$0xff] }
 0x4a9   : > { %v6742_v31 = vpop.f32.mrb[39].mxu1  ;;  %v7900_v32 = vpack.c.bf16 %v3430_v63, %v3428_v62 }
 0x4aa   : > { %3382 = vst [vmem:[#allocation2 + $0x10] sm:$0xff] %v10398_v0  ;;  %v6743_v9 = vadd.f32 %v6742_v31, %v6741_v2 }
 0x4ac   : > { %v10413_v1 = vmax.f32 %v6663_v19, %v6743_v9  ;;  %v6744_v6 = vpop.f32.mrb[40].mxu1  ;;  %v3423_v19 = vld [vmem:[%s11693_s5 + $0x58] sm:$0xff] }
 0x4ad   : > { %v6745_v58 = vpop.f32.mrb[41].mxu1  ;;  %v3444_v11 = vld [vmem:[#allocation2 + $0x1] sm:$0xff]  ;;  %v7890_v18 = vpack.c.bf16 %v3423_v19, %v3421_v12 }
 0x4ae   : > { %3383 = vst [vmem:[#allocation2 + $0x18] sm:$0xff] %v10413_v1  ;;  %v6746_v13 = vadd.f32 %v6745_v58, %v6744_v6  ;;  %3558 = vmatmul.mubr.f32.vlgmr.msra.gmra.mrb[64].mxu1 %v3444_v11  ;;  %v3432_v6 = vld [vmem:[%s11693_s5 + $0xa0] sm:$0xff]  ;;  %v3437_v58 = vld [vmem:[%s11693_s5 + $0xc8] sm:$0xff] }
 0x4af   : > { %3563 = vmatprep.mubr.f32.mxu1 %v8919_v7  ;;  %7885 = vmatpush1.bf16.msra.mxu1 %v7884_v55 }
 0x4b0   : > { %v10430_v15 = vmax.f32 %v10368_v42, %v6746_v13  ;;  %v6747_v16 = vpop.f32.mrb[42].mxu1  ;;  %7887 = vmatprep.subr.bf16.mxu1 %v7886_v22  ;;  %v3427_v42 = vld [vmem:[%s11693_s5 + $0x78] sm:$0xff]  ;;  %v3434_v22 = vld [vmem:[%s11693_s5 + $0xb0] sm:$0xff] }
 0x4b1   : > { %v6748_v24 = vpop.f32.mrb[43].mxu1  ;;  %v3445_v26 = vld [vmem:[#allocation2 + $0x9] sm:$0xff]  ;;  %v7894_v43 = vpack.c.bf16 %v3427_v42, %v3425_v33  ;;  %v7904_v12 = vpack.c.bf16 %v3434_v22, %v3432_v6 }
 0x4b2   : > { %3384 = vst [vmem:[#allocation2 + $0x20] sm:$0xff] %v10430_v15  ;;  %v6749_v35 = vadd.f32 %v6748_v24, %v6747_v16  ;;  %3564 = vmatmul.mubr.f32.gmra.mrb[66].mxu1 %v3445_v26  ;;  %v3436_v16 = vld [vmem:[%s11693_s5 + $0xc0] sm:$0xff]  ;;  %v3441_v24 = vld [vmem:[%s11693_s5 + $0xe8] sm:$0xff] }
 0x4b3   : > { %3569 = vmatprep.mubr.f32.mxu1 %v8919_v7  ;;  %7889 = vmatpush1.bf16.msra.mxu1 %v7888_v14 }
 0x4b4   : > { %v10447_v38 = vmax.f32 %v10370_v10, %v6749_v35  ;;  %v6750_v39 = vpop.f32.mrb[44].mxu1  ;;  %7891 = vmatprep.subr.bf16.mxu1 %v7890_v18  ;;  %v3431_v10 = vld [vmem:[%s11693_s5 + $0x98] sm:$0xff]  ;;  %v3438_v18 = vld [vmem:[%s11693_s5 + $0xd0] sm:$0xff] }
 0x4b5   : > { %v6751_v47 = vpop.f32.mrb[45].mxu1  ;;  %v3446_v50 = vld [vmem:[#allocation2 + $0x11] sm:$0xff]  ;;  %v7898_v61 = vpack.c.bf16 %v3431_v10, %v3429_v51  ;;  %v7908_v33 = vpack.c.bf16 %v3438_v18, %v3436_v16  ;;  %v6425_v16 = vld [vmem:[%s11693_s5 + $0x200] sm:$0xff] }
 0x4b6   : > { %3385 = vst [vmem:[#allocation2 + $0x28] sm:$0xff] %v10447_v38  ;;  %v6752_v52 = vadd.f32 %v6751_v47, %v6750_v39  ;;  %3570 = vmatmul.mubr.f32.gmra.mrb[68].mxu1 %v3446_v50  ;;  %v3440_v39 = vld [vmem:[%s11693_s5 + $0xe0] sm:$0xff]  ;;  %v6426_v47 = vld [vmem:[%s11693_s5 + $0x208] sm:$0xff] }
 0x4b7   : > { %3575 = vmatprep.mubr.f32.mxu1 %v8919_v7  ;;  %7893 = vmatpush1.bf16.msra.mxu1 %v7892_v36 }
 0x4b8   : > { %v10464_v56 = vmax.f32 %v10372_v29, %v6752_v52  ;;  %v6753_v57 = vpop.f32.mrb[46].mxu1  ;;  %7895 = vmatprep.subr.bf16.mxu1 %v7894_v43  ;;  %v3435_v29 = vld [vmem:[%s11693_s5 + $0xb8] sm:$0xff]  ;;  %v3442_v43 = vld [vmem:[%s11693_s5 + $0xf0] sm:$0xff] }
 0x4b9   : > { %v6754_v2 = vpop.f32.mrb[47].mxu1  ;;  %v3447_v3 = vld [vmem:[#allocation2 + $0x19] sm:$0xff]  ;;  %v7902_v55 = vpack.c.bf16 %v3435_v29, %v3433_v5  ;;  %v7912_v51 = vpack.c.bf16 %v3442_v43, %v3440_v39 }
 0x4ba   : > { %3386 = vst [vmem:[#allocation2 + $0x30] sm:$0xff] %v10464_v56  ;;  %v6755_v31 = vadd.f32 %v6754_v2, %v6753_v57  ;;  %3576 = vmatmul.mubr.f32.gmra.mrb[70].mxu1 %v3447_v3 }
 0x4bb   : > { %3581 = vmatprep.mubr.f32.mxu1 %v8919_v7  ;;  %7897 = vmatpush1.bf16.msra.mxu1 %v7896_v54 }
 0x4bc   : > { %v10481_v8 = vmax.f32 %v10374_v48, %v6755_v31  ;;  %v6756_v9 = vpop.f32.mrb[48].mxu1  ;;  %7899 = vmatprep.subr.bf16.mxu1 %v7898_v61  ;;  %v3439_v48 = vld [vmem:[%s11693_s5 + $0xd8] sm:$0xff] }
 0x4bd   : > { %v6757_v41 = vpop.f32.mrb[49].mxu1  ;;  %v3448_v60 = vld [vmem:[#allocation2 + $0x21] sm:$0xff]  ;;  %v7906_v14 = vpack.c.bf16 %v3439_v48, %v3437_v58 }
 0x4be   : > { %3387 = vst [vmem:[#allocation2 + $0x38] sm:$0xff] %v10481_v8  ;;  %v6758_v11 = vadd.f32 %v6757_v41, %v6756_v9  ;;  %3582 = vmatmul.mubr.f32.gmra.mrb[72].mxu1 %v3448_v60 }
 0x4bf   : > { %3587 = vmatprep.mubr.f32.mxu1 %v8919_v7  ;;  %7901 = vmatpush1.bf16.msra.mxu1 %v7900_v32 }
 0x4c0   : > { %v10498_v19 = vmax.f32 %v10376_v17, %v6758_v11  ;;  %v6759_v13 = vpop.f32.mrb[50].mxu1  ;;  %7903 = vmatprep.subr.bf16.mxu1 %v7902_v55  ;;  %v3443_v17 = vld [vmem:[%s11693_s5 + $0xf8] sm:$0xff] }
 0x4c1   : > { %v6760_v20 = vpop.f32.mrb[51].mxu1  ;;  %v3449_v23 = vld [vmem:[#allocation2 + $0x29] sm:$0xff]  ;;  %v7910_v36 = vpack.c.bf16 %v3443_v17, %v3441_v24 }
 0x4c2   : > { %3388 = vst [vmem:[#allocation2 + $0x40] sm:$0xff] %v10498_v19  ;;  %v6761_v26 = vadd.f32 %v6760_v20, %v6759_v13  ;;  %3588 = vmatmul.mubr.f32.gmra.mrb[74].mxu1 %v3449_v23  ;;  %v6430_v20 = vld [vmem:[%s11693_s5 + $0x228] sm:$0xff]  ;;  %v6432_v23 = vld [vmem:[%s11693_s5 + $0x238] sm:$0xff] }
 0x4c3   : > { %3593 = vmatprep.mubr.f32.mxu1 %v8919_v7  ;;  %7905 = vmatpush1.bf16.msra.mxu1 %v7904_v12  ;;  %v7918_v17 = vpack.c.bf16 %v6432_v23, %v6430_v20  ;;  %v6465_v23 = vld [vmem:[%s11693_s5 + $0x340] sm:$0xff] }
 0x4c4   : > { %v10515_v42 = vmax.f32 %v10378_v21, %v6761_v26  ;;  %v6762_v35 = vpop.f32.mrb[52].mxu1  ;;  %7907 = vmatprep.subr.bf16.mxu1 %v7906_v14  ;;  %v6428_v21 = vld [vmem:[%s11693_s5 + $0x218] sm:$0xff]  ;;  %v6429_v26 = vld [vmem:[%s11693_s5 + $0x220] sm:$0xff] }
 0x4c5   : > { %v6763_v44 = vpop.f32.mrb[53].mxu1  ;;  %v3450_v46 = vld [vmem:[#allocation2 + $0x31] sm:$0xff]  ;;  %v7914_v54 = vpack.c.bf16 %v6428_v21, %v6426_v47  ;;  %v6438_v47 = vld [vmem:[%s11693_s5 + $0x268] sm:$0xff] }
 0x4c6   : > { %3389 = vst [vmem:[#allocation2 + $0x48] sm:$0xff] %v10515_v42  ;;  %v6764_v50 = vadd.f32 %v6763_v44, %v6762_v35  ;;  %3594 = vmatmul.mubr.f32.gmra.mrb[76].mxu1 %v3450_v46  ;;  %v6434_v35 = vld [vmem:[%s11693_s5 + $0x248] sm:$0xff]  ;;  %v6433_v44 = vld [vmem:[%s11693_s5 + $0x240] sm:$0xff]  ;;  %v6435_v46 = vld [vmem:[%s11693_s5 + $0x250] sm:$0xff] }
 0x4c7   : > { %3599 = vmatprep.mubr.f32.mxu1 %v8919_v7  ;;  %7909 = vmatpush1.bf16.msra.mxu1 %v7908_v33  ;;  %v6431_v33 = vld [vmem:[%s11693_s5 + $0x230] sm:$0xff]  ;;  %v7924_v21 = vpack.c.bf16 %v6435_v46, %v6433_v44  ;;  %v6474_v46 = vld [vmem:[%s11693_s5 + $0x388] sm:$0xff] }
 0x4c8   : > { %v10532_v10 = vmax.f32 %v10380_v25, %v6764_v50  ;;  %v6765_v52 = vpop.f32.mrb[54].mxu1  ;;  %7911 = vmatprep.subr.bf16.mxu1 %v7910_v36  ;;  %v6436_v36 = vld [vmem:[%s11693_s5 + $0x258] sm:$0xff]  ;;  %v7920_v39 = vpack.c.bf16 %v6431_v33, %v6429_v26  ;;  %v6470_v26 = vld [vmem:[%s11693_s5 + $0x368] sm:$0xff] }
 0x4c9   : > { %v6766_v57 = vpop.f32.mrb[55].mxu1  ;;  %v3451_v61 = vld [vmem:[#allocation2 + $0x39] sm:$0xff]  ;;  %v7922_v43 = vpack.c.bf16 %v6436_v36, %v6434_v35 }
 0x4ca   : > { %3390 = vst [vmem:[#allocation2 + $0x50] sm:$0xff] %v10532_v10  ;;  %v6767_v62 = vadd.f32 %v6766_v57, %v6765_v52  ;;  %3600 = vmatmul.mubr.f32.gmra.mrb[78].mxu1 %v3451_v61  ;;  %v6439_v52 = vld [vmem:[%s11693_s5 + $0x270] sm:$0xff]  ;;  %v6472_v33 = vld [vmem:[%s11693_s5 + $0x378] sm:$0xff] }
 0x4cb   : > { %3605 = vmatprep.mubr.f32.mxu1 %v8919_v7  ;;  %7913 = vmatpush1.bf16.msra.mxu1 %v7912_v51  ;;  %v6437_v51 = vld [vmem:[%s11693_s5 + $0x260] sm:$0xff]  ;;  %v7958_v36 = vpack.c.bf16 %v6472_v33, %v6470_v26  ;;  %v3817_v44 = vld [vmem:[#allocation2 + $0x12] sm:$0xff] }
 0x4cc   : > { %v10537_v63 = vmax.f32 %v10382_v34, %v6767_v62  ;;  %v6768_v2 = vpop.f32.mrb[56].mxu1  ;;  %7915 = vmatprep.subr.bf16.mxu1 %v7914_v54  ;;  %v6442_v54 = vld [vmem:[%s11693_s5 + $0x288] sm:$0xff]  ;;  %v7928_v57 = vpack.c.bf16 %v6439_v52, %v6437_v51  ;;  %v6441_v62 = vld [vmem:[%s11693_s5 + $0x280] sm:$0xff]  ;;  %v6475_v51 = vld [vmem:[%s11693_s5 + $0x390] sm:$0xff] }
 0x4cd   : > { %v6769_v3 = vpop.f32.mrb[57].mxu1  ;;  %v3452_v25 = vld [vmem:[#allocation2 + $0x41] sm:$0xff] }
 0x4ce   : > { %3391 = vst [vmem:[#allocation2 + $0x58] sm:$0xff] %v10537_v63  ;;  %v6770_v5 = vadd.f32 %v6769_v3, %v6768_v2  ;;  %3606 = vmatmul.mubr.f32.gmra.mrb[80].mxu1 %v3452_v25  ;;  %v6443_v2 = vld [vmem:[%s11693_s5 + $0x290] sm:$0xff]  ;;  %v6446_v3 = vld [vmem:[%s11693_s5 + $0x2a8] sm:$0xff]  ;;  %v3818_v52 = vld [vmem:[#allocation2 + $0x1a] sm:$0xff] }
 0x4cf   : > { %3611 = vmatprep.mubr.f32.mxu1 %v8919_v7  ;;  %v7932_v25 = vpack.c.bf16 %v6443_v2, %v6441_v62  ;;  %v6477_v62 = vld [vmem:[%s11693_s5 + $0x3a0] sm:$0xff]  ;;  %v6479_v2 = vld [vmem:[%s11693_s5 + $0x3b0] sm:$0xff] }
 0x4d0   : > { %v10542_v29 = vmax.f32 %v10384_v37, %v6770_v5  ;;  %v6771_v31 = vpop.f32.mrb[58].mxu1 }
 0x4d1   : > { %v6772_v32 = vpop.f32.mrb[59].mxu1  ;;  %v3453_v9 = vld [vmem:[#allocation2 + $0x49] sm:$0xff] }
 0x4d2   : > { %3392 = vst [vmem:[#allocation2 + $0x60] sm:$0xff] %v10542_v29  ;;  %v6773_v34 = vadd.f32 %v6772_v32, %v6771_v31  ;;  %3612 = vmatmul.mubr.f32.gmra.mrb[82].mxu1 %v3453_v9  ;;  %v6445_v31 = vld [vmem:[%s11693_s5 + $0x2a0] sm:$0xff]  ;;  %v6447_v32 = vld [vmem:[%s11693_s5 + $0x2b0] sm:$0xff]  ;;  %v6450_v9 = vld [vmem:[%s11693_s5 + $0x2c8] sm:$0xff] }
 0x4d3   : > { %3617 = vmatprep.mubr.f32.mxu1 %v8919_v7 }
 0x4d4   : > { %v10547_v55 = vmax.f32 %v10386_v40, %v6773_v34  ;;  %v6774_v6 = vpop.f32.mrb[60].mxu1  ;;  %v7936_v34 = vpack.c.bf16 %v6447_v32, %v6445_v31  ;;  %v6481_v32 = vld [vmem:[%s11693_s5 + $0x3c0] sm:$0xff] }
 0x4d5   : > { %v6775_v22 = vpop.f32.mrb[61].mxu1  ;;  %v3454_v41 = vld [vmem:[#allocation2 + $0x51] sm:$0xff] }
 0x4d6   : > { %3393 = vst [vmem:[#allocation2 + $0x68] sm:$0xff] %v10547_v55  ;;  %v6776_v60 = vadd.f32 %v6775_v22, %v6774_v6  ;;  %3618 = vmatmul.mubr.f32.gmra.mrb[84].mxu1 %v3454_v41  ;;  %v6449_v22 = vld [vmem:[%s11693_s5 + $0x2c0] sm:$0xff]  ;;  %v6451_v41 = vld [vmem:[%s11693_s5 + $0x2d0] sm:$0xff] }
 0x4d7   : > { %3623 = vmatprep.mubr.f32.mxu1 %v8919_v7 }
 0x4d8   : > { %v10552_v37 = vmax.f32 %v10388_v45, %v6776_v60  ;;  %v6777_v58 = vpop.f32.mrb[62].mxu1  ;;  %v6454_v60 = vld [vmem:[%s11693_s5 + $0x2e8] sm:$0xff] }
 0x4d9   : > { %v6778_v48 = vpop.f32.mrb[63].mxu1  ;;  %v3455_v11 = vld [vmem:[#allocation2 + $0x59] sm:$0xff] }
 0x4da   : > { %3394 = vst [vmem:[#allocation2 + $0x70] sm:$0xff] %v10552_v37  ;;  %v6779_v12 = vadd.f32 %v6778_v48, %v6777_v58  ;;  %3624 = vmatmul.mubr.f32.gmra.mrb[86].mxu1 %v3455_v11  ;;  %v7940_v58 = vpack.c.bf16 %v6451_v41, %v6449_v22  ;;  %v6453_v11 = vld [vmem:[%s11693_s5 + $0x2e0] sm:$0xff] }
 0x4db   : > { %3629 = vmatprep.mubr.f32.mxu1 %v8919_v7 }
 0x4dc   : > { %v3379_v40 = vmax.f32 %v10390_v49, %v6779_v12  ;;  %v6427_v49 = vld [vmem:[%s11693_s5 + $0x210] sm:$0xff] }
 0x4dd   : > { %v3456_v13 = vld [vmem:[#allocation2 + $0x61] sm:$0xff]  ;;  %v7916_v24 = vpack.c.bf16 %v6427_v49, %v6425_v16  ;;  %v6455_v12 = vld [vmem:[%s11693_s5 + $0x2f0] sm:$0xff]  ;;  %v6468_v49 = vld [vmem:[%s11693_s5 + $0x358] sm:$0xff] }
 0x4de   : > { %3395 = vst [vmem:[#allocation2 + $0x78] sm:$0xff] %v3379_v40  ;;  %3630 = vmatmul.mubr.f32.gmra.mrb[88].mxu1 %v3456_v13  ;;  %v6458_v40 = vld [vmem:[%s11693_s5 + $0x308] sm:$0xff]  ;;  %v7944_v13 = vpack.c.bf16 %v6455_v12, %v6453_v11  ;;  %v6492_v11 = vld [vmem:[%s11693_s5 + $0x418] sm:$0xff] }
 0x4df   : > { %3635 = vmatprep.mubr.f32.mxu1 %v8919_v7  ;;  %v6466_v16 = vld [vmem:[%s11693_s5 + $0x348] sm:$0xff] }
 0x4e0   : > { %v7954_v20 = vpack.c.bf16 %v6468_v49, %v6466_v16 }
 0x4e1   : > { %v3457_v14 = vld [vmem:[#allocation2 + $0x69] sm:$0xff] }
 0x4e2   : > { %3636 = vmatmul.mubr.f32.gmra.mrb[90].mxu1 %v3457_v14 }
 0x4e3   : > { %3641 = vmatprep.mubr.f32.mxu1 %v8919_v7 }
 0x4e5   : > { %v3458_v45 = vld [vmem:[#allocation2 + $0x71] sm:$0xff]  ;;  %v3459_v18 = vld [vmem:[#allocation2 + $0x79] sm:$0xf] }
 0x4e6   : > { %3642 = vmatmul.mubr.f32.gmra.mrb[92].mxu1 %v3458_v45  ;;  %v3815_v45 = vld [vmem:[#allocation2 + $0x2] sm:$0xff] }
 0x4e7   : > { %3647 = vmatprep.mubr.f32.mxu1 %v8919_v7 }
 0x4ea   : > { %3648 = vmatmul.mubr.f32.gmra.mrb[94].mxu1 %v3459_v18 }
 0x4eb   : > { %3718 = vmatprep.mubr.f32.mxu1 %v8919_v7 }
 0x4ee   : > { %3719 = vmatmul.mubr.f32.vlgmr.msra.gmra.mrb[64].mxu1 %v10392_v53  ;;  %v6440_v53 = vld [vmem:[%s11693_s5 + $0x278] sm:$0xff] }
 0x4ef   : > { %3724 = vmatprep.mubr.f32.mxu1 %v8919_v7  ;;  %7917 = vmatpush1.bf16.msra.mxu1 %v7916_v24  ;;  %v7926_v50 = vpack.c.bf16 %v6440_v53, %v6438_v47  ;;  %v6467_v24 = vld [vmem:[%s11693_s5 + $0x350] sm:$0xff]  ;;  %v6476_v47 = vld [vmem:[%s11693_s5 + $0x398] sm:$0xff] }
 0x4f0   : > { %7919 = vmatprep.subr.bf16.mxu1 %v7918_v17  ;;  %v3816_v17 = vld [vmem:[#allocation2 + $0xa] sm:$0xff]  ;;  %v7956_v35 = vpack.c.bf16 %v6467_v24, %v6465_v23 }
 0x4f1   : > { %v4057_v23 = vld [vmem:[#allocation2 + $0x3] sm:$0xff] }
 0x4f2   : > { %3725 = vmatmul.mubr.f32.gmra.mrb[66].mxu1 %v10395_v59  ;;  %v6444_v59 = vld [vmem:[%s11693_s5 + $0x298] sm:$0xff]  ;;  %v6498_v24 = vld [vmem:[%s11693_s5 + $0x448] sm:$0xff] }
 0x4f3   : > { %3730 = vmatprep.mubr.f32.mxu1 %v8919_v7  ;;  %7921 = vmatpush1.bf16.msra.mxu1 %v7920_v39  ;;  %v7930_v61 = vpack.c.bf16 %v6444_v59, %v6442_v54  ;;  %v6469_v39 = vld [vmem:[%s11693_s5 + $0x360] sm:$0xff]  ;;  %v6478_v54 = vld [vmem:[%s11693_s5 + $0x3a8] sm:$0xff]  ;;  %v6480_v59 = vld [vmem:[%s11693_s5 + $0x3b8] sm:$0xff] }
 0x4f4   : > { %7923 = vmatprep.subr.bf16.mxu1 %v7922_v43  ;;  %v6471_v43 = vld [vmem:[%s11693_s5 + $0x370] sm:$0xff] }
 0x4f5   : > { %v7960_v53 = vpack.c.bf16 %v6471_v43, %v6469_v39  ;;  %v4058_v39 = vld [vmem:[#allocation2 + $0xb] sm:$0xff] }
 0x4f6   : > { %3731 = vmatmul.mubr.f32.gmra.mrb[68].mxu1 %v10398_v0  ;;  %v6448_v0 = vld [vmem:[%s11693_s5 + $0x2b8] sm:$0xff]  ;;  %v6502_v43 = vld [vmem:[%s11693_s5 + $0x468] sm:$0xff] }
 0x4f7   : > { %3736 = vmatprep.mubr.f32.mxu1 %v8919_v7  ;;  %7925 = vmatpush1.bf16.msra.mxu1 %v7924_v21  ;;  %v7934_v5 = vpack.c.bf16 %v6448_v0, %v6446_v3  ;;  %v7962_v21 = vpack.c.bf16 %v6476_v47, %v6474_v46  ;;  %v3819_v3 = vld [vmem:[#allocation2 + $0x22] sm:$0xff] }
 0x4f8   : > { %7927 = vmatprep.subr.bf16.mxu1 %v7926_v50  ;;  %v6473_v50 = vld [vmem:[%s11693_s5 + $0x380] sm:$0xff]  ;;  %v6482_v0 = vld [vmem:[%s11693_s5 + $0x3c8] sm:$0xff] }
 0x4fa   : > { %3737 = vmatmul.mubr.f32.gmra.mrb[70].mxu1 %v10413_v1  ;;  %v6452_v1 = vld [vmem:[%s11693_s5 + $0x2d8] sm:$0xff] }
 0x4fb   : > { %3742 = vmatprep.mubr.f32.mxu1 %v8919_v7  ;;  %7929 = vmatpush1.bf16.msra.mxu1 %v7928_v57  ;;  %v7938_v6 = vpack.c.bf16 %v6452_v1, %v6450_v9  ;;  %v7964_v57 = vpack.c.bf16 %v6475_v51, %v6473_v50  ;;  %v6483_v9 = vld [vmem:[%s11693_s5 + $0x3d0] sm:$0xff]  ;;  %v6506_v51 = vld [vmem:[%s11693_s5 + $0x488] sm:$0xff] }
 0x4fc   : > { %7931 = vmatprep.subr.bf16.mxu1 %v7930_v61  ;;  %v7966_v61 = vpack.c.bf16 %v6480_v59, %v6478_v54  ;;  %v3820_v1 = vld [vmem:[#allocation2 + $0x2a] sm:$0xff]  ;;  %v7972_v22 = vpack.c.bf16 %v6483_v9, %v6481_v32  ;;  %v4059_v50 = vld [vmem:[#allocation2 + $0x13] sm:$0xff] }
 0x4fd   : > { %v4061_v32 = vld [vmem:[#allocation2 + $0x23] sm:$0xff] }
 0x4fe   : > { %3743 = vmatmul.mubr.f32.gmra.mrb[72].mxu1 %v10430_v15  ;;  %v6456_v15 = vld [vmem:[%s11693_s5 + $0x2f8] sm:$0xff]  ;;  %v6514_v9 = vld [vmem:[%s11693_s5 + $0x4c8] sm:$0xff] }
 0x4ff   : > { %3748 = vmatprep.mubr.f32.mxu1 %v8919_v7  ;;  %7933 = vmatpush1.bf16.msra.mxu1 %v7932_v25  ;;  %v7942_v48 = vpack.c.bf16 %v6456_v15, %v6454_v60  ;;  %v6484_v25 = vld [vmem:[%s11693_s5 + $0x3d8] sm:$0xff]  ;;  %v6485_v60 = vld [vmem:[%s11693_s5 + $0x3e0] sm:$0xff]  ;;  %v6487_v15 = vld [vmem:[%s11693_s5 + $0x3f0] sm:$0xff] }
 0x500   : > { %7935 = vmatprep.subr.bf16.mxu1 %v7934_v5  ;;  %v7968_v5 = vpack.c.bf16 %v6479_v2, %v6477_v62  ;;  %v7970_v31 = vpack.c.bf16 %v6484_v25, %v6482_v0  ;;  %v7976_v12 = vpack.c.bf16 %v6487_v15, %v6485_v60  ;;  %v4060_v62 = vld [vmem:[#allocation2 + $0x1b] sm:$0xff]  ;;  %v6510_v2 = vld [vmem:[%s11693_s5 + $0x4a8] sm:$0xff] }
 0x501   : > { %v4062_v60 = vld [vmem:[#allocation2 + $0x2b] sm:$0xff] }
 0x502   : > { %3749 = vmatmul.mubr.f32.gmra.mrb[74].mxu1 %v10447_v38  ;;  %v6460_v38 = vld [vmem:[%s11693_s5 + $0x318] sm:$0xff]  ;;  %v6518_v15 = vld [vmem:[%s11693_s5 + $0x4e8] sm:$0xff] }
 0x503   : > { %3754 = vmatprep.mubr.f32.mxu1 %v8919_v7  ;;  %7937 = vmatpush1.bf16.msra.mxu1 %v7936_v34  ;;  %v7946_v14 = vpack.c.bf16 %v6460_v38, %v6458_v40  ;;  %v6486_v34 = vld [vmem:[%s11693_s5 + $0x3e8] sm:$0xff]  ;;  %v3822_v38 = vld [vmem:[#allocation2 + $0x3a] sm:$0xff] }
 0x504   : > { %7939 = vmatprep.subr.bf16.mxu1 %v7938_v6  ;;  %v6488_v6 = vld [vmem:[%s11693_s5 + $0x3f8] sm:$0xff] }
 0x505   : > { %v7974_v41 = vpack.c.bf16 %v6488_v6, %v6486_v34 }
 0x506   : > { %3755 = vmatmul.mubr.f32.gmra.mrb[76].mxu1 %v10464_v56  ;;  %v6457_v56 = vld [vmem:[%s11693_s5 + $0x300] sm:$0xff] }
 0x507   : > { %3760 = vmatprep.mubr.f32.mxu1 %v8919_v7  ;;  %7941 = vmatpush1.bf16.msra.mxu1 %v7940_v58  ;;  %v3821_v58 = vld [vmem:[#allocation2 + $0x32] sm:$0xff] }
 0x508   : > { %7943 = vmatprep.subr.bf16.mxu1 %v7942_v48  ;;  %v6490_v48 = vld [vmem:[%s11693_s5 + $0x408] sm:$0xff] }
 0x509   : > { %v7978_v40 = vpack.c.bf16 %v6492_v11, %v6490_v48 }
 0x50a   : > { %3761 = vmatmul.mubr.f32.gmra.mrb[78].mxu1 %v10481_v8  ;;  %v6459_v8 = vld [vmem:[%s11693_s5 + $0x310] sm:$0xff] }
 0x50b   : > { %3766 = vmatprep.mubr.f32.mxu1 %v8919_v7  ;;  %7945 = vmatpush1.bf16.msra.mxu1 %v7944_v13  ;;  %v3823_v13 = vld [vmem:[#allocation2 + $0x42] sm:$0xff] }
 0x50c   : > { %7947 = vmatprep.subr.bf16.mxu1 %v7946_v14  ;;  %v3824_v14 = vld [vmem:[#allocation2 + $0x4a] sm:$0xff] }
 0x50e   : > { %3767 = vmatmul.mubr.f32.gmra.mrb[80].mxu1 %v10498_v19  ;;  %v3411_v19 = vld [vmem:[#allocation2 + $0x78] sm:$0xf] }
 0x50f   : > { %3772 = vmatprep.mubr.f32.mxu1 %v8919_v7 }
 0x512   : > { %3773 = vmatmul.mubr.f32.gmra.mrb[82].mxu1 %v10515_v42  ;;  %v6462_v42 = vld [vmem:[%s11693_s5 + $0x328] sm:$0xff] }
 0x513   : > { %3778 = vmatprep.mubr.f32.mxu1 %v8919_v7 }
 0x516   : > { %3779 = vmatmul.mubr.f32.gmra.mrb[84].mxu1 %v10532_v10  ;;  %v6464_v10 = vld [vmem:[%s11693_s5 + $0x338] sm:$0xff] }
 0x517   : > { %3784 = vmatprep.mubr.f32.mxu1 %v8919_v7 }
 0x51a   : > { %3785 = vmatmul.mubr.f32.gmra.mrb[86].mxu1 %v10537_v63  ;;  %v7948_v63 = vpack.c.bf16 %v6459_v8, %v6457_v56  ;;  %v3825_v56 = vld [vmem:[#allocation2 + $0x52] sm:$0xff]  ;;  %v3826_v8 = vld [vmem:[#allocation2 + $0x5a] sm:$0xff] }
 0x51b   : > { %3790 = vmatprep.mubr.f32.mxu1 %v8919_v7 }
 0x51e   : > { %3791 = vmatmul.mubr.f32.gmra.mrb[88].mxu1 %v10542_v29  ;;  %v7950_v29 = vpack.c.bf16 %v6464_v10, %v6462_v42  ;;  %v3828_v42 = vld [vmem:[#allocation2 + $0x6a] sm:$0xff]  ;;  %v3829_v10 = vld [vmem:[#allocation2 + $0x72] sm:$0xff] }
 0x51f   : > { %3796 = vmatprep.mubr.f32.mxu1 %v8919_v7 }
 0x522   : > { %3797 = vmatmul.mubr.f32.gmra.mrb[90].mxu1 %v10547_v55  ;;  %v6461_v55 = vld [vmem:[%s11693_s5 + $0x320] sm:$0xff] }
 0x523   : > { %3802 = vmatprep.mubr.f32.mxu1 %v8919_v7 }
 0x526   : > { %3803 = vmatmul.mubr.f32.gmra.mrb[92].mxu1 %v10552_v37  ;;  %v6463_v37 = vld [vmem:[%s11693_s5 + $0x330] sm:$0xff] }
 0x527   : > { %3808 = vmatprep.mubr.f32.mxu1 %v8919_v7  ;;  %v7952_v18 = vpack.c.bf16 %v6463_v37, %v6461_v55  ;;  %v3830_v55 = vld [vmem:[#allocation2 + $0x7a] sm:$0xf]  ;;  %v6494_v37 = vld [vmem:[%s11693_s5 + $0x428] sm:$0xff] }
 0x52a   : > { %3809 = vmatmul.mubr.f32.gmra.mrb[94].mxu1 %v3411_v19  ;;  %v3827_v19 = vld [vmem:[#allocation2 + $0x62] sm:$0xff] }
 0x52b   : > { %3928 = vmatprep.mubr.f32.mxu1 %v8919_v7 }
 0x52e   : > { %3929 = vmatmul.mubr.f32.vlgmr.msra.gmra.mrb[64].mxu1 %v3815_v45  ;;  %v6496_v45 = vld [vmem:[%s11693_s5 + $0x438] sm:$0xff] }
 0x52f   : > { %3934 = vmatprep.mubr.f32.mxu1 %v8919_v7  ;;  %7949 = vmatpush1.bf16.msra.mxu1 %v7948_v63  ;;  %v6489_v63 = vld [vmem:[%s11693_s5 + $0x400] sm:$0xff]  ;;  %v7982_v49 = vpack.c.bf16 %v6496_v45, %v6494_v37  ;;  %v4300_v45 = vld [vmem:[#allocation2 + $0xc] sm:$0xff] }
 0x530   : > { %7951 = vmatprep.subr.bf16.mxu1 %v7950_v29  ;;  %v6491_v29 = vld [vmem:[%s11693_s5 + $0x410] sm:$0xff]  ;;  %v4299_v37 = vld [vmem:[#allocation2 + $0x4] sm:$0xff] }
 0x531   : > { %v7980_v16 = vpack.c.bf16 %v6491_v29, %v6489_v63  ;;  %v4070_v63 = vld [vmem:[#allocation2 + $0x6b] sm:$0xff]  ;;  %v4071_v29 = vld [vmem:[#allocation2 + $0x73] sm:$0xff] }
 0x532   : > { %3935 = vmatmul.mubr.f32.gmra.mrb[66].mxu1 %v3816_v17  ;;  %v6500_v17 = vld [vmem:[%s11693_s5 + $0x458] sm:$0xff] }
 0x533   : > { %3940 = vmatprep.mubr.f32.mxu1 %v8919_v7  ;;  %7953 = vmatpush1.bf16.msra.mxu1 %v7952_v18  ;;  %v6493_v18 = vld [vmem:[%s11693_s5 + $0x420] sm:$0xff]  ;;  %v7986_v33 = vpack.c.bf16 %v6500_v17, %v6498_v24 }
 0x534   : > { %7955 = vmatprep.subr.bf16.mxu1 %v7954_v20  ;;  %v6495_v20 = vld [vmem:[%s11693_s5 + $0x430] sm:$0xff]  ;;  %v4306_v24 = vld [vmem:[#allocation2 + $0x3c] sm:$0xff]  ;;  %v4307_v17 = vld [vmem:[#allocation2 + $0x44] sm:$0xff] }
 0x535   : > { %v7984_v26 = vpack.c.bf16 %v6495_v20, %v6493_v18  ;;  %v4303_v18 = vld [vmem:[#allocation2 + $0x24] sm:$0xff]  ;;  %v4304_v20 = vld [vmem:[#allocation2 + $0x2c] sm:$0xff] }
 0x536   : > { %3941 = vmatmul.mubr.f32.gmra.mrb[68].mxu1 %v3817_v44  ;;  %v6504_v44 = vld [vmem:[%s11693_s5 + $0x478] sm:$0xff] }
 0x537   : > { %3946 = vmatprep.mubr.f32.mxu1 %v8919_v7  ;;  %7957 = vmatpush1.bf16.msra.mxu1 %v7956_v35  ;;  %v6497_v35 = vld [vmem:[%s11693_s5 + $0x440] sm:$0xff]  ;;  %v7990_v47 = vpack.c.bf16 %v6504_v44, %v6502_v43  ;;  %v4313_v43 = vld [vmem:[#allocation2 + $0x74] sm:$0xff]  ;;  %v4314_v44 = vld [vmem:[#allocation2 + $0x7c] sm:$0xf] }
 0x538   : > { %7959 = vmatprep.subr.bf16.mxu1 %v7958_v36  ;;  %v6499_v36 = vld [vmem:[%s11693_s5 + $0x450] sm:$0xff] }
 0x539   : > { %v7988_v46 = vpack.c.bf16 %v6499_v36, %v6497_v35  ;;  %v4310_v35 = vld [vmem:[#allocation2 + $0x5c] sm:$0xff]  ;;  %v4311_v36 = vld [vmem:[#allocation2 + $0x64] sm:$0xff] }
 0x53a   : > { %3947 = vmatmul.mubr.f32.gmra.mrb[70].mxu1 %v3818_v52  ;;  %v6508_v52 = vld [vmem:[%s11693_s5 + $0x498] sm:$0xff] }
 0x53b   : > { %3952 = vmatprep.mubr.f32.mxu1 %v8919_v7  ;;  %7961 = vmatpush1.bf16.msra.mxu1 %v7960_v53  ;;  %v6501_v53 = vld [vmem:[%s11693_s5 + $0x460] sm:$0xff]  ;;  %v7994_v59 = vpack.c.bf16 %v6508_v52, %v6506_v51 }
 0x53c   : > { %7963 = vmatprep.subr.bf16.mxu1 %v7962_v21  ;;  %v6503_v21 = vld [vmem:[%s11693_s5 + $0x470] sm:$0xff] }
 0x53d   : > { %v7992_v54 = vpack.c.bf16 %v6503_v21, %v6501_v53 }
 0x53e   : > { %3953 = vmatmul.mubr.f32.gmra.mrb[72].mxu1 %v3819_v3  ;;  %v6512_v3 = vld [vmem:[%s11693_s5 + $0x4b8] sm:$0xff] }
 0x53f   : > { %3958 = vmatprep.mubr.f32.mxu1 %v8919_v7  ;;  %7965 = vmatpush1.bf16.msra.mxu1 %v7964_v57  ;;  %v6505_v57 = vld [vmem:[%s11693_s5 + $0x480] sm:$0xff]  ;;  %v7998_v25 = vpack.c.bf16 %v6512_v3, %v6510_v2 }
 0x540   : > { %7967 = vmatprep.subr.bf16.mxu1 %v7966_v61  ;;  %v6507_v61 = vld [vmem:[%s11693_s5 + $0x490] sm:$0xff] }
 0x541   : > { %v7996_v0 = vpack.c.bf16 %v6507_v61, %v6505_v57 }
 0x542   : > { %3959 = vmatmul.mubr.f32.gmra.mrb[74].mxu1 %v3820_v1  ;;  %v6516_v1 = vld [vmem:[%s11693_s5 + $0x4d8] sm:$0xff] }
 0x543   : > { %3964 = vmatprep.mubr.f32.mxu1 %v8919_v7  ;;  %7969 = vmatpush1.bf16.msra.mxu1 %v7968_v5  ;;  %v6509_v5 = vld [vmem:[%s11693_s5 + $0x4a0] sm:$0xff]  ;;  %v8002_v6 = vpack.c.bf16 %v6516_v1, %v6514_v9 }
 0x544   : > { %7971 = vmatprep.subr.bf16.mxu1 %v7970_v31  ;;  %v6511_v31 = vld [vmem:[%s11693_s5 + $0x4b0] sm:$0xff] }
 0x545   : > { %v8000_v34 = vpack.c.bf16 %v6511_v31, %v6509_v5 }
 0x546   : > { %3965 = vmatmul.mubr.f32.gmra.mrb[76].mxu1 %v3821_v58  ;;  %v6520_v58 = vld [vmem:[%s11693_s5 + $0x4f8] sm:$0xff] }
 0x547   : > { %3970 = vmatprep.mubr.f32.mxu1 %v8919_v7  ;;  %7973 = vmatpush1.bf16.msra.mxu1 %v7972_v22  ;;  %v6513_v22 = vld [vmem:[%s11693_s5 + $0x4c0] sm:$0xff]  ;;  %v8006_v11 = vpack.c.bf16 %v6520_v58, %v6518_v15 }
 0x548   : > { %7975 = vmatprep.subr.bf16.mxu1 %v7974_v41  ;;  %v6515_v41 = vld [vmem:[%s11693_s5 + $0x4d0] sm:$0xff] }
 0x549   : > { %v8004_v48 = vpack.c.bf16 %v6515_v41, %v6513_v22 }
 0x54a   : > { %3971 = vmatmul.mubr.f32.gmra.mrb[78].mxu1 %v3822_v38  ;;  %v4063_v38 = vld [vmem:[#allocation2 + $0x33] sm:$0xff] }
 0x54b   : > { %3976 = vmatprep.mubr.f32.mxu1 %v8919_v7  ;;  %7977 = vmatpush1.bf16.msra.mxu1 %v7976_v12  ;;  %v6517_v12 = vld [vmem:[%s11693_s5 + $0x4e0] sm:$0xff] }
 0x54c   : > { %7979 = vmatprep.subr.bf16.mxu1 %v7978_v40  ;;  %v6519_v40 = vld [vmem:[%s11693_s5 + $0x4f0] sm:$0xff] }
 0x54e   : > { %3977 = vmatmul.mubr.f32.gmra.mrb[80].mxu1 %v3823_v13  ;;  %v8008_v13 = vpack.c.bf16 %v6519_v40, %v6517_v12 }
 0x54f   : > { %3982 = vmatprep.mubr.f32.mxu1 %v8919_v7 }
 0x552   : > { %3983 = vmatmul.mubr.f32.gmra.mrb[82].mxu1 %v3824_v14  ;;  %v4064_v14 = vld [vmem:[#allocation2 + $0x3b] sm:$0xff] }
 0x553   : > { %3988 = vmatprep.mubr.f32.mxu1 %v8919_v7 }
 0x556   : > { %3989 = vmatmul.mubr.f32.gmra.mrb[84].mxu1 %v3825_v56  ;;  %v4065_v56 = vld [vmem:[#allocation2 + $0x43] sm:$0xff] }
 0x557   : > { %3994 = vmatprep.mubr.f32.mxu1 %v8919_v7 }
 0x55a   : > { %3995 = vmatmul.mubr.f32.gmra.mrb[86].mxu1 %v3826_v8  ;;  %v4066_v8 = vld [vmem:[#allocation2 + $0x4b] sm:$0xff] }
 0x55b   : > { %4000 = vmatprep.mubr.f32.mxu1 %v8919_v7 }
 0x55e   : > { %4001 = vmatmul.mubr.f32.gmra.mrb[88].mxu1 %v3827_v19  ;;  %v4067_v19 = vld [vmem:[#allocation2 + $0x53] sm:$0xff] }
 0x55f   : > { %4006 = vmatprep.mubr.f32.mxu1 %v8919_v7 }
 0x562   : > { %4007 = vmatmul.mubr.f32.gmra.mrb[90].mxu1 %v3828_v42  ;;  %v4068_v42 = vld [vmem:[#allocation2 + $0x5b] sm:$0xff] }
 0x563   : > { %4012 = vmatprep.mubr.f32.mxu1 %v8919_v7 }
 0x566   : > { %4013 = vmatmul.mubr.f32.gmra.mrb[92].mxu1 %v3829_v10  ;;  %v4069_v10 = vld [vmem:[#allocation2 + $0x63] sm:$0xff] }
 0x567   : > { %4018 = vmatprep.mubr.f32.mxu1 %v8919_v7 }
 0x56a   : > { %4019 = vmatmul.mubr.f32.gmra.mrb[94].mxu1 %v3830_v55  ;;  %v4072_v55 = vld [vmem:[#allocation2 + $0x7b] sm:$0xf] }
 0x56b   : > { %4170 = vmatprep.mubr.f32.mxu1 %v8919_v7 }
 0x56e   : > { %4171 = vmatmul.mubr.f32.vlgmr.msra.gmra.mrb[64].mxu1 %v4057_v23  ;;  %v4305_v23 = vld [vmem:[#allocation2 + $0x34] sm:$0xff] }
 0x56f   : > { %4176 = vmatprep.mubr.f32.mxu1 %v8919_v7  ;;  %7981 = vmatpush1.bf16.msra.mxu1 %v7980_v16  ;;  %v4301_v16 = vld [vmem:[#allocation2 + $0x14] sm:$0xff] }
 0x570   : > { %7983 = vmatprep.subr.bf16.mxu1 %v7982_v49  ;;  %v4302_v49 = vld [vmem:[#allocation2 + $0x1c] sm:$0xff] }
 0x572   : > { %4177 = vmatmul.mubr.f32.gmra.mrb[66].mxu1 %v4058_v39  ;;  %v4312_v39 = vld [vmem:[#allocation2 + $0x6c] sm:$0xff] }
 0x573   : > { %4182 = vmatprep.mubr.f32.mxu1 %v8919_v7  ;;  %7985 = vmatpush1.bf16.msra.mxu1 %v7984_v26  ;;  %v4308_v26 = vld [vmem:[#allocation2 + $0x4c] sm:$0xff] }
 0x574   : > { %7987 = vmatprep.subr.bf16.mxu1 %v7986_v33  ;;  %v4309_v33 = vld [vmem:[#allocation2 + $0x54] sm:$0xff] }
 0x576   : > { %4183 = vmatmul.mubr.f32.gmra.mrb[68].mxu1 %v4059_v50 }
 0x577   : > { %4188 = vmatprep.mubr.f32.mxu1 %v8919_v7  ;;  %7989 = vmatpush1.bf16.msra.mxu1 %v7988_v46  ;;  %v8921_v46 = vmov 0.0|0.0  }
 0x578   : > { %7991 = vmatprep.subr.bf16.mxu1 %v7990_v47  ;;  %8158 = vmatprep.subr.bf16.mxu0 %v8921_v46  ;;  %v4541_v47 = vld [vmem:[%s11694_s6] sm:$0x3] }
 0x579   : > { %v10932_v53 = vrot.slane %v4541_v47, %v2741_v28  ;;  %v10936_v21 = vrot.slane %v4541_v47, %v2745_v30 }
 0x57a   : > { %4189 = vmatmul.mubr.f32.gmra.mrb[70].mxu1 %v4060_v62 }
 0x57b   : > { %4194 = vmatprep.mubr.f32.mxu1 %v8919_v7  ;;  %7993 = vmatpush1.bf16.msra.mxu1 %v7992_v54 }
 0x57c   : > { %7995 = vmatprep.subr.bf16.mxu1 %v7994_v59 }
 0x57e   : > { %4195 = vmatmul.mubr.f32.gmra.mrb[72].mxu1 %v4061_v32 }
 0x57f   : > { %4200 = vmatprep.mubr.f32.mxu1 %v8919_v7  ;;  %7997 = vmatpush1.bf16.msra.mxu1 %v7996_v0 }
 0x580   : > { %7999 = vmatprep.subr.bf16.mxu1 %v7998_v25 }
 0x582   : > { %4201 = vmatmul.mubr.f32.gmra.mrb[74].mxu1 %v4062_v60 }
 0x583   : > { %4206 = vmatprep.mubr.f32.mxu1 %v8919_v7  ;;  %8001 = vmatpush1.bf16.msra.mxu1 %v8000_v34 }
 0x584   : > { %8003 = vmatprep.subr.bf16.mxu1 %v8002_v6 }
 0x586   : > { %4207 = vmatmul.mubr.f32.gmra.mrb[76].mxu1 %v4063_v38 }
 0x587   : > { %4212 = vmatprep.mubr.f32.mxu1 %v8919_v7  ;;  %8005 = vmatpush1.bf16.msra.mxu1 %v8004_v48 }
 0x588   : > { %8007 = vmatprep.subr.bf16.mxu1 %v8006_v11 }
 0x58a   : > { %4213 = vmatmul.mubr.f32.gmra.mrb[78].mxu1 %v4064_v14 }
 0x58b   : > { %4218 = vmatprep.mubr.f32.mxu1 %v8919_v7  ;;  %8009 = vmatpush1.bf16.msra.mxu1 %v8008_v13 }
 0x58c   : > { %8010 = vmatprep.subr.bf16.mxu1 %v8921_v46 }
 0x58e   : > { %4219 = vmatmul.mubr.f32.gmra.mrb[80].mxu1 %v4065_v56 }
 0x58f   : > { %4224 = vmatprep.mubr.f32.mxu1 %v8919_v7 }
 0x592   : > { %4225 = vmatmul.mubr.f32.gmra.mrb[82].mxu1 %v4066_v8 }
 0x593   : > { %4230 = vmatprep.mubr.f32.mxu1 %v8919_v7 }
 0x596   : > { %4231 = vmatmul.mubr.f32.gmra.mrb[84].mxu1 %v4067_v19 }
 0x597   : > { %4236 = vmatprep.mubr.f32.mxu1 %v8919_v7 }
 0x59a   : > { %4237 = vmatmul.mubr.f32.gmra.mrb[86].mxu1 %v4068_v42 }
 0x59b   : > { %4242 = vmatprep.mubr.f32.mxu1 %v8919_v7 }
 0x59e   : > { %4243 = vmatmul.mubr.f32.gmra.mrb[88].mxu1 %v4069_v10 }
 0x59f   : > { %4248 = vmatprep.mubr.f32.mxu1 %v8919_v7 }
 0x5a2   : > { %4249 = vmatmul.mubr.f32.gmra.mrb[90].mxu1 %v4070_v63 }
 0x5a3   : > { %4254 = vmatprep.mubr.f32.mxu1 %v8919_v7 }
 0x5a6   : > { %4255 = vmatmul.mubr.f32.gmra.mrb[92].mxu1 %v4071_v29 }
 0x5a7   : > { %4260 = vmatprep.mubr.f32.mxu1 %v8919_v7 }
 0x5aa   : > { %4261 = vmatmul.mubr.f32.gmra.mrb[94].mxu1 %v4072_v55 }
 0x5ab   : > { %4412 = vmatprep.mubr.f32.mxu1 %v8919_v7 }
 0x5ae   : > { %4413 = vmatmul.mubr.f32.vlgmr.msra.gmra.mrb[64].mxu1 %v4299_v37 }
 0x5af   : > { %4418 = vmatprep.mubr.f32.mxu1 %v8919_v7 }
 0x5b2   : > { %4419 = vmatmul.mubr.f32.gmra.mrb[66].mxu1 %v4300_v45 }
 0x5b3   : > { %4424 = vmatprep.mubr.f32.mxu1 %v8919_v7 }
 0x5b6   : > { %4425 = vmatmul.mubr.f32.gmra.mrb[68].mxu1 %v4301_v16 }
 0x5b7   : > { %4430 = vmatprep.mubr.f32.mxu1 %v8919_v7 }
 0x5ba   : > { %4431 = vmatmul.mubr.f32.gmra.mrb[70].mxu1 %v4302_v49 }
 0x5bb   : > { %4436 = vmatprep.mubr.f32.mxu1 %v8919_v7 }
 0x5be   : > { %4437 = vmatmul.mubr.f32.gmra.mrb[72].mxu1 %v4303_v18 }
 0x5bf   : > { %4442 = vmatprep.mubr.f32.mxu1 %v8919_v7 }
 0x5c2   : > { %4443 = vmatmul.mubr.f32.gmra.mrb[74].mxu1 %v4304_v20 }
 0x5c3   : > { %4448 = vmatprep.mubr.f32.mxu1 %v8919_v7 }
 0x5c6   : > { %4449 = vmatmul.mubr.f32.gmra.mrb[76].mxu1 %v4305_v23 }
 0x5c7   : > { %4454 = vmatprep.mubr.f32.mxu1 %v8919_v7 }
 0x5ca   : > { %4455 = vmatmul.mubr.f32.gmra.mrb[78].mxu1 %v4306_v24 }
 0x5cb   : > { %4460 = vmatprep.mubr.f32.mxu1 %v8919_v7 }
 0x5ce   : > { %4461 = vmatmul.mubr.f32.gmra.mrb[80].mxu1 %v4307_v17 }
 0x5cf   : > { %4466 = vmatprep.mubr.f32.mxu1 %v8919_v7 }
 0x5d2   : > { %4467 = vmatmul.mubr.f32.gmra.mrb[82].mxu1 %v4308_v26 }
 0x5d3   : > { %4472 = vmatprep.mubr.f32.mxu1 %v8919_v7 }
 0x5d6   : > { %4473 = vmatmul.mubr.f32.gmra.mrb[84].mxu1 %v4309_v33 }
 0x5d7   : > { %4478 = vmatprep.mubr.f32.mxu1 %v8919_v7 }
 0x5da   : > { %4479 = vmatmul.mubr.f32.gmra.mrb[86].mxu1 %v4310_v35 }
 0x5db   : > { %4484 = vmatprep.mubr.f32.mxu1 %v8919_v7 }
 0x5de   : > { %4485 = vmatmul.mubr.f32.gmra.mrb[88].mxu1 %v4311_v36 }
 0x5df   : > { %4490 = vmatprep.mubr.f32.mxu1 %v8919_v7 }
 0x5e2   : > { %4491 = vmatmul.mubr.f32.gmra.mrb[90].mxu1 %v4312_v39 }
 0x5e3   : > { %4496 = vmatprep.mubr.f32.mxu1 %v8919_v7 }
 0x5e6   : > { %4497 = vmatmul.mubr.f32.gmra.mrb[92].mxu1 %v4313_v43 }
 0x5e7   : > { %4502 = vmatprep.mubr.f32.mxu1 %v8919_v7 }
 0x5ea   : > { %4503 = vmatmul.mubr.f32.gmra.mrb[94].mxu1 %v4314_v44 }
 0x5eb   : > { %7101 = vmatprep.mubr.msk.f32.mxu1 %vm8922_vm5, %v8919_v7 }
 0x681   : > { %v4414_v50 = vpop.f32.mrb[64].mxu1 }
 0x682   : > { %v4553_v51 = vadd.f32 %v10932_v53, %v4414_v50  ;;  %v4416_v52 = vpop.f32.mrb[65].mxu1 }
 0x683   : > { %v4554_v54 = vadd.f32 %v10936_v21, %v4416_v52 }
 0x684   : > { %v4585_v59 = vmax.f32 %v4553_v51, 0.0 }
 0x685   : > { %v4586_v57 = vmax.f32 %v4554_v54, 0.0  ;;  %v4420_v61 = vpop.f32.mrb[66].mxu1 }
 0x686   : > { %v4555_v62 = vadd.f32 %v10932_v53, %v4420_v61  ;;  %v4422_v2 = vpop.f32.mrb[67].mxu1 }
 0x687   : > { %v4617_v3 = vmax.f32 %v4585_v59, %v4586_v57  ;;  %v4556_v28 = vadd.f32 %v10936_v21, %v4422_v2 }
 0x688   : > { %v4587_v0 = vmax.f32 %v4555_v62, 0.0 }
 0x689   : > { %v4588_v25 = vmax.f32 %v4556_v28, 0.0  ;;  %v4426_v27 = vpop.f32.mrb[68].mxu1 }
 0x68a   : > { %v4557_v30 = vadd.f32 %v10932_v53, %v4426_v27  ;;  %v4428_v5 = vpop.f32.mrb[69].mxu1 }
 0x68b   : > { %v4618_v31 = vmax.f32 %v4587_v0, %v4588_v25  ;;  %v4558_v32 = vadd.f32 %v10936_v21, %v4428_v5 }
 0x68c   : > { %v4589_v9 = vmax.f32 %v4557_v30, 0.0 }
 0x68d   : > { %v10944_v1 = vpack.c.bf16 %v4618_v31, %v4617_v3  ;;  %v4590_v34 = vmax.f32 %v4558_v32, 0.0  ;;  %v4432_v6 = vpop.f32.mrb[70].mxu1 }
 0x68e   : > { %v4559_v22 = vadd.f32 %v10932_v53, %v4432_v6  ;;  %v4434_v41 = vpop.f32.mrb[71].mxu1 }
 0x68f   : > { %v4619_v60 = vmax.f32 %v4589_v9, %v4590_v34  ;;  %v4560_v15 = vadd.f32 %v10936_v21, %v4434_v41  ;;  %8012 = vmatpush3.bf16.msra.mxu1 %v10944_v1  ;;  %8160 = vmatpush3.bf16.msra.mxu0 %v10944_v1 }
 0x690   : > { %v4591_v58 = vmax.f32 %v4559_v22, 0.0  ;;  %8013 = vmatprep.subr.bf16.mxu1 %v8921_v46  ;;  %8161 = vmatprep.subr.bf16.mxu0 %v8921_v46 }
 0x691   : > { %v4592_v48 = vmax.f32 %v4560_v15, 0.0  ;;  %v4438_v11 = vpop.f32.mrb[72].mxu1 }
 0x692   : > { %v4561_v12 = vadd.f32 %v10932_v53, %v4438_v11  ;;  %v4440_v40 = vpop.f32.mrb[73].mxu1 }
 0x693   : > { %v4620_v38 = vmax.f32 %v4591_v58, %v4592_v48  ;;  %v4562_v13 = vadd.f32 %v10936_v21, %v4440_v40 }
 0x694   : > { %v4593_v14 = vmax.f32 %v4561_v12, 0.0 }
 0x695   : > { %v10954_v56 = vpack.c.bf16 %v4620_v38, %v4619_v60  ;;  %v4594_v8 = vmax.f32 %v4562_v13, 0.0  ;;  %v4444_v19 = vpop.f32.mrb[74].mxu1 }
 0x696   : > { %v4563_v42 = vadd.f32 %v10932_v53, %v4444_v19  ;;  %v4446_v10 = vpop.f32.mrb[75].mxu1 }
 0x697   : > { %v4621_v63 = vmax.f32 %v4593_v14, %v4594_v8  ;;  %v4564_v29 = vadd.f32 %v10936_v21, %v4446_v10  ;;  %8015 = vmatpush3.bf16.msra.mxu1 %v10954_v56  ;;  %8163 = vmatpush3.bf16.msra.mxu0 %v10954_v56 }
 0x698   : > { %v4595_v55 = vmax.f32 %v4563_v42, 0.0  ;;  %8016 = vmatprep.subr.bf16.mxu1 %v8921_v46  ;;  %8164 = vmatprep.subr.bf16.mxu0 %v8921_v46 }
 0x699   : > { %v4596_v37 = vmax.f32 %v4564_v29, 0.0  ;;  %v4450_v45 = vpop.f32.mrb[76].mxu1 }
 0x69a   : > { %v4565_v16 = vadd.f32 %v10932_v53, %v4450_v45  ;;  %v4452_v49 = vpop.f32.mrb[77].mxu1 }
 0x69b   : > { %v4622_v18 = vmax.f32 %v4595_v55, %v4596_v37  ;;  %v4566_v20 = vadd.f32 %v10936_v21, %v4452_v49 }
 0x69c   : > { %v4597_v23 = vmax.f32 %v4565_v16, 0.0 }
 0x69d   : > { %v10964_v24 = vpack.c.bf16 %v4622_v18, %v4621_v63  ;;  %v4598_v17 = vmax.f32 %v4566_v20, 0.0  ;;  %v4456_v26 = vpop.f32.mrb[78].mxu1 }
 0x69e   : > { %v4567_v33 = vadd.f32 %v10932_v53, %v4456_v26  ;;  %v4458_v35 = vpop.f32.mrb[79].mxu1 }
 0x69f   : > { %v4623_v36 = vmax.f32 %v4597_v23, %v4598_v17  ;;  %v4568_v39 = vadd.f32 %v10936_v21, %v4458_v35  ;;  %8018 = vmatpush3.bf16.msra.mxu1 %v10964_v24  ;;  %8166 = vmatpush3.bf16.msra.mxu0 %v10964_v24 }
 0x6a0   : > { %v4599_v43 = vmax.f32 %v4567_v33, 0.0  ;;  %8019 = vmatprep.subr.bf16.mxu1 %v8921_v46  ;;  %8167 = vmatprep.subr.bf16.mxu0 %v8921_v46 }
 0x6a1   : > { %v4600_v44 = vmax.f32 %v4568_v39, 0.0  ;;  %v4462_v47 = vpop.f32.mrb[80].mxu1 }
 0x6a2   : > { %v4569_v50 = vadd.f32 %v10932_v53, %v4462_v47  ;;  %v4464_v51 = vpop.f32.mrb[81].mxu1 }
 0x6a3   : > { %v4624_v52 = vmax.f32 %v4599_v43, %v4600_v44  ;;  %v4570_v54 = vadd.f32 %v10936_v21, %v4464_v51 }
 0x6a4   : > { %v4601_v59 = vmax.f32 %v4569_v50, 0.0 }
 0x6a5   : > { %v10974_v57 = vpack.c.bf16 %v4624_v52, %v4623_v36  ;;  %v4602_v61 = vmax.f32 %v4570_v54, 0.0  ;;  %v4468_v62 = vpop.f32.mrb[82].mxu1 }
 0x6a6   : > { %v4571_v2 = vadd.f32 %v10932_v53, %v4468_v62  ;;  %v4470_v3 = vpop.f32.mrb[83].mxu1  ;;  %v6528_v62 = vld [vmem:[%s11696_s8 + $0x8] sm:$0xff] }
 0x6a7   : > { %v4625_v28 = vmax.f32 %v4601_v59, %v4602_v61  ;;  %v4572_v0 = vadd.f32 %v10936_v21, %v4470_v3  ;;  %8021 = vmatpush3.bf16.msra.mxu1 %v10974_v57  ;;  %8169 = vmatpush3.bf16.msra.mxu0 %v10974_v57  ;;  %v6525_v61 = vld [vmem:[%s11695_s7 + $0x8] sm:$0xff] }
 0x6a8   : > { %v4603_v25 = vmax.f32 %v4571_v2, 0.0  ;;  %8022 = vmatprep.subr.bf16.mxu1 %v8921_v46  ;;  %8170 = vmatprep.subr.bf16.mxu0 %v8921_v46  ;;  %v6531_v2 = vld [vmem:[%s11697_s9 + $0x80] sm:$0xff]  ;;  %v6532_v3 = vld [vmem:[%s11697_s9 + $0x88] sm:$0xff] }
 0x6a9   : > { %v4604_v27 = vmax.f32 %v4572_v0, 0.0  ;;  %v4474_v30 = vpop.f32.mrb[84].mxu1  ;;  %v6533_v0 = vld [vmem:[%s11697_s9 + $0x90] sm:$0xff] }
 0x6aa   : > { %v4573_v5 = vadd.f32 %v10932_v53, %v4474_v30  ;;  %v4476_v31 = vpop.f32.mrb[85].mxu1 }
 0x6ab   : > { %v4626_v32 = vmax.f32 %v4603_v25, %v4604_v27  ;;  %v4574_v9 = vadd.f32 %v10936_v21, %v4476_v31  ;;  %v6534_v25 = vld [vmem:[%s11697_s9 + $0x98] sm:$0xff]  ;;  %v6535_v27 = vld [vmem:[%s11697_s9 + $0xa0] sm:$0xff] }
 0x6ac   : > { %v4605_v34 = vmax.f32 %v4573_v5, 0.0  ;;  %v8114_v30 = vpack.c.bf16 %v6534_v25, %v6533_v0  ;;  %v6536_v5 = vld [vmem:[%s11697_s9 + $0xa8] sm:$0xff]  ;;  %v4799_v0 = vld [vmem:[%s11697_s9 + $0x70] sm:$0xff]  ;;  %v4800_v25 = vld [vmem:[%s11697_s9 + $0x78] sm:$0xff] }
 0x6ad   : > { %v10984_v6 = vpack.c.bf16 %v4626_v32, %v4625_v28  ;;  %v4606_v22 = vmax.f32 %v4574_v9, 0.0  ;;  %v4480_v41 = vpop.f32.mrb[86].mxu1  ;;  %v8111_v28 = vpack.c.bf16 %v6532_v3, %v6531_v2  ;;  %v8117_v31 = vpack.c.bf16 %v6536_v5, %v6535_v27  ;;  %v6537_v32 = vld [vmem:[%s11697_s9 + $0xb0] sm:$0xff]  ;;  %v6538_v9 = vld [vmem:[%s11697_s9 + $0xb8] sm:$0xff]  ;;  %v4797_v2 = vld [vmem:[%s11697_s9 + $0x60] sm:$0xff] }
 0x6ae   : > { %v4575_v60 = vadd.f32 %v10932_v53, %v4480_v41  ;;  %v4482_v15 = vpop.f32.mrb[87].mxu1  ;;  %v6540_v41 = vld [vmem:[%s11697_s9 + $0xc8] sm:$0xff]  ;;  %v8156_v27 = vpack.c.bf16 %v4800_v25, %v4799_v0  ;;  %v6553_v5 = vld [vmem:[%s11697_s9 + $0x100] sm:$0xff] }
 0x6af   : > { %v4627_v58 = vmax.f32 %v4605_v34, %v4606_v22  ;;  %v4576_v48 = vadd.f32 %v10936_v21, %v4482_v15  ;;  %8024 = vmatpush3.bf16.msra.mxu1 %v10984_v6  ;;  %8172 = vmatpush3.bf16.msra.mxu0 %v10984_v6  ;;  %v8120_v34 = vpack.c.bf16 %v6538_v9, %v6537_v32  ;;  %v6539_v22 = vld [vmem:[%s11697_s9 + $0xc0] sm:$0xff]  ;;  %v6541_v15 = vld [vmem:[%s11697_s9 + $0xd0] sm:$0xff]  ;;  %v4798_v3 = vld [vmem:[%s11697_s9 + $0x68] sm:$0xff] }
 0x6b0   : > { %v4607_v11 = vmax.f32 %v4575_v60, 0.0  ;;  %8025 = vmatprep.subr.bf16.mxu1 %v8921_v46  ;;  %8173 = vmatprep.subr.bf16.mxu0 %v8921_v46  ;;  %v8123_v60 = vpack.c.bf16 %v6540_v41, %v6539_v22  ;;  %v6555_v32 = vld [vmem:[%s11697_s9 + $0x110] sm:$0xff]  ;;  %v6557_v41 = vld [vmem:[%s11697_s9 + $0x120] sm:$0xff]  ;;  %v6584_v0 = vld [vmem:[%s11697_s9 + $0x1c8] sm:$0xff] }
 0x6b1   : > { %v4608_v12 = vmax.f32 %v4576_v48, 0.0  ;;  %v4486_v40 = vpop.f32.mrb[88].mxu1 }
 0x6b2   : > { %v4577_v38 = vadd.f32 %v10932_v53, %v4486_v40  ;;  %v4488_v13 = vpop.f32.mrb[89].mxu1 }
 0x6b3   : > { %v4628_v14 = vmax.f32 %v4607_v11, %v4608_v12  ;;  %v4578_v8 = vadd.f32 %v10936_v21, %v4488_v13  ;;  %v6543_v11 = vld [vmem:[%s11697_s9 + $0xe0] sm:$0xff]  ;;  %v6544_v12 = vld [vmem:[%s11697_s9 + $0xe8] sm:$0xff]  ;;  %v6546_v13 = vld [vmem:[%s11697_s9 + $0xf8] sm:$0xff] }
 0x6b4   : > { %v4609_v19 = vmax.f32 %v4577_v38, 0.0  ;;  %v8129_v40 = vpack.c.bf16 %v6544_v12, %v6543_v11  ;;  %v6545_v38 = vld [vmem:[%s11697_s9 + $0xf0] sm:$0xff]  ;;  %v6561_v12 = vld [vmem:[%s11697_s9 + $0x140] sm:$0xff] }
 0x6b5   : > { %v10994_v42 = vpack.c.bf16 %v4628_v14, %v4627_v58  ;;  %v4610_v10 = vmax.f32 %v4578_v8, 0.0  ;;  %v4492_v63 = vpop.f32.mrb[90].mxu1  ;;  %v6542_v58 = vld [vmem:[%s11697_s9 + $0xd8] sm:$0xff]  ;;  %v8132_v14 = vpack.c.bf16 %v6546_v13, %v6545_v38  ;;  %v6563_v13 = vld [vmem:[%s11697_s9 + $0x150] sm:$0xff] }
 0x6b6   : > { %v4579_v29 = vadd.f32 %v10932_v53, %v4492_v63  ;;  %v4494_v55 = vpop.f32.mrb[91].mxu1  ;;  %v8126_v48 = vpack.c.bf16 %v6542_v58, %v6541_v15  ;;  %v6547_v63 = vld [vmem:[%s11695_s7 + $0x10] sm:$0xff] }
 0x6b7   : > { %v4629_v37 = vmax.f32 %v4609_v19, %v4610_v10  ;;  %v4580_v45 = vadd.f32 %v10936_v21, %v4494_v55  ;;  %8027 = vmatpush3.bf16.msra.mxu1 %v10994_v42  ;;  %8175 = vmatpush3.bf16.msra.mxu0 %v10994_v42  ;;  %v6559_v58 = vld [vmem:[%s11697_s9 + $0x130] sm:$0xff] }
 0x6b8   : > { %v4611_v16 = vmax.f32 %v4579_v29, 0.0  ;;  %8028 = vmatprep.subr.bf16.mxu1 %v8921_v46  ;;  %8176 = vmatprep.subr.bf16.mxu0 %v8921_v46 }
 0x6b9   : > { %v4612_v49 = vmax.f32 %v4580_v45, 0.0  ;;  %v4498_v18 = vpop.f32.mrb[92].mxu1 }
 0x6ba   : > { %v4581_v20 = vadd.f32 %v10932_v53, %v4498_v18  ;;  %v4500_v23 = vpop.f32.mrb[93].mxu1 }
 0x6bb   : > { %v4630_v17 = vmax.f32 %v4611_v16, %v4612_v49  ;;  %v4582_v26 = vadd.f32 %v10936_v21, %v4500_v23  ;;  %v4785_v16 = vld [vmem:[%s11697_s9] sm:$0xff]  ;;  %v4786_v49 = vld [vmem:[%s11697_s9 + $0x8] sm:$0xff] }
 0x6bc   : > { %v4613_v33 = vmax.f32 %v4581_v20, 0.0  ;;  %v8135_v20 = vpack.c.bf16 %v4786_v49, %v4785_v16  ;;  %v6569_v49 = vld [vmem:[%s11695_s7 + $0x18] sm:$0xff] }
 0x6bd   : > { %v11004_v35 = vpack.c.bf16 %v4630_v17, %v4629_v37  ;;  %v4614_v36 = vmax.f32 %v4582_v26, 0.0  ;;  %v4504_v39 = vpop.f32.mrb[94].mxu1  ;;  %v4787_v26 = vld [vmem:[%s11697_s9 + $0x10] sm:$0xff] }
 0x6be   : > { %v4583_v43 = vadd.f32 %v10932_v53, %v4504_v39  ;;  %v4506_v44 = vpop.f32.mrb[95].mxu1  ;;  %v4633_v53 = vld [vmem:[%s11695_s7] sm:$0xff] }
 0x6bf   : > { %v4631_v47 = vmax.f32 %v4613_v33, %v4614_v36  ;;  %v4584_v50 = vadd.f32 %v10936_v21, %v4506_v44  ;;  %8030 = vmatpush3.bf16.msra.mxu1 %v11004_v35  ;;  %8178 = vmatpush3.bf16.msra.mxu0 %v11004_v35  ;;  %v4710_v21 = vld [vmem:[%s11696_s8] sm:$0xff]  ;;  %v4788_v33 = vld [vmem:[%s11697_s9 + $0x18] sm:$0xff] }
 0x6c0   : > { %v4615_v51 = vmax.f32 %v4583_v43, 0.0  ;;  %8031 = vmatprep.subr.bf16.mxu1 %v8921_v46  ;;  %8179 = vmatprep.subr.bf16.mxu0 %v8921_v46  ;;  %v8138_v36 = vpack.c.bf16 %v4788_v33, %v4787_v26  ;;  %v4789_v39 = vld [vmem:[%s11697_s9 + $0x20] sm:$0xff]  ;;  %v4790_v43 = vld [vmem:[%s11697_s9 + $0x28] sm:$0xff] }
 0x6c1   : > { %v4616_v52 = vmax.f32 %v4584_v50, 0.0  ;;  %v8141_v44 = vpack.c.bf16 %v4790_v43, %v4789_v39  ;;  %v4792_v50 = vld [vmem:[%s11697_s9 + $0x38] sm:$0xff] }
 0x6c2   : > { %v6572_v43 = vld [vmem:[%s11696_s8 + $0x18] sm:$0xff] }
 0x6c3   : > { %v4632_v54 = vmax.f32 %v4615_v51, %v4616_v52  ;;  %v4793_v52 = vld [vmem:[%s11697_s9 + $0x40] sm:$0xff] }
 0x6c5   : > { %v11012_v59 = vpack.c.bf16 %v4632_v54, %v4631_v47  ;;  %v4791_v47 = vld [vmem:[%s11697_s9 + $0x30] sm:$0xff]  ;;  %v4794_v54 = vld [vmem:[%s11697_s9 + $0x48] sm:$0xff] }
 0x6c6   : > { %v8144_v51 = vpack.c.bf16 %v4792_v50, %v4791_v47  ;;  %v6576_v47 = vld [vmem:[%s11697_s9 + $0x188] sm:$0xff]  ;;  %v6577_v50 = vld [vmem:[%s11697_s9 + $0x190] sm:$0xff] }
 0x6c7   : > { %8034 = vmatpush3.bf16.msk.msra.mxu1 %vm10022_vm4, %v11012_v59  ;;  %8182 = vmatpush3.bf16.msk.msra.mxu0 %vm10022_vm4, %v11012_v59 }
 0x6c8   : > { %8035 = vmatprep.subr.bf16.mxu1 %v8921_v46  ;;  %8208 = vmatprep.subr.bf16.mxu0 %v8921_v46 }
 0x6ca   : > { %7102 = vmatmul.mubr.msk.f32.vlgmr.msra.gmra.mrb[96].mxu1 %vm2941_vm1, %v4633_v53  ;;  %7312 = vmatmul.mubr.msk.f32.vlgmr.msra.gmra.mrb[64].mxu0 %vm2941_vm1, %v6547_v63  ;;  %v8147_v53 = vpack.c.bf16 %v4794_v54, %v4793_v52  ;;  %v6578_v52 = vld [vmem:[%s11697_s9 + $0x198] sm:$0xff] }
 0x6cb   : > { %8037 = vmatpush3.bf16.msra.mxu1 %v10944_v1  ;;  %7136 = vmatprep.mubr.msk.f32.mxu1 %vm8922_vm5, %v8919_v7  ;;  %v8286_v54 = vpack.c.bf16 %v6578_v52, %v6577_v50  ;;  %v5838_v50 = vld [vmem:[%s11699_s11 + $0x18] sm:$0xff]  ;;  %v5839_v52 = vld [vmem:[%s11699_s11 + $0x20] sm:$0xff] }
 0x6cc   : > { %8038 = vmatprep.subr.bf16.mxu1 %v8921_v46  ;;  %7381 = vmatprep.mubr.msk.f32.mxu0 %vm8922_vm5, %v8919_v7 }
 0x6cf   : > { %8040 = vmatpush3.bf16.msra.mxu1 %v10954_v56 }
 0x6d0   : > { %8041 = vmatprep.subr.bf16.mxu1 %v8921_v46 }
 0x6d3   : > { %8043 = vmatpush3.bf16.msra.mxu1 %v10964_v24 }
 0x6d4   : > { %8044 = vmatprep.subr.bf16.mxu1 %v8921_v46 }
 0x6d7   : > { %8046 = vmatpush3.bf16.msra.mxu1 %v10974_v57 }
 0x6d8   : > { %8047 = vmatprep.subr.bf16.mxu1 %v8921_v46 }
 0x6db   : > { %8049 = vmatpush3.bf16.msra.mxu1 %v10984_v6 }
 0x6dc   : > { %8050 = vmatprep.subr.bf16.mxu1 %v8921_v46 }
 0x6df   : > { %8052 = vmatpush3.bf16.msra.mxu1 %v10994_v42 }
 0x6e0   : > { %8053 = vmatprep.subr.bf16.mxu1 %v8921_v46 }
 0x6e3   : > { %8055 = vmatpush3.bf16.msra.mxu1 %v11004_v35 }
 0x6e4   : > { %8056 = vmatprep.subr.bf16.mxu1 %v8921_v46 }
 0x6e7   : > { %8059 = vmatpush3.bf16.msk.msra.mxu1 %vm10022_vm4, %v11012_v59 }
 0x6e8   : > { %8060 = vmatprep.subr.bf16.mxu1 %v8921_v46 }
 0x6ea   : > { %7137 = vmatmul.mubr.msk.f32.vlgmr.msra.gmra.mrb[98].mxu1 %vm2941_vm1, %v4710_v21  ;;  %v4795_v21 = vld [vmem:[%s11697_s9 + $0x50] sm:$0xff] }
 0x6eb   : > { %8062 = vmatpush3.bf16.msra.mxu1 %v10944_v1  ;;  %7171 = vmatprep.mubr.msk.f32.mxu1 %vm8922_vm5, %v8919_v7 }
 0x6ec   : > { %8063 = vmatprep.subr.bf16.mxu1 %v8921_v46 }
 0x6ef   : > { %8065 = vmatpush3.bf16.msra.mxu1 %v10954_v56 }
 0x6f0   : > { %8066 = vmatprep.subr.bf16.mxu1 %v8921_v46 }
 0x6f3   : > { %8068 = vmatpush3.bf16.msra.mxu1 %v10964_v24 }
 0x6f4   : > { %8069 = vmatprep.subr.bf16.mxu1 %v8921_v46 }
 0x6f7   : > { %8071 = vmatpush3.bf16.msra.mxu1 %v10974_v57 }
 0x6f8   : > { %8072 = vmatprep.subr.bf16.mxu1 %v8921_v46 }
 0x6fb   : > { %8074 = vmatpush3.bf16.msra.mxu1 %v10984_v6 }
 0x6fc   : > { %8075 = vmatprep.subr.bf16.mxu1 %v8921_v46 }
 0x6ff   : > { %8077 = vmatpush3.bf16.msra.mxu1 %v10994_v42 }
 0x700   : > { %8078 = vmatprep.subr.bf16.mxu1 %v8921_v46 }
 0x703   : > { %8080 = vmatpush3.bf16.msra.mxu1 %v11004_v35 }
 0x704   : > { %8081 = vmatprep.subr.bf16.mxu1 %v8921_v46 }
 0x707   : > { %8084 = vmatpush3.bf16.msk.msra.mxu1 %vm10022_vm4, %v11012_v59 }
 0x708   : > { %8085 = vmatprep.subr.bf16.mxu1 %v8921_v46 }
 0x70a   : > { %7172 = vmatmul.mubr.msk.f32.vlgmr.msra.gmra.mrb[100].mxu1 %vm2941_vm1, %v6525_v61  ;;  %v4796_v61 = vld [vmem:[%s11697_s9 + $0x58] sm:$0xff] }
 0x70b   : > { %8087 = vmatpush3.bf16.msra.mxu1 %v10944_v1  ;;  %7206 = vmatprep.mubr.msk.f32.mxu1 %vm8922_vm5, %v8919_v7 }
 0x70c   : > { %8088 = vmatprep.subr.bf16.mxu1 %v8921_v46 }
 0x70f   : > { %8090 = vmatpush3.bf16.msra.mxu1 %v10954_v56 }
 0x710   : > { %8091 = vmatprep.subr.bf16.mxu1 %v8921_v46 }
 0x713   : > { %8093 = vmatpush3.bf16.msra.mxu1 %v10964_v24 }
 0x714   : > { %8094 = vmatprep.subr.bf16.mxu1 %v8921_v46 }
 0x717   : > { %8096 = vmatpush3.bf16.msra.mxu1 %v10974_v57 }
 0x718   : > { %8097 = vmatprep.subr.bf16.mxu1 %v8921_v46 }
 0x71b   : > { %8099 = vmatpush3.bf16.msra.mxu1 %v10984_v6 }
 0x71c   : > { %8100 = vmatprep.subr.bf16.mxu1 %v8921_v46 }
 0x71f   : > { %8102 = vmatpush3.bf16.msra.mxu1 %v10994_v42 }
 0x720   : > { %8103 = vmatprep.subr.bf16.mxu1 %v8921_v46 }
 0x723   : > { %8105 = vmatpush3.bf16.msra.mxu1 %v11004_v35 }
 0x724   : > { %8106 = vmatprep.subr.bf16.mxu1 %v8921_v46 }
 0x727   : > { %8109 = vmatpush3.bf16.msk.msra.mxu1 %vm10022_vm4, %v11012_v59 }
 0x728   : > { %8110 = vmatprep.subr.bf16.mxu1 %v8921_v46 }
 0x72a   : > { %7207 = vmatmul.mubr.msk.f32.vlgmr.msra.gmra.mrb[102].mxu1 %vm2941_vm1, %v6528_v62  ;;  %v8150_v62 = vpack.c.bf16 %v4796_v61, %v4795_v21  ;;  %v6580_v21 = vld [vmem:[%s11697_s9 + $0x1a8] sm:$0xff] }
 0x72b   : > { %7241 = vmatprep.mubr.msk.f32.mxu1 %vm8922_vm5, %v8919_v7  ;;  %8112 = vmatpush3.bf16.msra.mxu1 %v8111_v28  ;;  %v8153_v28 = vpack.c.bf16 %v4798_v3, %v4797_v2  ;;  %v6582_v2 = vld [vmem:[%s11697_s9 + $0x1b8] sm:$0xff] }
 0x72c   : > { %8113 = vmatprep.subr.bf16.mxu1 %v8921_v46 }
 0x72f   : > { %8115 = vmatpush3.bf16.msra.mxu1 %v8114_v30  ;;  %v6550_v30 = vld [vmem:[%s11696_s8 + $0x10] sm:$0xff] }
 0x730   : > { %8116 = vmatprep.subr.bf16.mxu1 %v8921_v46 }
 0x733   : > { %8118 = vmatpush3.bf16.msra.mxu1 %v8117_v31  ;;  %v6554_v31 = vld [vmem:[%s11697_s9 + $0x108] sm:$0xff] }
 0x734   : > { %8119 = vmatprep.subr.bf16.mxu1 %v8921_v46  ;;  %v8209_v9 = vpack.c.bf16 %v6554_v31, %v6553_v5  ;;  %v6587_v31 = vld [vmem:[%s11697_s9 + $0x1e0] sm:$0xff] }
 0x736   : > { %8210 = vmatpush3.bf16.msra.mxu0 %v8209_v9 }
 0x737   : > { %8121 = vmatpush3.bf16.msra.mxu1 %v8120_v34  ;;  %v6556_v34 = vld [vmem:[%s11697_s9 + $0x118] sm:$0xff]  ;;  %8211 = vmatprep.subr.bf16.mxu0 %v8921_v46 }
 0x738   : > { %8122 = vmatprep.subr.bf16.mxu1 %v8921_v46  ;;  %v8212_v22 = vpack.c.bf16 %v6556_v34, %v6555_v32  ;;  %v6588_v32 = vld [vmem:[%s11697_s9 + $0x1e8] sm:$0xff]  ;;  %v6589_v34 = vld [vmem:[%s11697_s9 + $0x1f0] sm:$0xff] }
 0x739   : > { %v8301_v9 = vpack.c.bf16 %v6588_v32, %v6587_v31 }
 0x73a   : > { %8213 = vmatpush3.bf16.msra.mxu0 %v8212_v22  ;;  %v6590_v22 = vld [vmem:[%s11697_s9 + $0x1f8] sm:$0xff] }
 0x73b   : > { %8124 = vmatpush3.bf16.msra.mxu1 %v8123_v60  ;;  %v6558_v60 = vld [vmem:[%s11697_s9 + $0x128] sm:$0xff]  ;;  %8214 = vmatprep.subr.bf16.mxu0 %v8921_v46 }
 0x73c   : > { %8125 = vmatprep.subr.bf16.mxu1 %v8921_v46  ;;  %v8215_v15 = vpack.c.bf16 %v6558_v60, %v6557_v41  ;;  %v8304_v41 = vpack.c.bf16 %v6590_v22, %v6589_v34  ;;  %v5847_v22 = vld [vmem:[%s11699_s11 + $0x60] sm:$0xff] }
 0x73e   : > { %8216 = vmatpush3.bf16.msra.mxu0 %v8215_v15 }
 0x73f   : > { %8127 = vmatpush3.bf16.msra.mxu1 %v8126_v48  ;;  %v6560_v48 = vld [vmem:[%s11697_s9 + $0x138] sm:$0xff]  ;;  %8217 = vmatprep.subr.bf16.mxu0 %v8921_v46 }
 0x740   : > { %8128 = vmatprep.subr.bf16.mxu1 %v8921_v46  ;;  %v8218_v11 = vpack.c.bf16 %v6560_v48, %v6559_v58  ;;  %v6591_v58 = vld [vmem:[%s11695_s7 + $0x20] sm:$0xff] }
 0x742   : > { %8219 = vmatpush3.bf16.msra.mxu0 %v8218_v11 }
 0x743   : > { %8130 = vmatpush3.bf16.msra.mxu1 %v8129_v40  ;;  %v6562_v40 = vld [vmem:[%s11697_s9 + $0x148] sm:$0xff]  ;;  %8220 = vmatprep.subr.bf16.mxu0 %v8921_v46 }
 0x744   : > { %8131 = vmatprep.subr.bf16.mxu1 %v8921_v46  ;;  %v8221_v38 = vpack.c.bf16 %v6562_v40, %v6561_v12 }
 0x746   : > { %8222 = vmatpush3.bf16.msra.mxu0 %v8221_v38 }
 0x747   : > { %8133 = vmatpush3.bf16.msra.mxu1 %v8132_v14  ;;  %v6564_v14 = vld [vmem:[%s11697_s9 + $0x158] sm:$0xff]  ;;  %8223 = vmatprep.subr.bf16.mxu0 %v8921_v46 }
 0x748   : > { %8134 = vmatprep.subr.bf16.mxu1 %v8921_v46 }
 0x79d   : > { %v4706_v8 = vpop.f32.mrb[96].mxu1 }
 0x79e   : > { %v7103_v19 = vpop.f32.mrb[97].mxu1 }
 0x79f   : > { %v6565_v19 = vld [vmem:[%s11697_s9 + $0x160] sm:$0xff] }
 0x7bd   : > { %v4780_v10 = vpop.f32.mrb[98].mxu1 }
 0x7be   : > { %v4784_v29 = vmax.f32 %v4706_v8, %v4780_v10  ;;  %v7138_v55 = vpop.f32.mrb[99].mxu1  ;;  %v8224_v8 = vpack.c.bf16 %v6564_v14, %v6563_v13  ;;  %v6566_v10 = vld [vmem:[%s11697_s9 + $0x168] sm:$0xff] }
 0x7bf   : > { %v8227_v63 = vpack.c.bf16 %v6566_v10, %v6565_v19  ;;  %v6568_v55 = vld [vmem:[%s11697_s9 + $0x178] sm:$0xff] }
 0x7c0   : > { %8225 = vmatpush3.bf16.msra.mxu0 %v8224_v8  ;;  %v6603_v8 = vld [vmem:[%s11697_s9 + $0x230] sm:$0xff]  ;;  %v6604_v19 = vld [vmem:[%s11697_s9 + $0x238] sm:$0xff] }
 0x7c1   : > { %8226 = vmatprep.subr.bf16.mxu0 %v8921_v46  ;;  %v8366_v10 = vpack.c.bf16 %v6604_v19, %v6603_v8  ;;  %v5940_v8 = vld [vmem:[%s11701_s13 + $0x58] sm:$0xff] }
 0x7c4   : > { %8228 = vmatpush3.bf16.msra.mxu0 %v8227_v63  ;;  %v6605_v63 = vld [vmem:[%s11697_s9 + $0x240] sm:$0xff] }
 0x7c5   : > { %8229 = vmatprep.subr.bf16.mxu0 %v8921_v46 }
 0x7dd   : > { %v4872_v37 = vpop.f32.mrb[100].mxu1 }
 0x7de   : > { %v7173_v45 = vpop.f32.mrb[101].mxu1 }
 0x7df   : > { %v5180_v45 = vpop.f32.mrb[64].mxu0 }
 0x7e0   : > { %v7313_v16 = vpop.f32.mrb[65].mxu0 }
 0x7fd   : > { %v4947_v18 = vpop.f32.mrb[102].mxu1 }
 0x7fe   : > { %v4951_v23 = vmax.f32 %v4872_v37, %v4947_v18  ;;  %v7208_v17 = vpop.f32.mrb[103].mxu1 }
 0x800   : > { %7242 = vmatmul.mubr.f32.vlgmr.msra.gmra.mrb[104].mxu1 %v4951_v23 }
 0x801   : > { %8136 = vmatpush3.bf16.msra.mxu1 %v8135_v20  ;;  %7276 = vmatprep.mubr.msk.f32.mxu1 %vm8922_vm5, %v8919_v7 }
 0x802   : > { %8137 = vmatprep.subr.bf16.mxu1 %v8921_v46 }
 0x805   : > { %8139 = vmatpush3.bf16.msra.mxu1 %v8138_v36 }
 0x806   : > { %8140 = vmatprep.subr.bf16.mxu1 %v8921_v46 }
 0x809   : > { %8142 = vmatpush3.bf16.msra.mxu1 %v8141_v44  ;;  %v6575_v44 = vld [vmem:[%s11697_s9 + $0x180] sm:$0xff] }
 0x80a   : > { %8143 = vmatprep.subr.bf16.mxu1 %v8921_v46 }
 0x80d   : > { %8145 = vmatpush3.bf16.msra.mxu1 %v8144_v51  ;;  %v8283_v51 = vpack.c.bf16 %v6576_v47, %v6575_v44  ;;  %v5837_v44 = vld [vmem:[%s11699_s11 + $0x10] sm:$0xff] }
 0x80e   : > { %8146 = vmatprep.subr.bf16.mxu1 %v8921_v46 }
 0x811   : > { %8148 = vmatpush3.bf16.msra.mxu1 %v8147_v53  ;;  %v6579_v53 = vld [vmem:[%s11697_s9 + $0x1a0] sm:$0xff] }
 0x812   : > { %8149 = vmatprep.subr.bf16.mxu1 %v8921_v46  ;;  %v8289_v61 = vpack.c.bf16 %v6580_v21, %v6579_v53  ;;  %v5841_v21 = vld [vmem:[%s11699_s11 + $0x30] sm:$0xff] }
 0x815   : > { %8151 = vmatpush3.bf16.msra.mxu1 %v8150_v62  ;;  %v6581_v62 = vld [vmem:[%s11697_s9 + $0x1b0] sm:$0xff] }
 0x816   : > { %8152 = vmatprep.subr.bf16.mxu1 %v8921_v46  ;;  %v8292_v3 = vpack.c.bf16 %v6582_v2, %v6581_v62  ;;  %v5843_v2 = vld [vmem:[%s11699_s11 + $0x40] sm:$0xff] }
 0x819   : > { %8154 = vmatpush3.bf16.msra.mxu1 %v8153_v28  ;;  %v6583_v28 = vld [vmem:[%s11697_s9 + $0x1c0] sm:$0xff] }
 0x81a   : > { %8155 = vmatprep.subr.bf16.mxu1 %v8921_v46  ;;  %v8295_v25 = vpack.c.bf16 %v6584_v0, %v6583_v28  ;;  %v5845_v0 = vld [vmem:[%s11699_s11 + $0x50] sm:$0xff] }
 0x81d   : > { %8157 = vmatpush3.bf16.msra.mxu1 %v8156_v27  ;;  %v6585_v27 = vld [vmem:[%s11697_s9 + $0x1d0] sm:$0xff] }
 0x81e   : > { %8183 = vmatprep.subr.bf16.mxu1 %v8921_v46 }
 0x820   : > { %7277 = vmatmul.mubr.f32.vlgmr.msra.gmra.mrb[106].mxu1 %v4784_v29  ;;  %v6567_v29 = vld [vmem:[%s11697_s9 + $0x170] sm:$0xff] }
 0x821   : > { %8185 = vmatpush3.bf16.msra.mxu1 %v10944_v1  ;;  %7346 = vmatprep.mubr.msk.f32.mxu1 %vm8922_vm5, %v8919_v7  ;;  %v8230_v37 = vpack.c.bf16 %v6568_v55, %v6567_v29  ;;  %v6606_v29 = vld [vmem:[%s11697_s9 + $0x248] sm:$0xff] }
 0x822   : > { %8186 = vmatprep.subr.bf16.mxu1 %v8921_v46  ;;  %v8369_v55 = vpack.c.bf16 %v6606_v29, %v6605_v63  ;;  %v5942_v63 = vld [vmem:[%s11701_s13 + $0x68] sm:$0xff] }
 0x823   : > { %8231 = vmatpush3.bf16.msra.mxu0 %v8230_v37  ;;  %v6607_v37 = vld [vmem:[%s11697_s9 + $0x250] sm:$0xff] }
 0x824   : > { %8257 = vmatprep.subr.bf16.mxu0 %v8921_v46 }
 0x825   : > { %8188 = vmatpush3.bf16.msra.mxu1 %v10954_v56 }
 0x826   : > { %8189 = vmatprep.subr.bf16.mxu1 %v8921_v46 }
 0x829   : > { %8191 = vmatpush3.bf16.msra.mxu1 %v10964_v24 }
 0x82a   : > { %8192 = vmatprep.subr.bf16.mxu1 %v8921_v46 }
 0x82d   : > { %8194 = vmatpush3.bf16.msra.mxu1 %v10974_v57 }
 0x82e   : > { %8195 = vmatprep.subr.bf16.mxu1 %v8921_v46 }
 0x831   : > { %8197 = vmatpush3.bf16.msra.mxu1 %v10984_v6 }
 0x832   : > { %8198 = vmatprep.subr.bf16.mxu1 %v8921_v46 }
 0x835   : > { %8200 = vmatpush3.bf16.msra.mxu1 %v10994_v42 }
 0x836   : > { %8201 = vmatprep.subr.bf16.mxu1 %v8921_v46 }
 0x839   : > { %8203 = vmatpush3.bf16.msra.mxu1 %v11004_v35 }
 0x83a   : > { %8204 = vmatprep.subr.bf16.mxu1 %v8921_v46 }
 0x83d   : > { %8207 = vmatpush3.bf16.msk.msra.mxu1 %vm10022_vm4, %v11012_v59 }
 0x83e   : > { %8232 = vmatprep.subr.bf16.mxu1 %v8921_v46 }
 0x840   : > { %7347 = vmatmul.mubr.msk.f32.vlgmr.msra.gmra.mrb[108].mxu1 %vm2941_vm1, %v6550_v30  ;;  %v6586_v30 = vld [vmem:[%s11697_s9 + $0x1d8] sm:$0xff] }
 0x841   : > { %8234 = vmatpush3.bf16.msra.mxu1 %v10944_v1  ;;  %7416 = vmatprep.mubr.msk.f32.mxu1 %vm8922_vm5, %v8919_v7  ;;  %v8298_v5 = vpack.c.bf16 %v6586_v30, %v6585_v27 }
 0x842   : > { %8235 = vmatprep.subr.bf16.mxu1 %v8921_v46 }
 0x845   : > { %8237 = vmatpush3.bf16.msra.mxu1 %v10954_v56 }
 0x846   : > { %8238 = vmatprep.subr.bf16.mxu1 %v8921_v46 }
 0x849   : > { %8240 = vmatpush3.bf16.msra.mxu1 %v10964_v24 }
 0x84a   : > { %8241 = vmatprep.subr.bf16.mxu1 %v8921_v46 }
 0x84d   : > { %8243 = vmatpush3.bf16.msra.mxu1 %v10974_v57 }
 0x84e   : > { %8244 = vmatprep.subr.bf16.mxu1 %v8921_v46 }
 0x851   : > { %8246 = vmatpush3.bf16.msra.mxu1 %v10984_v6 }
 0x852   : > { %8247 = vmatprep.subr.bf16.mxu1 %v8921_v46 }
 0x855   : > { %8249 = vmatpush3.bf16.msra.mxu1 %v10994_v42 }
 0x856   : > { %8250 = vmatprep.subr.bf16.mxu1 %v8921_v46 }
 0x859   : > { %8252 = vmatpush3.bf16.msra.mxu1 %v11004_v35 }
 0x85a   : > { %8253 = vmatprep.subr.bf16.mxu1 %v8921_v46 }
 0x85d   : > { %8256 = vmatpush3.bf16.msk.msra.mxu1 %vm10022_vm4, %v11012_v59 }
 0x85e   : > { %8282 = vmatprep.subr.bf16.mxu1 %v8921_v46 }
 0x860   : > { %7417 = vmatmul.mubr.msk.f32.vlgmr.msra.gmra.mrb[110].mxu1 %vm2941_vm1, %v6569_v49  ;;  %v6609_v49 = vld [vmem:[%s11697_s9 + $0x260] sm:$0xff] }
 0x861   : > { %7486 = vmatprep.mubr.msk.f32.mxu1 %vm8922_vm5, %v8919_v7  ;;  %8284 = vmatpush3.bf16.msra.mxu1 %v8283_v51  ;;  %v8384_v51 = vpack.c.bf16 %v5838_v50, %v5837_v44 }
 0x862   : > { %8285 = vmatprep.subr.bf16.mxu1 %v8921_v46 }
 0x865   : > { %8287 = vmatpush3.bf16.msra.mxu1 %v8286_v54  ;;  %v5840_v54 = vld [vmem:[%s11699_s11 + $0x28] sm:$0xff] }
 0x866   : > { %8288 = vmatprep.subr.bf16.mxu1 %v8921_v46  ;;  %v8387_v53 = vpack.c.bf16 %v5840_v54, %v5839_v52 }
 0x869   : > { %8290 = vmatpush3.bf16.msra.mxu1 %v8289_v61  ;;  %v5842_v61 = vld [vmem:[%s11699_s11 + $0x38] sm:$0xff] }
 0x86a   : > { %8291 = vmatprep.subr.bf16.mxu1 %v8921_v46  ;;  %v8390_v62 = vpack.c.bf16 %v5842_v61, %v5841_v21 }
 0x86d   : > { %8293 = vmatpush3.bf16.msra.mxu1 %v8292_v3  ;;  %v5844_v3 = vld [vmem:[%s11699_s11 + $0x48] sm:$0xff] }
 0x86e   : > { %8294 = vmatprep.subr.bf16.mxu1 %v8921_v46  ;;  %v8393_v28 = vpack.c.bf16 %v5844_v3, %v5843_v2 }
 0x871   : > { %8296 = vmatpush3.bf16.msra.mxu1 %v8295_v25  ;;  %v5846_v25 = vld [vmem:[%s11699_s11 + $0x58] sm:$0xff] }
 0x872   : > { %8297 = vmatprep.subr.bf16.mxu1 %v8921_v46  ;;  %v8396_v27 = vpack.c.bf16 %v5846_v25, %v5845_v0 }
 0x875   : > { %8299 = vmatpush3.bf16.msra.mxu1 %v8298_v5 }
 0x876   : > { %8300 = vmatprep.subr.bf16.mxu1 %v8921_v46 }
 0x879   : > { %8302 = vmatpush3.bf16.msra.mxu1 %v8301_v9 }
 0x87a   : > { %8303 = vmatprep.subr.bf16.mxu1 %v8921_v46 }
 0x87d   : > { %8305 = vmatpush3.bf16.msra.mxu1 %v8304_v41  ;;  %v5848_v41 = vld [vmem:[%s11699_s11 + $0x68] sm:$0xff] }
 0x87e   : > { %8331 = vmatprep.subr.bf16.mxu1 %v8921_v46 }
 0x8d3   : > { %v5035_v18 = vpop.f32.mrb[104].mxu1 }
 0x8d4   : > { %v7243_v20 = vpop.f32.mrb[105].mxu1 }
 0x8f3   : > { %v5105_v23 = vpop.f32.mrb[106].mxu1 }
 0x8f4   : > { %v11326_v17 = vadd.f32 %v5105_v23, %v5035_v18  ;;  %v7278_v26 = vpop.f32.mrb[107].mxu1  ;;  %v6610_v18 = vld [vmem:[%s11697_s9 + $0x268] sm:$0xff]  ;;  %v6611_v23 = vld [vmem:[%s11697_s9 + $0x270] sm:$0xff] }
 0x8f5   : > { %v8375_v20 = vpack.c.bf16 %v6610_v18, %v6609_v49 }
 0x913   : > { %v5255_v33 = vpop.f32.mrb[108].mxu1 }
 0x914   : > { %v5259_v36 = vmax.f32 %v5180_v45, %v5255_v33  ;;  %v7348_v39 = vpop.f32.mrb[109].mxu1  ;;  %v6608_v45 = vld [vmem:[%s11697_s9 + $0x258] sm:$0xff] }
 0x915   : > { %v8372_v16 = vpack.c.bf16 %v6608_v45, %v6607_v37  ;;  %v5835_v39 = vld [vmem:[%s11699_s11] sm:$0xff] }
 0x916   : > { %7382 = vmatmul.mubr.f32.vlgmr.msra.gmra.mrb[66].mxu0 %v5259_v36  ;;  %v6613_v37 = vld [vmem:[%s11698_s10] ss:$0 sm:$0xff] }
 0x917   : > { %8259 = vmatpush3.bf16.msra.mxu0 %v10944_v1  ;;  %7451 = vmatprep.mubr.msk.f32.mxu0 %vm8922_vm5, %v8919_v7 }
 0x918   : > { %8260 = vmatprep.subr.bf16.mxu0 %v8921_v46 }
 0x91b   : > { %8262 = vmatpush3.bf16.msra.mxu0 %v10954_v56 }
 0x91c   : > { %8263 = vmatprep.subr.bf16.mxu0 %v8921_v46 }
 0x91f   : > { %8265 = vmatpush3.bf16.msra.mxu0 %v10964_v24 }
 0x920   : > { %8266 = vmatprep.subr.bf16.mxu0 %v8921_v46 }
 0x923   : > { %8268 = vmatpush3.bf16.msra.mxu0 %v10974_v57 }
 0x924   : > { %8269 = vmatprep.subr.bf16.mxu0 %v8921_v46 }
 0x927   : > { %8271 = vmatpush3.bf16.msra.mxu0 %v10984_v6 }
 0x928   : > { %8272 = vmatprep.subr.bf16.mxu0 %v8921_v46 }
 0x92b   : > { %8274 = vmatpush3.bf16.msra.mxu0 %v10994_v42 }
 0x92c   : > { %8275 = vmatprep.subr.bf16.mxu0 %v8921_v46 }
 0x92f   : > { %8277 = vmatpush3.bf16.msra.mxu0 %v11004_v35 }
 0x930   : > { %8278 = vmatprep.subr.bf16.mxu0 %v8921_v46 }
 0x933   : > { %8281 = vmatpush3.bf16.msk.msra.mxu0 %vm10022_vm4, %v11012_v59  ;;  %v5419_v60 = vpop.f32.mrb[110].mxu1 }
 0x934   : > { %8306 = vmatprep.subr.bf16.mxu0 %v8921_v46  ;;  %v7418_v15 = vpop.f32.mrb[111].mxu1 }
 0x935   : > { %v5849_v15 = vld [vmem:[%s11699_s11 + $0x70] sm:$0xff] }
 0x936   : > { %7452 = vmatmul.mubr.msk.f32.vlgmr.msra.gmra.mrb[68].mxu0 %vm2941_vm1, %v6572_v43  ;;  %v5836_v43 = vld [vmem:[%s11699_s11 + $0x8] sm:$0xff] }
 0x937   : > { %8308 = vmatpush3.bf16.msra.mxu0 %v10944_v1  ;;  %7521 = vmatprep.mubr.msk.f32.mxu0 %vm8922_vm5, %v8919_v7  ;;  %v8381_v47 = vpack.c.bf16 %v5836_v43, %v5835_v39  ;;  %v6615_v43 = vld [vmem:[%s11702_s14] ss:$0 sm:$0xff] }
 0x938   : > { %8309 = vmatprep.subr.bf16.mxu0 %v8921_v46 }
 0x93b   : > { %8311 = vmatpush3.bf16.msra.mxu0 %v10954_v56 }
 0x93c   : > { %8312 = vmatprep.subr.bf16.mxu0 %v8921_v46 }
 0x93f   : > { %8314 = vmatpush3.bf16.msra.mxu0 %v10964_v24 }
 0x940   : > { %8315 = vmatprep.subr.bf16.mxu0 %v8921_v46 }
 0x943   : > { %8317 = vmatpush3.bf16.msra.mxu0 %v10974_v57 }
 0x944   : > { %8318 = vmatprep.subr.bf16.mxu0 %v8921_v46 }
 0x947   : > { %8320 = vmatpush3.bf16.msra.mxu0 %v10984_v6 }
 0x948   : > { %8321 = vmatprep.subr.bf16.mxu0 %v8921_v46 }
 0x94b   : > { %8323 = vmatpush3.bf16.msra.mxu0 %v10994_v42 }
 0x94c   : > { %8324 = vmatprep.subr.bf16.mxu0 %v8921_v46 }
 0x94f   : > { %8326 = vmatpush3.bf16.msra.mxu0 %v11004_v35 }
 0x950   : > { %8327 = vmatprep.subr.bf16.mxu0 %v8921_v46 }
 0x953   : > { %8330 = vmatpush3.bf16.msk.msra.mxu0 %vm10022_vm4, %v11012_v59 }
 0x954   : > { %8356 = vmatprep.subr.bf16.mxu0 %v8921_v46 }
 0x956   : > { %7522 = vmatmul.mubr.msk.f32.vlgmr.msra.gmra.mrb[70].mxu0 %vm2941_vm1, %v6591_v58 }
 0x957   : > { %7591 = vmatprep.mubr.msk.f32.mxu0 %vm8922_vm5, %v8919_v7 }
 0x9e9   : > { %v5343_v48 = vpop.f32.mrb[66].mxu0 }
 0x9ea   : > { %v11435_v11 = vadd.f32 %v5343_v48, %v11326_v17  ;;  %v7383_v12 = vpop.f32.mrb[67].mxu0  ;;  %v6612_v17 = vld [vmem:[%s11697_s9 + $0x278] sm:$0xff]  ;;  %v5929_v48 = vld [vmem:[%s11701_s13] sm:$0xff] }
 0x9eb   : > { %v8378_v33 = vpack.c.bf16 %v6612_v17, %v6611_v23  ;;  %v5931_v12 = vld [vmem:[%s11701_s13 + $0x10] sm:$0xff]  ;;  %v6614_v17 = vld [vmem:[%s11700_s12] ss:$0 sm:$0xff] }
 0xa09   : > { %v5494_v40 = vpop.f32.mrb[68].mxu0 }
 0xa0a   : > { %v5498_v38 = vmax.f32 %v5419_v60, %v5494_v40  ;;  %v7453_v13 = vpop.f32.mrb[69].mxu0  ;;  %v8399_v60 = vpack.c.bf16 %v5848_v41, %v5847_v22 }
 0xa0c   : > { %7487 = vmatmul.mubr.f32.vlgmr.msra.gmra.mrb[112].mxu1 %v5498_v38  ;;  %v5932_v38 = vld [vmem:[%s11701_s13 + $0x18] sm:$0xff] }
 0xa0d   : > { %8333 = vmatpush3.bf16.msra.mxu1 %v10944_v1  ;;  %7556 = vmatprep.mubr.msk.f32.mxu1 %vm8922_vm5, %v8919_v7  ;;  %v6594_v1 = vld [vmem:[%s11696_s8 + $0x20] sm:$0xff]  ;;  %v8408_v13 = vpack.c.bf16 %v5932_v38, %v5931_v12 }
 0xa0e   : > { %8334 = vmatprep.subr.bf16.mxu1 %v8921_v46 }
 0xa11   : > { %8336 = vmatpush3.bf16.msra.mxu1 %v10954_v56  ;;  %v6597_v56 = vld [vmem:[%s11697_s9 + $0x200] sm:$0xff] }
 0xa12   : > { %8337 = vmatprep.subr.bf16.mxu1 %v8921_v46 }
 0xa15   : > { %8339 = vmatpush3.bf16.msra.mxu1 %v10964_v24  ;;  %v6599_v24 = vld [vmem:[%s11697_s9 + $0x210] sm:$0xff] }
 0xa16   : > { %8340 = vmatprep.subr.bf16.mxu1 %v8921_v46 }
 0xa19   : > { %8342 = vmatpush3.bf16.msra.mxu1 %v10974_v57  ;;  %v8357_v57 = vpack.c.bf16 %v6598_v4, %v6597_v56  ;;  %v5934_v56 = vld [vmem:[%s11701_s13 + $0x28] sm:$0xff] }
 0xa1a   : > { %8343 = vmatprep.subr.bf16.mxu1 %v8921_v46 }
 0xa1b   : > { %8358 = vmatpush3.bf16.msra.mxu0 %v8357_v57  ;;  %v5936_v57 = vld [vmem:[%s11701_s13 + $0x38] sm:$0xff] }
 0xa1c   : > { %8359 = vmatprep.subr.bf16.mxu0 %v8921_v46 }
 0xa1d   : > { %8345 = vmatpush3.bf16.msra.mxu1 %v10984_v6  ;;  %v6600_v6 = vld [vmem:[%s11697_s9 + $0x218] sm:$0xff] }
 0xa1e   : > { %8346 = vmatprep.subr.bf16.mxu1 %v8921_v46 }
 0xa21   : > { %8348 = vmatpush3.bf16.msra.mxu1 %v10994_v42  ;;  %v8360_v42 = vpack.c.bf16 %v6600_v6, %v6599_v24  ;;  %v5935_v24 = vld [vmem:[%s11701_s13 + $0x30] sm:$0xff] }
 0xa22   : > { %8349 = vmatprep.subr.bf16.mxu1 %v8921_v46  ;;  %v8414_v6 = vpack.c.bf16 %v5936_v57, %v5935_v24 }
 0xa23   : > { %8361 = vmatpush3.bf16.msra.mxu0 %v8360_v42  ;;  %v5937_v42 = vld [vmem:[%s11701_s13 + $0x40] sm:$0xff] }
 0xa24   : > { %8362 = vmatprep.subr.bf16.mxu0 %v8921_v46 }
 0xa25   : > { %8351 = vmatpush3.bf16.msra.mxu1 %v11004_v35  ;;  %v6601_v35 = vld [vmem:[%s11697_s9 + $0x220] sm:$0xff] }
 0xa26   : > { %8352 = vmatprep.subr.bf16.mxu1 %v8921_v46 }
 0xa29   : > { %8355 = vmatpush3.bf16.msk.msra.mxu1 %vm10022_vm4, %v11012_v59  ;;  %v6602_v59 = vld [vmem:[%s11697_s9 + $0x228] sm:$0xff]  ;;  %v5658_v26 = vpop.f32.mrb[70].mxu0 }
 0xa2a   : > { %8380 = vmatprep.subr.bf16.mxu1 %v8921_v46  ;;  %v8363_v14 = vpack.c.bf16 %v6602_v59, %v6601_v35  ;;  %v7523_v36 = vpop.f32.mrb[71].mxu0  ;;  %v5938_v35 = vld [vmem:[%s11701_s13 + $0x48] sm:$0xff] }
 0xa2b   : > { %v8417_v59 = vpack.c.bf16 %v5938_v35, %v5937_v42 }
 0xa2c   : > { %7557 = vmatmul.mubr.msk.f32.vlgmr.msra.gmra.mrb[114].mxu1 %vm2941_vm1, %v6594_v1  ;;  %8364 = vmatpush3.bf16.msra.mxu0 %v8363_v14  ;;  %v5933_v1 = vld [vmem:[%s11701_s13 + $0x20] sm:$0xff]  ;;  %v5939_v14 = vld [vmem:[%s11701_s13 + $0x50] sm:$0xff] }
 0xa2d   : > { %7626 = vmatprep.mubr.msk.f32.mxu1 %vm8922_vm5, %v8919_v7  ;;  %8365 = vmatprep.subr.bf16.mxu0 %v8921_v46  ;;  %v8411_v4 = vpack.c.bf16 %v5934_v56, %v5933_v1  ;;  %v8420_v19 = vpack.c.bf16 %v5940_v8, %v5939_v14 }
 0xa2e   : > { %8382 = vmatpush3.bf16.msra.mxu1 %v8381_v47 }
 0xa2f   : > { %8383 = vmatprep.subr.bf16.mxu1 %v8921_v46 }
 0xa30   : > { %8367 = vmatpush3.bf16.msra.mxu0 %v8366_v10  ;;  %v5941_v10 = vld [vmem:[%s11701_s13 + $0x60] sm:$0xff] }
 0xa31   : > { %8368 = vmatprep.subr.bf16.mxu0 %v8921_v46  ;;  %v8423_v29 = vpack.c.bf16 %v5942_v63, %v5941_v10 }
 0xa32   : > { %8385 = vmatpush3.bf16.msra.mxu1 %v8384_v51 }
 0xa33   : > { %8386 = vmatprep.subr.bf16.mxu1 %v8921_v46 }
 0xa34   : > { %8370 = vmatpush3.bf16.msra.mxu0 %v8369_v55 }
 0xa35   : > { %8371 = vmatprep.subr.bf16.mxu0 %v8921_v46 }
 0xa36   : > { %8388 = vmatpush3.bf16.msra.mxu1 %v8387_v53 }
 0xa37   : > { %8389 = vmatprep.subr.bf16.mxu1 %v8921_v46 }
 0xa38   : > { %8373 = vmatpush3.bf16.msra.mxu0 %v8372_v16 }
 0xa39   : > { %8374 = vmatprep.subr.bf16.mxu0 %v8921_v46 }
 0xa3a   : > { %8391 = vmatpush3.bf16.msra.mxu1 %v8390_v62 }
 0xa3b   : > { %8392 = vmatprep.subr.bf16.mxu1 %v8921_v46 }
 0xa3c   : > { %8376 = vmatpush3.bf16.msra.mxu0 %v8375_v20  ;;  %v5943_v20 = vld [vmem:[%s11701_s13 + $0x70] sm:$0xff] }
 0xa3d   : > { %8377 = vmatprep.subr.bf16.mxu0 %v8921_v46 }
 0xa3e   : > { %8394 = vmatpush3.bf16.msra.mxu1 %v8393_v28 }
 0xa3f   : > { %8395 = vmatprep.subr.bf16.mxu1 %v8921_v46 }
 0xa40   : > { %8379 = vmatpush3.bf16.msra.mxu0 %v8378_v33 }
 0xa41   : > { %8404 = vmatprep.subr.bf16.mxu0 %v8921_v46 }
 0xa42   : > { %8397 = vmatpush3.bf16.msra.mxu1 %v8396_v27 }
 0xa43   : > { %8398 = vmatprep.subr.bf16.mxu1 %v8921_v46 }
 0xa46   : > { %8400 = vmatpush3.bf16.msra.mxu1 %v8399_v60 }
 0xa47   : > { %8401 = vmatprep.subr.bf16.mxu1 %v8921_v46 }
 0xadf   : > { %v5582_v30 = vpop.f32.mrb[112].mxu1 }
 0xae0   : > { %v5586_v5 = vadd.f32 %v5582_v30, %v11435_v11  ;;  %v7488_v31 = vpop.f32.mrb[113].mxu1  ;;  %v5930_v11 = vld [vmem:[%s11701_s13 + $0x8] sm:$0xff] }
 0xae1   : > { %v8405_v40 = vpack.c.bf16 %v5930_v11, %v5929_v48 }
 0xaff   : > { %v5733_v32 = vpop.f32.mrb[114].mxu1 }
 0xb00   : > { %v5737_v9 = vmax.f32 %v5658_v26, %v5733_v32  ;;  %v7558_v34 = vpop.f32.mrb[115].mxu1 }
 0xb02   : > { %7592 = vmatmul.mubr.f32.vlgmr.msra.gmra.mrb[72].mxu0 %v5737_v9 }
 0xb03   : > { %7661 = vmatprep.mubr.msk.f32.mxu0 %vm8922_vm5, %v8919_v7  ;;  %v5850_v7 = vld [vmem:[%s11699_s11 + $0x78] sm:$0xff]  ;;  %8406 = vmatpush3.bf16.msra.mxu0 %v8405_v40 }
 0xb04   : > { %v8402_v58 = vpack.c.bf16 %v5850_v7, %v5849_v15  ;;  %8407 = vmatprep.subr.bf16.mxu0 %v8921_v46 }
 0xb06   : > { %8403 = vmatpush3.bf16.msra.mxu1 %v8402_v58 }
 0xb07   : > { %8409 = vmatpush3.bf16.msra.mxu0 %v8408_v13 }
 0xb08   : > { %8410 = vmatprep.subr.bf16.mxu0 %v8921_v46 }
 0xb0b   : > { %8412 = vmatpush3.bf16.msra.mxu0 %v8411_v4 }
 0xb0c   : > { %8413 = vmatprep.subr.bf16.mxu0 %v8921_v46 }
 0xb0f   : > { %8415 = vmatpush3.bf16.msra.mxu0 %v8414_v6 }
 0xb10   : > { %8416 = vmatprep.subr.bf16.mxu0 %v8921_v46 }
 0xb13   : > { %8418 = vmatpush3.bf16.msra.mxu0 %v8417_v59 }
 0xb14   : > { %8419 = vmatprep.subr.bf16.mxu0 %v8921_v46 }
 0xb17   : > { %8421 = vmatpush3.bf16.msra.mxu0 %v8420_v19 }
 0xb18   : > { %8422 = vmatprep.subr.bf16.mxu0 %v8921_v46 }
 0xb1b   : > { %8424 = vmatpush3.bf16.msra.mxu0 %v8423_v29 }
 0xb1c   : > { %8425 = vmatprep.subr.bf16.mxu0 %v8921_v46  ;;  %v5944_v46 = vld [vmem:[%s11701_s13 + $0x78] sm:$0xff] }
 0xb1d   : > { %v8426_v23 = vpack.c.bf16 %v5944_v46, %v5943_v20 }
 0xb1f   : > { %8427 = vmatpush3.bf16.msra.mxu0 %v8426_v23 }
 0xbd5   : > { %v5821_v55 = vpop.f32.mrb[72].mxu0 }
 0xbd6   : > { %v5825_v45 = vadd.f32 %v5821_v55, %v5586_v5  ;;  %v7593_v16 = vpop.f32.mrb[73].mxu0 }
 0xbd8   : > { %v5833_v49 = vadd.f32 %v6613_v37, %v5825_v45 }
 0xbda   : > { %v5834_v18 = vmax.f32 %v5833_v49, 0.0 }
 0xbdc   : > { %7627 = vmatmul.mubr.f32.vlgmr.msra.gmra.mrb[116].mxu1 %v5834_v18 }
 0xcaf   : > { %v5924_v26 = vpop.f32.mrb[116].mxu1 }
 0xcb0   : > { %v5925_v33 = vadd.f32 %v6614_v17, %v5924_v26  ;;  %v7628_v36 = vpop.f32.mrb[117].mxu1 }
 0xcb2   : > { %v5928_v39 = vmax.f32 %v5925_v33, 0.0 }
 0xcb4   : > { %7662 = vmatmul.mubr.f32.vlgmr.msra.gmra.mrb[74].mxu0 %v5928_v39 }
 0xd87   : > { %v6018_v44 = vpop.f32.mrb[74].mxu0 }
 0xd88   : > { %v6019_v47 = vadd.f32 %v6615_v43, %v6018_v44  ;;  %v7663_v50 = vpop.f32.mrb[75].mxu0 }
 0xd8a   : > { %6022 = vst [vmem:[%s488_s18] sm:$0xff] %v6019_v47 }
 0xd8b   : > { %8868 = shalt.err (!%p8865_p3)
}
 0xd8c   : > { %s8869_s23 = scalar_lea.hbm %s11646_s27, 128  ;;  %s8873_s18 = scalar_lea.hbm %s11703_s15, 256 }
 0xd8d   : > { %p8870_p4 = scmp.ne.s32.totalorder %s11646_s27, %s8869_s23  ;;  %p8874_p9 = scmp.lt.u32.totalorder %s11646_s27, %s11703_s15 }
 0xd8e   : > { %p8875_p10 = scmp.lt.u32.totalorder %s8873_s18, %s8869_s23  ;;  %p8877_p12 = scmp.lt.u32.totalorder %s8869_s23, %s11646_s27 }
 0xd8f   : > { %p8871_p7 = pnand %p8870_p4, %p9042_p5 }
 0xd90   : > { %p8876_p11 = por %p8875_p10, %p8874_p9 }
 0xd91   : > { %p8872_p8 = pneg %p8871_p7 }
 0xd92   : > { %p8878_p13 = por %p8877_p12, %p8876_p11 }
 0xd94   : > { %p8879_p0 = pnand %p8878_p13, %p8872_p8 }
 0xd96   : > { %8882 = shalt.err (!%p8879_p0)
}
 0xd97   : > { %8812 = dma.vmem_to_hbm [thread:$0]  (%p9042_p5), %s11648_s16, 128, %s11646_s27, %s6024_s17  }
 0xd98 PF: > { %s11720_s24 = sld [smem:[#allocation8_spill]]  ;;  %s11721_s22 = sld [smem:[#allocation6_spill]] }
 0xd9e   : > { %p8818_p1 = scmp.ge.s32.totalorder %s11720_s24, 2  ;;  %s6049_s26 = sand.u32 1, %s11721_s22  }
 0xd9f   : > { %s6050_s30 = scalar_lea.sflag [#allocation4], %s6049_s26 }
 0xda0   : > { %p8815_p2 = pnand %p8818_p1, %p9046_p6 }
 0xda2   : > { %8900 = dma.done.wait (!%p8815_p2), %s6050_s30, 128  }
 0xda3   : > { %8902 = vsyncadd (!%p8815_p2), %s6050_s30, 4294967168  ;;  %s11723_s21 = sld [smem:[#allocation9_spill]]  ;;  %s11724_s23 = sld [smem:[#allocation7_spill]] }
 0xda4   : > { %s11725_s20 = sld [smem:[#allocation10_spill]]  ;;  %s11726_s18 = smov %s8909_s19 }
 0xda9   : > { %p25_p3 = scmp.ge.s32.totalorder %s11723_s21, 4   ;;  %s11727_s19 = smov %s11724_s23 }
 0xdab   :  { %27 = sbr.rel (!%p25_p3) target bundleno = 3 (0x3), region = 135 }
 0xdb2   :  { %6055 = vsyncpa [#allocation4], 1 }
 0xdb3   :  { %6057 = vsyncpa [#allocation4 + $0x1], 1 }

</bundles_post_ra>
